<compile_context>
chip_gen: v6e
topology: v6e:2x2x1
jax: 0.10.0
libtpu: 0.0.40
codegen_flags: <defaults>
</compile_context>

<pallas_src>
import functools

import jax
import jax.numpy as jnp
from jax import lax
from jax.experimental import pallas as pl
from jax.experimental.pallas import tpu as pltpu

_MIB = 1024 * 1024


def spatial_attention_kernel(x_ref, wqkv_ref, wproj_ref, bproj_ref, o_ref,
                             ctx_ref, *, batch_tile, seq_len, num_heads, scale,
                             key_tile):
    cdt = x_ref.dtype                       # native MXU dtype (no f32 upcast)
    Bt, N, H, Tk = batch_tile, seq_len, num_heads, key_tile
    C = x_ref.shape[-1]
    D = C // H
    M = Bt * N                              # batch-fused MXU M dimension
    n_kt = N // Tk

    x = x_ref[...]                          # (M, C)   native dtype
    wqkv = wqkv_ref[...]                    # (C, 3C)  native dtype

    # qkv projection (qkv_bias=False), f32 accumulation on the MXU.
    qkv = jnp.dot(x, wqkv, preferred_element_type=jnp.float32)       # (M, 3C)

    # Fold the softmax scale into q once ((M, C) multiply instead of (N, N)
    # per head), then drop back to the native MXU dtype.
    q_all = (qkv[:, 0 * C:1 * C] * scale).astype(cdt).reshape(Bt, N, C)
    k_all = qkv[:, 1 * C:2 * C].astype(cdt).reshape(Bt, N, C)
    v_all = qkv[:, 2 * C:3 * C].astype(cdt).reshape(Bt, N, C)

    # Per-head attention; each head's output lands in its lane slice of the
    # (M, C) context scratch -- the head "concat" costs only the stores, and
    # the output projection below runs once with full K = C depth.
    for h in range(H):
        sl = slice(h * D, (h + 1) * D)
        q_h = q_all[:, :, sl]               # (Bt, N, D)
        k_h = k_all[:, :, sl]               # (Bt, N, D)
        v_h = v_all[:, :, sl]               # (Bt, N, D)

        if n_kt == 1:
            # Single key tile: plain numerically-stable softmax.
            s = lax.dot_general(
                q_h, k_h, (((2,), (2,)), ((0,), (0,))),
                preferred_element_type=jnp.float32)                  # (Bt,N,N)
            m = jnp.max(s, axis=-1, keepdims=True)
            p = jnp.exp(s - m)
            l = jnp.sum(p, axis=-1, keepdims=True)
            out_h = lax.dot_general(
                p.astype(cdt), v_h, (((2,), (1,)), ((0,), (0,))),
                preferred_element_type=jnp.float32)                  # (Bt,N,D)
        else:
            # Key-tiled online softmax: bounds f32 score/exp temporaries to
            # (Bt, N, Tk).  Static unroll (Tk, n_kt are compile-time).
            m = jnp.full((Bt, N, 1), -jnp.inf, jnp.float32)
            l = jnp.zeros((Bt, N, 1), jnp.float32)
            out_h = jnp.zeros((Bt, N, D), jnp.float32)
            for t in range(n_kt):
                ks = slice(t * Tk, (t + 1) * Tk)
                k_t = k_h[:, ks, :]                                  # (Bt,Tk,D)
                v_t = v_h[:, ks, :]
                s = lax.dot_general(
                    q_h, k_t, (((2,), (2,)), ((0,), (0,))),
                    preferred_element_type=jnp.float32)              # (Bt,N,Tk)
                m_new = jnp.maximum(m, jnp.max(s, axis=-1, keepdims=True))
                alpha = jnp.exp(m - m_new)
                p = jnp.exp(s - m_new)
                l = alpha * l + jnp.sum(p, axis=-1, keepdims=True)
                out_h = alpha * out_h + lax.dot_general(
                    p.astype(cdt), v_t, (((2,), (1,)), ((0,), (0,))),
                    preferred_element_type=jnp.float32)
                m = m_new

        # Normalize (reciprocal on the otherwise-idle EUP slot) and store the
        # head output into its lane slice of the context scratch.
        out_h = out_h * pl.reciprocal(l, approx=True)                # (Bt,N,D)
        ctx_ref[:, sl] = out_h.reshape(M, D).astype(cdt)

    # Single full-depth output projection + bias.  proj_drop / attn_drop are
    # identity (p = 0.0 / eval).
    o_ref[...] = (jnp.dot(ctx_ref[...], wproj_ref[...],
                          preferred_element_type=jnp.float32)
                  + bproj_ref[...].astype(jnp.float32)).astype(o_ref.dtype)


def _vmem_limit_bytes():
    """Generation-aware scoped-VMEM limit (review opt #4)."""
    try:
        phys = pltpu.get_tpu_info().vmem_capacity_bytes
    except Exception:
        phys = 64 * _MIB                    # conservative (v7x-class) default
    if phys >= 100 * _MIB:                  # v5e / v6e: 128 MiB physical
        return 64 * _MIB
    return min(48 * _MIB, (phys * 3) // 4)  # v7x: 64 MiB physical, keep headroom


def _pick_batch_tile(B, N, C, head_dim, itemsize, vmem_budget, weight_bytes,
                     m_target=512):
    """Smallest legal batch tile meeting the MXU M target, within VMEM."""
    tk_est = min(N, 512)
    per_b = (N * C * (8 * itemsize + 12)    # x/out dbl-buffers, ctx, q/k/v, f32 qkv
             + 3 * N * tk_est * 4           # f32 scores / exp temporaries
             + 2 * N * head_dim * 4)        # per-head f32 accumulator
    max_bt_mem = max(1, (vmem_budget - weight_bytes) // per_b)
    feasible = [c for c in range(1, B + 1)
                if B % c == 0 and (c == B or (c * N) % 8 == 0)]
    # Smallest feasible tile that already fills the MXU M target: keeps the
    # grid as long as possible (megacore sharding / pipeline overlap).
    for c in feasible:
        if c * N >= m_target and c <= max_bt_mem:
            return c
    within = [c for c in feasible if c <= max_bt_mem]
    return max(within) if within else min(feasible)


def _pick_key_tile(N, batch_tile):
    """Bound per-head f32 score/exp temporaries to a few MiB (review opt #5)."""
    budget = 4 * _MIB
    if batch_tile * N * N * 4 <= budget:
        return N
    max_tk = max(128, budget // (4 * batch_tile * N))
    divisors = [d for d in range(128, min(N, max_tk) + 1) if N % d == 0]
    # TODO(synk): masked tail handling would allow non-divisor key tiles.
    return max(divisors) if divisors else N


def spatial_attention(x, w_qkv, w_proj, b_proj, *, num_heads, qk_scale=None,
                      batch_tile=None, key_tile=None, mxu_dtype=None):
    B, N, C = x.shape
    assert C % num_heads == 0
    D = C // num_heads
    scale = qk_scale if qk_scale is not None else D ** (-0.5)

    orig_dtype = x.dtype
    if mxu_dtype is not None:
        # bf16 MXU fast path for f32 callers (f32 accumulation kept in-kernel).
        x, w_qkv, w_proj, b_proj = (a.astype(mxu_dtype)
                                    for a in (x, w_qkv, w_proj, b_proj))

    itemsize = jnp.dtype(x.dtype).itemsize
    w_itemsize = jnp.dtype(w_qkv.dtype).itemsize
    weight_bytes = (w_qkv.size + w_proj.size + b_proj.size) * w_itemsize
    vmem_limit = _vmem_limit_bytes()

    if batch_tile is None:
        batch_tile = _pick_batch_tile(B, N, C, D, itemsize,
                                      vmem_budget=vmem_limit // 2,
                                      weight_bytes=weight_bytes)
    assert B % batch_tile == 0
    assert batch_tile == B or (batch_tile * N) % 8 == 0, \
        "batch_tile*N must be a multiple of 8 when the batch axis is tiled"
    M = batch_tile * N
    grid = (B // batch_tile,)

    if key_tile is None:
        key_tile = _pick_key_tile(N, batch_tile)
    assert N % key_tile == 0

    # 2-D lane-dense views of the activations (wrapper-side reshape is free
    # layout plumbing; for real C >= 128 the output stores are unmasked vst).
    x2d = x.reshape(B * N, C)
    b2d = b_proj.reshape(1, C)

    kernel = functools.partial(
        spatial_attention_kernel,
        batch_tile=batch_tile, seq_len=N, num_heads=num_heads, scale=scale,
        key_tile=key_tile)

    flops = (2 * B * N * C * (3 * C)                 # qkv projection
             + 2 * B * num_heads * N * N * D * 2     # scores + attn @ v
             + 2 * B * N * C * C)                    # output projection
    bytes_accessed = (x.size * itemsize + weight_bytes + B * N * C * itemsize)
    cost = pl.CostEstimate(flops=flops,
                           transcendentals=B * num_heads * N * N,
                           bytes_accessed=bytes_accessed)

    def _call(buffer_weights):
        def wspec(shape):
            if buffer_weights:
                # Grid-invariant blocks: single-buffer to reclaim VMEM.
                return pl.BlockSpec(shape, lambda b: (0,) * len(shape),
                                    pipeline_mode=pl.Buffered(1))
            return pl.BlockSpec(shape, lambda b: (0,) * len(shape))

        return pl.pallas_call(
            kernel,
            out_shape=jax.ShapeDtypeStruct((B * N, C), x.dtype),
            grid_spec=pltpu.PrefetchScalarGridSpec(
                num_scalar_prefetch=0,
                grid=grid,
                in_specs=[
                    pl.BlockSpec((M, C), lambda b: (b, 0)),   # x (batch-fused M)
                    wspec((C, 3 * C)),                        # w_qkv
                    wspec((C, C)),                            # w_proj
                    wspec((1, C)),                            # b_proj
                ],
                out_specs=pl.BlockSpec((M, C), lambda b: (b, 0)),
                scratch_shapes=[pltpu.VMEM((M, C), x.dtype)],  # head-concat ctx
            ),
            compiler_params=pltpu.CompilerParams(
                dimension_semantics=("parallel",),
                vmem_limit_bytes=vmem_limit),
            cost_estimate=cost,
        )(x2d, w_qkv, w_proj, b2d)

    try:
        out2d = _call(True)
    except Exception:
        # Fallback: default double-buffering of the weight tiles.
        out2d = _call(False)

    return out2d.reshape(B, N, C).astype(orig_dtype)


def spatial_attention_ref(x, w_qkv, w_proj, b_proj, *, num_heads, qk_scale=None):
    """Pure-JAX reference mirroring the PyTorch forward (f32)."""
    B, N, C = x.shape
    D = C // num_heads
    scale = qk_scale if qk_scale is not None else D ** (-0.5)
    x, w_qkv, w_proj, b_proj = (a.astype(jnp.float32)
                                for a in (x, w_qkv, w_proj, b_proj))
    qkv = x @ w_qkv                                     # (B, N, 3C)
    qkv = qkv.reshape(B, N, 3, num_heads, D).transpose(2, 0, 3, 1, 4)
    q, k, v = qkv[0], qkv[1], qkv[2]                    # (B, H, N, D)
    attn = jnp.einsum('bhnd,bhmd->bhnm', q, k) * scale
    attn = jax.nn.softmax(attn, axis=-1)
    out = jnp.einsum('bhnm,bhmd->bhnd', attn, v)        # (B, H, N, D)
    out = out.transpose(0, 2, 1, 3).reshape(B, N, C)
    return out @ w_proj + b_proj


if __name__ == "__main__":
    # Small shapes consistent with the module: dim divisible by heads.
    B, N, C = 2, 16, 32
    HEADS = 8

    key = jax.random.PRNGKey(0)
    kx, kqkv, kproj, kb = jax.random.split(key, 4)

    x = jax.random.normal(kx, (B, N, C), dtype=jnp.float32)
    w_qkv = jax.random.normal(kqkv, (C, 3 * C), dtype=jnp.float32) * 0.05
    w_proj = jax.random.normal(kproj, (C, C), dtype=jnp.float32) * 0.05
    b_proj = jax.random.normal(kb, (C,), dtype=jnp.float32) * 0.05

    ref = spatial_attention_ref(x, w_qkv, w_proj, b_proj, num_heads=HEADS)

    # f32 path (single key tile, grid of 1; approx reciprocal in the softmax
    # is the only intentional deviation from the exact reference).
    out = jax.block_until_ready(
        spatial_attention(x, w_qkv, w_proj, b_proj, num_heads=HEADS))
    assert out.shape == (B, N, C)
    assert jnp.allclose(out, ref, atol=1e-2, rtol=1e-2), "f32 mismatch"

    # Key-tiled online-softmax path (2 key tiles).
    out_kt = jax.block_until_ready(
        spatial_attention(x, w_qkv, w_proj, b_proj, num_heads=HEADS, key_tile=8))
    assert jnp.allclose(out_kt, ref, atol=1e-2, rtol=1e-2), "key-tiled mismatch"

    # Multi-step grid (exercises grid > 1 with single-buffered weight tiles).
    out_g = jax.block_until_ready(
        spatial_attention(x, w_qkv, w_proj, b_proj, num_heads=HEADS, batch_tile=1))
    assert jnp.allclose(out_g, ref, atol=1e-2, rtol=1e-2), "grid>1 mismatch"

    # Native bf16 inputs: operands stay bf16 on the MXU with f32 accumulation.
    out_bf16 = jax.block_until_ready(spatial_attention(
        x.astype(jnp.bfloat16), w_qkv.astype(jnp.bfloat16),
        w_proj.astype(jnp.bfloat16), b_proj.astype(jnp.bfloat16),
        num_heads=HEADS))
    assert jnp.allclose(out_bf16.astype(jnp.float32), ref, atol=1e-1, rtol=1e-1), \
        "bf16 mismatch"

    # bf16 MXU fast path for f32 callers (review opt #7).
    out_fast = jax.block_until_ready(spatial_attention(
        x, w_qkv, w_proj, b_proj, num_heads=HEADS, mxu_dtype=jnp.bfloat16))
    assert out_fast.dtype == x.dtype
    assert jnp.allclose(out_fast, ref, atol=1e-1, rtol=1e-1), "bf16-fast mismatch"

    print("KERNEL_OK")
</pallas_src>

<mosaic_0001>
module attributes {stable_mosaic.version = 11 : i64} {
  func.func @spatial_attention_kernel(%arg0: i32, %arg1: memref<32x32xf32, #tpu.memory_space<vmem>>, %arg2: memref<32x96xf32, #tpu.memory_space<vmem>>, %arg3: memref<32x32xf32, #tpu.memory_space<vmem>>, %arg4: memref<1x32xf32, #tpu.memory_space<vmem>>, %arg5: memref<32x32xf32, #tpu.memory_space<vmem>>, %arg6: memref<32x32xf32, #tpu.memory_space<vmem>>) attributes {dimension_semantics = [#tpu.dimension_semantics<parallel>], iteration_bounds = array<i64: 1>, scalar_prefetch = 0 : i64, scratch_operands = 1 : i64, tpu.core_type = #tpu.core_type<tc>, window_params = [{transform_indices = @transform_0, window_bounds = array<i64: 32, 32>}, {pipeline_mode = #tpu.pipeline_mode<synchronous>, transform_indices = @transform_1, window_bounds = array<i64: 32, 96>}, {pipeline_mode = #tpu.pipeline_mode<synchronous>, transform_indices = @transform_2, window_bounds = array<i64: 32, 32>}, {pipeline_mode = #tpu.pipeline_mode<synchronous>, transform_indices = @transform_3, window_bounds = array<i64: 1, 32>}, {transform_indices = @transform_4, window_bounds = array<i64: 32, 32>}]} {
    %c0 = arith.constant 0 : index
    %c0_0 = arith.constant 0 : index
    %0 = vector.load %arg1[%c0, %c0_0] : memref<32x32xf32, #tpu.memory_space<vmem>>, vector<32x32xf32>
    %c0_1 = arith.constant 0 : index
    %c0_2 = arith.constant 0 : index
    %1 = vector.load %arg2[%c0_1, %c0_2] : memref<32x96xf32, #tpu.memory_space<vmem>>, vector<32x96xf32>
    %cst = arith.constant dense<0.000000e+00> : vector<32x96xf32>
    %2 = tpu.matmul %0, %1, %cst {dimension_numbers = #tpu.dot_dimension_numbers<[1], [0], [0], [1], [0, 0, 1, 1], [], []>} : vector<32x32xf32>, vector<32x96xf32>, vector<32x96xf32> -> vector<32x96xf32>
    %3 = vector.extract_strided_slice %2 {offsets = [0, 0], sizes = [32, 32], strides = [1, 1]} : vector<32x96xf32> to vector<32x32xf32>
    %cst_3 = arith.constant 5.000000e-01 : f32
    %4 = vector.broadcast %cst_3 : f32 to vector<32x32xf32>
    %5 = arith.mulf %3, %4 : vector<32x32xf32>
    %6 = vector.shape_cast %5 : vector<32x32xf32> to vector<2x16x32xf32>
    %7 = vector.extract_strided_slice %2 {offsets = [0, 32], sizes = [32, 32], strides = [1, 1]} : vector<32x96xf32> to vector<32x32xf32>
    %8 = vector.shape_cast %7 : vector<32x32xf32> to vector<2x16x32xf32>
    %9 = vector.extract_strided_slice %2 {offsets = [0, 64], sizes = [32, 32], strides = [1, 1]} : vector<32x96xf32> to vector<32x32xf32>
    %10 = vector.shape_cast %9 : vector<32x32xf32> to vector<2x16x32xf32>
    %11 = vector.extract_strided_slice %6 {offsets = [0, 0, 0], sizes = [2, 16, 4], strides = [1, 1, 1]} : vector<2x16x32xf32> to vector<2x16x4xf32>
    %12 = vector.extract_strided_slice %8 {offsets = [0, 0, 0], sizes = [2, 16, 4], strides = [1, 1, 1]} : vector<2x16x32xf32> to vector<2x16x4xf32>
    %13 = vector.extract_strided_slice %10 {offsets = [0, 0, 0], sizes = [2, 16, 4], strides = [1, 1, 1]} : vector<2x16x32xf32> to vector<2x16x4xf32>
    %cst_4 = arith.constant dense<0.000000e+00> : vector<2x16x16xf32>
    %14 = tpu.matmul %11, %12, %cst_4 {dimension_numbers = #tpu.dot_dimension_numbers<[2], [2], [1], [1], [0, 0, 0, 1, 1, 1], [0], [0]>} : vector<2x16x4xf32>, vector<2x16x4xf32>, vector<2x16x16xf32> -> vector<2x16x16xf32>
    %cst_5 = arith.constant dense<0xFF800000> : vector<2x16xf32>
    %15 = vector.multi_reduction <maximumf>, %14, %cst_5 [2] : vector<2x16x16xf32> to vector<2x16xf32>
    %16 = vector.shape_cast %15 : vector<2x16xf32> to vector<2x16x1xf32>
    %17 = vector.broadcast %16 : vector<2x16x1xf32> to vector<2x16x16xf32>
    %18 = arith.subf %14, %17 : vector<2x16x16xf32>
    %19 = math.exp %18 : vector<2x16x16xf32>
    %cst_6 = arith.constant dense<0.000000e+00> : vector<2x16xf32>
    %20 = vector.multi_reduction <add>, %19, %cst_6 [2] : vector<2x16x16xf32> to vector<2x16xf32>
    %21 = vector.shape_cast %20 : vector<2x16xf32> to vector<2x16x1xf32>
    %cst_7 = arith.constant dense<0.000000e+00> : vector<2x16x4xf32>
    %22 = tpu.matmul %19, %13, %cst_7 {dimension_numbers = #tpu.dot_dimension_numbers<[2], [1], [1], [2], [0, 0, 0, 1, 1, 2], [0], [0]>} : vector<2x16x16xf32>, vector<2x16x4xf32>, vector<2x16x4xf32> -> vector<2x16x4xf32>
    %23 = tpu.reciprocal %21 {approx = true} : vector<2x16x1xf32> -> vector<2x16x1xf32>
    %24 = vector.broadcast %23 : vector<2x16x1xf32> to vector<2x16x4xf32>
    %25 = arith.mulf %22, %24 : vector<2x16x4xf32>
    %26 = vector.shape_cast %25 : vector<2x16x4xf32> to vector<32x4xf32>
    %c0_8 = arith.constant 0 : index
    %c0_9 = arith.constant 0 : index
    %27 = vector.load %arg6[%c0_8, %c0_9] : memref<32x32xf32, #tpu.memory_space<vmem>>, vector<32x4xf32>
    tpu.vector_store %arg6[%c0_8, %c0_9], %26 {strides = array<i32>} : memref<32x32xf32, #tpu.memory_space<vmem>>, vector<32x4xf32>,
    %28 = vector.extract_strided_slice %6 {offsets = [0, 0, 4], sizes = [2, 16, 4], strides = [1, 1, 1]} : vector<2x16x32xf32> to vector<2x16x4xf32>
    %29 = vector.extract_strided_slice %8 {offsets = [0, 0, 4], sizes = [2, 16, 4], strides = [1, 1, 1]} : vector<2x16x32xf32> to vector<2x16x4xf32>
    %30 = vector.extract_strided_slice %10 {offsets = [0, 0, 4], sizes = [2, 16, 4], strides = [1, 1, 1]} : vector<2x16x32xf32> to vector<2x16x4xf32>
    %cst_10 = arith.constant dense<0.000000e+00> : vector<2x16x16xf32>
    %31 = tpu.matmul %28, %29, %cst_10 {dimension_numbers = #tpu.dot_dimension_numbers<[2], [2], [1], [1], [0, 0, 0, 1, 1, 1], [0], [0]>} : vector<2x16x4xf32>, vector<2x16x4xf32>, vector<2x16x16xf32> -> vector<2x16x16xf32>
    %cst_11 = arith.constant dense<0xFF800000> : vector<2x16xf32>
    %32 = vector.multi_reduction <maximumf>, %31, %cst_11 [2] : vector<2x16x16xf32> to vector<2x16xf32>
    %33 = vector.shape_cast %32 : vector<2x16xf32> to vector<2x16x1xf32>
    %34 = vector.broadcast %33 : vector<2x16x1xf32> to vector<2x16x16xf32>
    %35 = arith.subf %31, %34 : vector<2x16x16xf32>
    %36 = math.exp %35 : vector<2x16x16xf32>
    %cst_12 = arith.constant dense<0.000000e+00> : vector<2x16xf32>
    %37 = vector.multi_reduction <add>, %36, %cst_12 [2] : vector<2x16x16xf32> to vector<2x16xf32>
    %38 = vector.shape_cast %37 : vector<2x16xf32> to vector<2x16x1xf32>
    %cst_13 = arith.constant dense<0.000000e+00> : vector<2x16x4xf32>
    %39 = tpu.matmul %36, %30, %cst_13 {dimension_numbers = #tpu.dot_dimension_numbers<[2], [1], [1], [2], [0, 0, 0, 1, 1, 2], [0], [0]>} : vector<2x16x16xf32>, vector<2x16x4xf32>, vector<2x16x4xf32> -> vector<2x16x4xf32>
    %40 = tpu.reciprocal %38 {approx = true} : vector<2x16x1xf32> -> vector<2x16x1xf32>
    %41 = vector.broadcast %40 : vector<2x16x1xf32> to vector<2x16x4xf32>
    %42 = arith.mulf %39, %41 : vector<2x16x4xf32>
    %43 = vector.shape_cast %42 : vector<2x16x4xf32> to vector<32x4xf32>
    %c0_14 = arith.constant 0 : index
    %c4 = arith.constant 4 : index
    %44 = vector.load %arg6[%c0_14, %c4] : memref<32x32xf32, #tpu.memory_space<vmem>>, vector<32x4xf32>
    tpu.vector_store %arg6[%c0_14, %c4], %43 {strides = array<i32>} : memref<32x32xf32, #tpu.memory_space<vmem>>, vector<32x4xf32>,
    %45 = vector.extract_strided_slice %6 {offsets = [0, 0, 8], sizes = [2, 16, 4], strides = [1, 1, 1]} : vector<2x16x32xf32> to vector<2x16x4xf32>
    %46 = vector.extract_strided_slice %8 {offsets = [0, 0, 8], sizes = [2, 16, 4], strides = [1, 1, 1]} : vector<2x16x32xf32> to vector<2x16x4xf32>
    %47 = vector.extract_strided_slice %10 {offsets = [0, 0, 8], sizes = [2, 16, 4], strides = [1, 1, 1]} : vector<2x16x32xf32> to vector<2x16x4xf32>
    %cst_15 = arith.constant dense<0.000000e+00> : vector<2x16x16xf32>
    %48 = tpu.matmul %45, %46, %cst_15 {dimension_numbers = #tpu.dot_dimension_numbers<[2], [2], [1], [1], [0, 0, 0, 1, 1, 1], [0], [0]>} : vector<2x16x4xf32>, vector<2x16x4xf32>, vector<2x16x16xf32> -> vector<2x16x16xf32>
    %cst_16 = arith.constant dense<0xFF800000> : vector<2x16xf32>
    %49 = vector.multi_reduction <maximumf>, %48, %cst_16 [2] : vector<2x16x16xf32> to vector<2x16xf32>
    %50 = vector.shape_cast %49 : vector<2x16xf32> to vector<2x16x1xf32>
    %51 = vector.broadcast %50 : vector<2x16x1xf32> to vector<2x16x16xf32>
    %52 = arith.subf %48, %51 : vector<2x16x16xf32>
    %53 = math.exp %52 : vector<2x16x16xf32>
    %cst_17 = arith.constant dense<0.000000e+00> : vector<2x16xf32>
    %54 = vector.multi_reduction <add>, %53, %cst_17 [2] : vector<2x16x16xf32> to vector<2x16xf32>
    %55 = vector.shape_cast %54 : vector<2x16xf32> to vector<2x16x1xf32>
    %cst_18 = arith.constant dense<0.000000e+00> : vector<2x16x4xf32>
    %56 = tpu.matmul %53, %47, %cst_18 {dimension_numbers = #tpu.dot_dimension_numbers<[2], [1], [1], [2], [0, 0, 0, 1, 1, 2], [0], [0]>} : vector<2x16x16xf32>, vector<2x16x4xf32>, vector<2x16x4xf32> -> vector<2x16x4xf32>
    %57 = tpu.reciprocal %55 {approx = true} : vector<2x16x1xf32> -> vector<2x16x1xf32>
    %58 = vector.broadcast %57 : vector<2x16x1xf32> to vector<2x16x4xf32>
    %59 = arith.mulf %56, %58 : vector<2x16x4xf32>
    %60 = vector.shape_cast %59 : vector<2x16x4xf32> to vector<32x4xf32>
    %c0_19 = arith.constant 0 : index
    %c8 = arith.constant 8 : index
    %61 = vector.load %arg6[%c0_19, %c8] : memref<32x32xf32, #tpu.memory_space<vmem>>, vector<32x4xf32>
    tpu.vector_store %arg6[%c0_19, %c8], %60 {strides = array<i32>} : memref<32x32xf32, #tpu.memory_space<vmem>>, vector<32x4xf32>,
    %62 = vector.extract_strided_slice %6 {offsets = [0, 0, 12], sizes = [2, 16, 4], strides = [1, 1, 1]} : vector<2x16x32xf32> to vector<2x16x4xf32>
    %63 = vector.extract_strided_slice %8 {offsets = [0, 0, 12], sizes = [2, 16, 4], strides = [1, 1, 1]} : vector<2x16x32xf32> to vector<2x16x4xf32>
    %64 = vector.extract_strided_slice %10 {offsets = [0, 0, 12], sizes = [2, 16, 4], strides = [1, 1, 1]} : vector<2x16x32xf32> to vector<2x16x4xf32>
    %cst_20 = arith.constant dense<0.000000e+00> : vector<2x16x16xf32>
    %65 = tpu.matmul %62, %63, %cst_20 {dimension_numbers = #tpu.dot_dimension_numbers<[2], [2], [1], [1], [0, 0, 0, 1, 1, 1], [0], [0]>} : vector<2x16x4xf32>, vector<2x16x4xf32>, vector<2x16x16xf32> -> vector<2x16x16xf32>
    %cst_21 = arith.constant dense<0xFF800000> : vector<2x16xf32>
    %66 = vector.multi_reduction <maximumf>, %65, %cst_21 [2] : vector<2x16x16xf32> to vector<2x16xf32>
    %67 = vector.shape_cast %66 : vector<2x16xf32> to vector<2x16x1xf32>
    %68 = vector.broadcast %67 : vector<2x16x1xf32> to vector<2x16x16xf32>
    %69 = arith.subf %65, %68 : vector<2x16x16xf32>
    %70 = math.exp %69 : vector<2x16x16xf32>
    %cst_22 = arith.constant dense<0.000000e+00> : vector<2x16xf32>
    %71 = vector.multi_reduction <add>, %70, %cst_22 [2] : vector<2x16x16xf32> to vector<2x16xf32>
    %72 = vector.shape_cast %71 : vector<2x16xf32> to vector<2x16x1xf32>
    %cst_23 = arith.constant dense<0.000000e+00> : vector<2x16x4xf32>
    %73 = tpu.matmul %70, %64, %cst_23 {dimension_numbers = #tpu.dot_dimension_numbers<[2], [1], [1], [2], [0, 0, 0, 1, 1, 2], [0], [0]>} : vector<2x16x16xf32>, vector<2x16x4xf32>, vector<2x16x4xf32> -> vector<2x16x4xf32>
    %74 = tpu.reciprocal %72 {approx = true} : vector<2x16x1xf32> -> vector<2x16x1xf32>
    %75 = vector.broadcast %74 : vector<2x16x1xf32> to vector<2x16x4xf32>
    %76 = arith.mulf %73, %75 : vector<2x16x4xf32>
    %77 = vector.shape_cast %76 : vector<2x16x4xf32> to vector<32x4xf32>
    %c0_24 = arith.constant 0 : index
    %c12 = arith.constant 12 : index
    %78 = vector.load %arg6[%c0_24, %c12] : memref<32x32xf32, #tpu.memory_space<vmem>>, vector<32x4xf32>
    tpu.vector_store %arg6[%c0_24, %c12], %77 {strides = array<i32>} : memref<32x32xf32, #tpu.memory_space<vmem>>, vector<32x4xf32>,
    %79 = vector.extract_strided_slice %6 {offsets = [0, 0, 16], sizes = [2, 16, 4], strides = [1, 1, 1]} : vector<2x16x32xf32> to vector<2x16x4xf32>
    %80 = vector.extract_strided_slice %8 {offsets = [0, 0, 16], sizes = [2, 16, 4], strides = [1, 1, 1]} : vector<2x16x32xf32> to vector<2x16x4xf32>
    %81 = vector.extract_strided_slice %10 {offsets = [0, 0, 16], sizes = [2, 16, 4], strides = [1, 1, 1]} : vector<2x16x32xf32> to vector<2x16x4xf32>
    %cst_25 = arith.constant dense<0.000000e+00> : vector<2x16x16xf32>
    %82 = tpu.matmul %79, %80, %cst_25 {dimension_numbers = #tpu.dot_dimension_numbers<[2], [2], [1], [1], [0, 0, 0, 1, 1, 1], [0], [0]>} : vector<2x16x4xf32>, vector<2x16x4xf32>, vector<2x16x16xf32> -> vector<2x16x16xf32>
    %cst_26 = arith.constant dense<0xFF800000> : vector<2x16xf32>
    %83 = vector.multi_reduction <maximumf>, %82, %cst_26 [2] : vector<2x16x16xf32> to vector<2x16xf32>
    %84 = vector.shape_cast %83 : vector<2x16xf32> to vector<2x16x1xf32>
    %85 = vector.broadcast %84 : vector<2x16x1xf32> to vector<2x16x16xf32>
    %86 = arith.subf %82, %85 : vector<2x16x16xf32>
    %87 = math.exp %86 : vector<2x16x16xf32>
    %cst_27 = arith.constant dense<0.000000e+00> : vector<2x16xf32>
    %88 = vector.multi_reduction <add>, %87, %cst_27 [2] : vector<2x16x16xf32> to vector<2x16xf32>
    %89 = vector.shape_cast %88 : vector<2x16xf32> to vector<2x16x1xf32>
    %cst_28 = arith.constant dense<0.000000e+00> : vector<2x16x4xf32>
    %90 = tpu.matmul %87, %81, %cst_28 {dimension_numbers = #tpu.dot_dimension_numbers<[2], [1], [1], [2], [0, 0, 0, 1, 1, 2], [0], [0]>} : vector<2x16x16xf32>, vector<2x16x4xf32>, vector<2x16x4xf32> -> vector<2x16x4xf32>
    %91 = tpu.reciprocal %89 {approx = true} : vector<2x16x1xf32> -> vector<2x16x1xf32>
    %92 = vector.broadcast %91 : vector<2x16x1xf32> to vector<2x16x4xf32>
    %93 = arith.mulf %90, %92 : vector<2x16x4xf32>
    %94 = vector.shape_cast %93 : vector<2x16x4xf32> to vector<32x4xf32>
    %c0_29 = arith.constant 0 : index
    %c16 = arith.constant 16 : index
    %95 = vector.load %arg6[%c0_29, %c16] : memref<32x32xf32, #tpu.memory_space<vmem>>, vector<32x4xf32>
    tpu.vector_store %arg6[%c0_29, %c16], %94 {strides = array<i32>} : memref<32x32xf32, #tpu.memory_space<vmem>>, vector<32x4xf32>,
    %96 = vector.extract_strided_slice %6 {offsets = [0, 0, 20], sizes = [2, 16, 4], strides = [1, 1, 1]} : vector<2x16x32xf32> to vector<2x16x4xf32>
    %97 = vector.extract_strided_slice %8 {offsets = [0, 0, 20], sizes = [2, 16, 4], strides = [1, 1, 1]} : vector<2x16x32xf32> to vector<2x16x4xf32>
    %98 = vector.extract_strided_slice %10 {offsets = [0, 0, 20], sizes = [2, 16, 4], strides = [1, 1, 1]} : vector<2x16x32xf32> to vector<2x16x4xf32>
    %cst_30 = arith.constant dense<0.000000e+00> : vector<2x16x16xf32>
    %99 = tpu.matmul %96, %97, %cst_30 {dimension_numbers = #tpu.dot_dimension_numbers<[2], [2], [1], [1], [0, 0, 0, 1, 1, 1], [0], [0]>} : vector<2x16x4xf32>, vector<2x16x4xf32>, vector<2x16x16xf32> -> vector<2x16x16xf32>
    %cst_31 = arith.constant dense<0xFF800000> : vector<2x16xf32>
    %100 = vector.multi_reduction <maximumf>, %99, %cst_31 [2] : vector<2x16x16xf32> to vector<2x16xf32>
    %101 = vector.shape_cast %100 : vector<2x16xf32> to vector<2x16x1xf32>
    %102 = vector.broadcast %101 : vector<2x16x1xf32> to vector<2x16x16xf32>
    %103 = arith.subf %99, %102 : vector<2x16x16xf32>
    %104 = math.exp %103 : vector<2x16x16xf32>
    %cst_32 = arith.constant dense<0.000000e+00> : vector<2x16xf32>
    %105 = vector.multi_reduction <add>, %104, %cst_32 [2] : vector<2x16x16xf32> to vector<2x16xf32>
    %106 = vector.shape_cast %105 : vector<2x16xf32> to vector<2x16x1xf32>
    %cst_33 = arith.constant dense<0.000000e+00> : vector<2x16x4xf32>
    %107 = tpu.matmul %104, %98, %cst_33 {dimension_numbers = #tpu.dot_dimension_numbers<[2], [1], [1], [2], [0, 0, 0, 1, 1, 2], [0], [0]>} : vector<2x16x16xf32>, vector<2x16x4xf32>, vector<2x16x4xf32> -> vector<2x16x4xf32>
    %108 = tpu.reciprocal %106 {approx = true} : vector<2x16x1xf32> -> vector<2x16x1xf32>
    %109 = vector.broadcast %108 : vector<2x16x1xf32> to vector<2x16x4xf32>
    %110 = arith.mulf %107, %109 : vector<2x16x4xf32>
    %111 = vector.shape_cast %110 : vector<2x16x4xf32> to vector<32x4xf32>
    %c0_34 = arith.constant 0 : index
    %c20 = arith.constant 20 : index
    %112 = vector.load %arg6[%c0_34, %c20] : memref<32x32xf32, #tpu.memory_space<vmem>>, vector<32x4xf32>
    tpu.vector_store %arg6[%c0_34, %c20], %111 {strides = array<i32>} : memref<32x32xf32, #tpu.memory_space<vmem>>, vector<32x4xf32>,
    %113 = vector.extract_strided_slice %6 {offsets = [0, 0, 24], sizes = [2, 16, 4], strides = [1, 1, 1]} : vector<2x16x32xf32> to vector<2x16x4xf32>
    %114 = vector.extract_strided_slice %8 {offsets = [0, 0, 24], sizes = [2, 16, 4], strides = [1, 1, 1]} : vector<2x16x32xf32> to vector<2x16x4xf32>
    %115 = vector.extract_strided_slice %10 {offsets = [0, 0, 24], sizes = [2, 16, 4], strides = [1, 1, 1]} : vector<2x16x32xf32> to vector<2x16x4xf32>
    %cst_35 = arith.constant dense<0.000000e+00> : vector<2x16x16xf32>
    %116 = tpu.matmul %113, %114, %cst_35 {dimension_numbers = #tpu.dot_dimension_numbers<[2], [2], [1], [1], [0, 0, 0, 1, 1, 1], [0], [0]>} : vector<2x16x4xf32>, vector<2x16x4xf32>, vector<2x16x16xf32> -> vector<2x16x16xf32>
    %cst_36 = arith.constant dense<0xFF800000> : vector<2x16xf32>
    %117 = vector.multi_reduction <maximumf>, %116, %cst_36 [2] : vector<2x16x16xf32> to vector<2x16xf32>
    %118 = vector.shape_cast %117 : vector<2x16xf32> to vector<2x16x1xf32>
    %119 = vector.broadcast %118 : vector<2x16x1xf32> to vector<2x16x16xf32>
    %120 = arith.subf %116, %119 : vector<2x16x16xf32>
    %121 = math.exp %120 : vector<2x16x16xf32>
    %cst_37 = arith.constant dense<0.000000e+00> : vector<2x16xf32>
    %122 = vector.multi_reduction <add>, %121, %cst_37 [2] : vector<2x16x16xf32> to vector<2x16xf32>
    %123 = vector.shape_cast %122 : vector<2x16xf32> to vector<2x16x1xf32>
    %cst_38 = arith.constant dense<0.000000e+00> : vector<2x16x4xf32>
    %124 = tpu.matmul %121, %115, %cst_38 {dimension_numbers = #tpu.dot_dimension_numbers<[2], [1], [1], [2], [0, 0, 0, 1, 1, 2], [0], [0]>} : vector<2x16x16xf32>, vector<2x16x4xf32>, vector<2x16x4xf32> -> vector<2x16x4xf32>
    %125 = tpu.reciprocal %123 {approx = true} : vector<2x16x1xf32> -> vector<2x16x1xf32>
    %126 = vector.broadcast %125 : vector<2x16x1xf32> to vector<2x16x4xf32>
    %127 = arith.mulf %124, %126 : vector<2x16x4xf32>
    %128 = vector.shape_cast %127 : vector<2x16x4xf32> to vector<32x4xf32>
    %c0_39 = arith.constant 0 : index
    %c24 = arith.constant 24 : index
    %129 = vector.load %arg6[%c0_39, %c24] : memref<32x32xf32, #tpu.memory_space<vmem>>, vector<32x4xf32>
    tpu.vector_store %arg6[%c0_39, %c24], %128 {strides = array<i32>} : memref<32x32xf32, #tpu.memory_space<vmem>>, vector<32x4xf32>,
    %130 = vector.extract_strided_slice %6 {offsets = [0, 0, 28], sizes = [2, 16, 4], strides = [1, 1, 1]} : vector<2x16x32xf32> to vector<2x16x4xf32>
    %131 = vector.extract_strided_slice %8 {offsets = [0, 0, 28], sizes = [2, 16, 4], strides = [1, 1, 1]} : vector<2x16x32xf32> to vector<2x16x4xf32>
    %132 = vector.extract_strided_slice %10 {offsets = [0, 0, 28], sizes = [2, 16, 4], strides = [1, 1, 1]} : vector<2x16x32xf32> to vector<2x16x4xf32>
    %cst_40 = arith.constant dense<0.000000e+00> : vector<2x16x16xf32>
    %133 = tpu.matmul %130, %131, %cst_40 {dimension_numbers = #tpu.dot_dimension_numbers<[2], [2], [1], [1], [0, 0, 0, 1, 1, 1], [0], [0]>} : vector<2x16x4xf32>, vector<2x16x4xf32>, vector<2x16x16xf32> -> vector<2x16x16xf32>
    %cst_41 = arith.constant dense<0xFF800000> : vector<2x16xf32>
    %134 = vector.multi_reduction <maximumf>, %133, %cst_41 [2] : vector<2x16x16xf32> to vector<2x16xf32>
    %135 = vector.shape_cast %134 : vector<2x16xf32> to vector<2x16x1xf32>
    %136 = vector.broadcast %135 : vector<2x16x1xf32> to vector<2x16x16xf32>
    %137 = arith.subf %133, %136 : vector<2x16x16xf32>
    %138 = math.exp %137 : vector<2x16x16xf32>
    %cst_42 = arith.constant dense<0.000000e+00> : vector<2x16xf32>
    %139 = vector.multi_reduction <add>, %138, %cst_42 [2] : vector<2x16x16xf32> to vector<2x16xf32>
    %140 = vector.shape_cast %139 : vector<2x16xf32> to vector<2x16x1xf32>
    %cst_43 = arith.constant dense<0.000000e+00> : vector<2x16x4xf32>
    %141 = tpu.matmul %138, %132, %cst_43 {dimension_numbers = #tpu.dot_dimension_numbers<[2], [1], [1], [2], [0, 0, 0, 1, 1, 2], [0], [0]>} : vector<2x16x16xf32>, vector<2x16x4xf32>, vector<2x16x4xf32> -> vector<2x16x4xf32>
    %142 = tpu.reciprocal %140 {approx = true} : vector<2x16x1xf32> -> vector<2x16x1xf32>
    %143 = vector.broadcast %142 : vector<2x16x1xf32> to vector<2x16x4xf32>
    %144 = arith.mulf %141, %143 : vector<2x16x4xf32>
    %145 = vector.shape_cast %144 : vector<2x16x4xf32> to vector<32x4xf32>
    %c0_44 = arith.constant 0 : index
    %c28 = arith.constant 28 : index
    %146 = vector.load %arg6[%c0_44, %c28] : memref<32x32xf32, #tpu.memory_space<vmem>>, vector<32x4xf32>
    tpu.vector_store %arg6[%c0_44, %c28], %145 {strides = array<i32>} : memref<32x32xf32, #tpu.memory_space<vmem>>, vector<32x4xf32>,
    %c0_45 = arith.constant 0 : index
    %c0_46 = arith.constant 0 : index
    %147 = vector.load %arg6[%c0_45, %c0_46] : memref<32x32xf32, #tpu.memory_space<vmem>>, vector<32x32xf32>
    %c0_47 = arith.constant 0 : index
    %c0_48 = arith.constant 0 : index
    %148 = vector.load %arg3[%c0_47, %c0_48] : memref<32x32xf32, #tpu.memory_space<vmem>>, vector<32x32xf32>
    %cst_49 = arith.constant dense<0.000000e+00> : vector<32x32xf32>
    %149 = tpu.matmul %147, %148, %cst_49 {dimension_numbers = #tpu.dot_dimension_numbers<[1], [0], [0], [1], [0, 0, 1, 1], [], []>} : vector<32x32xf32>, vector<32x32xf32>, vector<32x32xf32> -> vector<32x32xf32>
    %c0_50 = arith.constant 0 : index
    %c0_51 = arith.constant 0 : index
    %150 = vector.load %arg4[%c0_50, %c0_51] : memref<1x32xf32, #tpu.memory_space<vmem>>, vector<1x32xf32>
    %151 = vector.broadcast %150 : vector<1x32xf32> to vector<32x32xf32>
    %152 = arith.addf %149, %151 : vector<32x32xf32>
    %c0_52 = arith.constant 0 : index
    %c0_53 = arith.constant 0 : index
    %153 = vector.load %arg5[%c0_52, %c0_53] : memref<32x32xf32, #tpu.memory_space<vmem>>, vector<32x32xf32>
    tpu.vector_store %arg5[%c0_52, %c0_53], %152 {strides = array<i32>} : memref<32x32xf32, #tpu.memory_space<vmem>>, vector<32x32xf32>,
    return
  }
  func.func @transform_0(%arg0: i32) -> (i32, i32) {
    %c0_i32 = arith.constant 0 : i32
    %c0_i32_0 = arith.constant 0 : i32
    return %arg0, %c0_i32 : i32, i32
  }
  func.func @transform_1(%arg0: i32) -> (i32, i32) {
    %c0_i32 = arith.constant 0 : i32
    %c0_i32_0 = arith.constant 0 : i32
    %c0_i32_1 = arith.constant 0 : i32
    return %c0_i32, %c0_i32_0 : i32, i32
  }
  func.func @transform_2(%arg0: i32) -> (i32, i32) {
    %c0_i32 = arith.constant 0 : i32
    %c0_i32_0 = arith.constant 0 : i32
    %c0_i32_1 = arith.constant 0 : i32
    return %c0_i32, %c0_i32_0 : i32, i32
  }
  func.func @transform_3(%arg0: i32) -> (i32, i32) {
    %c0_i32 = arith.constant 0 : i32
    %c0_i32_0 = arith.constant 0 : i32
    %c0_i32_1 = arith.constant 0 : i32
    return %c0_i32, %c0_i32_0 : i32, i32
  }
  func.func @transform_4(%arg0: i32) -> (i32, i32) {
    %c0_i32 = arith.constant 0 : i32
    %c0_i32_0 = arith.constant 0 : i32
    return %arg0, %c0_i32 : i32, i32
  }
}

module attributes {stable_mosaic.version = 11 : i64} {
  func.func @spatial_attention_kernel(%arg0: i32, %arg1: memref<32x32xf32, #tpu.memory_space<vmem>>, %arg2: memref<32x96xf32, #tpu.memory_space<vmem>>, %arg3: memref<32x32xf32, #tpu.memory_space<vmem>>, %arg4: memref<1x32xf32, #tpu.memory_space<vmem>>, %arg5: memref<32x32xf32, #tpu.memory_space<vmem>>, %arg6: memref<32x32xf32, #tpu.memory_space<vmem>>) attributes {dimension_semantics = [#tpu.dimension_semantics<parallel>], iteration_bounds = array<i64: 1>, scalar_prefetch = 0 : i64, scratch_operands = 1 : i64, tpu.core_type = #tpu.core_type<tc>, window_params = [{transform_indices = @transform_0, window_bounds = array<i64: 32, 32>}, {pipeline_mode = #tpu.pipeline_mode<synchronous>, transform_indices = @transform_1, window_bounds = array<i64: 32, 96>}, {pipeline_mode = #tpu.pipeline_mode<synchronous>, transform_indices = @transform_2, window_bounds = array<i64: 32, 32>}, {pipeline_mode = #tpu.pipeline_mode<synchronous>, transform_indices = @transform_3, window_bounds = array<i64: 1, 32>}, {transform_indices = @transform_4, window_bounds = array<i64: 32, 32>}]} {
    %c0 = arith.constant 0 : index
    %c0_0 = arith.constant 0 : index
    %0 = vector.load %arg1[%c0, %c0_0] : memref<32x32xf32, #tpu.memory_space<vmem>>, vector<32x32xf32>
    %c0_1 = arith.constant 0 : index
    %c0_2 = arith.constant 0 : index
    %1 = vector.load %arg2[%c0_1, %c0_2] : memref<32x96xf32, #tpu.memory_space<vmem>>, vector<32x96xf32>
    %cst = arith.constant dense<0.000000e+00> : vector<32x96xf32>
    %2 = tpu.matmul %0, %1, %cst {dimension_numbers = #tpu.dot_dimension_numbers<[1], [0], [0], [1], [0, 0, 1, 1], [], []>} : vector<32x32xf32>, vector<32x96xf32>, vector<32x96xf32> -> vector<32x96xf32>
    %3 = vector.extract_strided_slice %2 {offsets = [0, 0], sizes = [32, 32], strides = [1, 1]} : vector<32x96xf32> to vector<32x32xf32>
    %cst_3 = arith.constant 5.000000e-01 : f32
    %4 = vector.broadcast %cst_3 : f32 to vector<32x32xf32>
    %5 = arith.mulf %3, %4 : vector<32x32xf32>
    %6 = vector.shape_cast %5 : vector<32x32xf32> to vector<2x16x32xf32>
    %7 = vector.extract_strided_slice %2 {offsets = [0, 32], sizes = [32, 32], strides = [1, 1]} : vector<32x96xf32> to vector<32x32xf32>
    %8 = vector.shape_cast %7 : vector<32x32xf32> to vector<2x16x32xf32>
    %9 = vector.extract_strided_slice %2 {offsets = [0, 64], sizes = [32, 32], strides = [1, 1]} : vector<32x96xf32> to vector<32x32xf32>
    %10 = vector.shape_cast %9 : vector<32x32xf32> to vector<2x16x32xf32>
    %11 = vector.extract_strided_slice %6 {offsets = [0, 0, 0], sizes = [2, 16, 4], strides = [1, 1, 1]} : vector<2x16x32xf32> to vector<2x16x4xf32>
    %12 = vector.extract_strided_slice %8 {offsets = [0, 0, 0], sizes = [2, 16, 4], strides = [1, 1, 1]} : vector<2x16x32xf32> to vector<2x16x4xf32>
    %13 = vector.extract_strided_slice %10 {offsets = [0, 0, 0], sizes = [2, 16, 4], strides = [1, 1, 1]} : vector<2x16x32xf32> to vector<2x16x4xf32>
    %cst_4 = arith.constant dense<0.000000e+00> : vector<2x16x16xf32>
    %14 = tpu.matmul %11, %12, %cst_4 {dimension_numbers = #tpu.dot_dimension_numbers<[2], [2], [1], [1], [0, 0, 0, 1, 1, 1], [0], [0]>} : vector<2x16x4xf32>, vector<2x16x4xf32>, vector<2x16x16xf32> -> vector<2x16x16xf32>
    %cst_5 = arith.constant dense<0xFF800000> : vector<2x16xf32>
    %15 = vector.multi_reduction <maximumf>, %14, %cst_5 [2] : vector<2x16x16xf32> to vector<2x16xf32>
    %16 = vector.shape_cast %15 : vector<2x16xf32> to vector<2x16x1xf32>
    %17 = vector.broadcast %16 : vector<2x16x1xf32> to vector<2x16x16xf32>
    %18 = arith.subf %14, %17 : vector<2x16x16xf32>
    %19 = math.exp %18 : vector<2x16x16xf32>
    %cst_6 = arith.constant dense<0.000000e+00> : vector<2x16xf32>
    %20 = vector.multi_reduction <add>, %19, %cst_6 [2] : vector<2x16x16xf32> to vector<2x16xf32>
    %21 = vector.shape_cast %20 : vector<2x16xf32> to vector<2x16x1xf32>
    %cst_7 = arith.constant dense<0.000000e+00> : vector<2x16x4xf32>
    %22 = tpu.matmul %19, %13, %cst_7 {dimension_numbers = #tpu.dot_dimension_numbers<[2], [1], [1], [2], [0, 0, 0, 1, 1, 2], [0], [0]>} : vector<2x16x16xf32>, vector<2x16x4xf32>, vector<2x16x4xf32> -> vector<2x16x4xf32>
    %23 = tpu.reciprocal %21 {approx = true} : vector<2x16x1xf32> -> vector<2x16x1xf32>
    %24 = vector.broadcast %23 : vector<2x16x1xf32> to vector<2x16x4xf32>
    %25 = arith.mulf %22, %24 : vector<2x16x4xf32>
    %26 = vector.shape_cast %25 : vector<2x16x4xf32> to vector<32x4xf32>
    %c0_8 = arith.constant 0 : index
    %c0_9 = arith.constant 0 : index
    %27 = vector.load %arg6[%c0_8, %c0_9] : memref<32x32xf32, #tpu.memory_space<vmem>>, vector<32x4xf32>
    tpu.vector_store %arg6[%c0_8, %c0_9], %26 {strides = array<i32>} : memref<32x32xf32, #tpu.memory_space<vmem>>, vector<32x4xf32>,
    %28 = vector.extract_strided_slice %6 {offsets = [0, 0, 4], sizes = [2, 16, 4], strides = [1, 1, 1]} : vector<2x16x32xf32> to vector<2x16x4xf32>
    %29 = vector.extract_strided_slice %8 {offsets = [0, 0, 4], sizes = [2, 16, 4], strides = [1, 1, 1]} : vector<2x16x32xf32> to vector<2x16x4xf32>
    %30 = vector.extract_strided_slice %10 {offsets = [0, 0, 4], sizes = [2, 16, 4], strides = [1, 1, 1]} : vector<2x16x32xf32> to vector<2x16x4xf32>
    %cst_10 = arith.constant dense<0.000000e+00> : vector<2x16x16xf32>
    %31 = tpu.matmul %28, %29, %cst_10 {dimension_numbers = #tpu.dot_dimension_numbers<[2], [2], [1], [1], [0, 0, 0, 1, 1, 1], [0], [0]>} : vector<2x16x4xf32>, vector<2x16x4xf32>, vector<2x16x16xf32> -> vector<2x16x16xf32>
    %cst_11 = arith.constant dense<0xFF800000> : vector<2x16xf32>
    %32 = vector.multi_reduction <maximumf>, %31, %cst_11 [2] : vector<2x16x16xf32> to vector<2x16xf32>
    %33 = vector.shape_cast %32 : vector<2x16xf32> to vector<2x16x1xf32>
    %34 = vector.broadcast %33 : vector<2x16x1xf32> to vector<2x16x16xf32>
    %35 = arith.subf %31, %34 : vector<2x16x16xf32>
    %36 = math.exp %35 : vector<2x16x16xf32>
    %cst_12 = arith.constant dense<0.000000e+00> : vector<2x16xf32>
    %37 = vector.multi_reduction <add>, %36, %cst_12 [2] : vector<2x16x16xf32> to vector<2x16xf32>
    %38 = vector.shape_cast %37 : vector<2x16xf32> to vector<2x16x1xf32>
    %cst_13 = arith.constant dense<0.000000e+00> : vector<2x16x4xf32>
    %39 = tpu.matmul %36, %30, %cst_13 {dimension_numbers = #tpu.dot_dimension_numbers<[2], [1], [1], [2], [0, 0, 0, 1, 1, 2], [0], [0]>} : vector<2x16x16xf32>, vector<2x16x4xf32>, vector<2x16x4xf32> -> vector<2x16x4xf32>
    %40 = tpu.reciprocal %38 {approx = true} : vector<2x16x1xf32> -> vector<2x16x1xf32>
    %41 = vector.broadcast %40 : vector<2x16x1xf32> to vector<2x16x4xf32>
    %42 = arith.mulf %39, %41 : vector<2x16x4xf32>
    %43 = vector.shape_cast %42 : vector<2x16x4xf32> to vector<32x4xf32>
    %c0_14 = arith.constant 0 : index
    %c4 = arith.constant 4 : index
    %44 = vector.load %arg6[%c0_14, %c4] : memref<32x32xf32, #tpu.memory_space<vmem>>, vector<32x4xf32>
    tpu.vector_store %arg6[%c0_14, %c4], %43 {strides = array<i32>} : memref<32x32xf32, #tpu.memory_space<vmem>>, vector<32x4xf32>,
    %45 = vector.extract_strided_slice %6 {offsets = [0, 0, 8], sizes = [2, 16, 4], strides = [1, 1, 1]} : vector<2x16x32xf32> to vector<2x16x4xf32>
    %46 = vector.extract_strided_slice %8 {offsets = [0, 0, 8], sizes = [2, 16, 4], strides = [1, 1, 1]} : vector<2x16x32xf32> to vector<2x16x4xf32>
    %47 = vector.extract_strided_slice %10 {offsets = [0, 0, 8], sizes = [2, 16, 4], strides = [1, 1, 1]} : vector<2x16x32xf32> to vector<2x16x4xf32>
    %cst_15 = arith.constant dense<0.000000e+00> : vector<2x16x16xf32>
    %48 = tpu.matmul %45, %46, %cst_15 {dimension_numbers = #tpu.dot_dimension_numbers<[2], [2], [1], [1], [0, 0, 0, 1, 1, 1], [0], [0]>} : vector<2x16x4xf32>, vector<2x16x4xf32>, vector<2x16x16xf32> -> vector<2x16x16xf32>
    %cst_16 = arith.constant dense<0xFF800000> : vector<2x16xf32>
    %49 = vector.multi_reduction <maximumf>, %48, %cst_16 [2] : vector<2x16x16xf32> to vector<2x16xf32>
    %50 = vector.shape_cast %49 : vector<2x16xf32> to vector<2x16x1xf32>
    %51 = vector.broadcast %50 : vector<2x16x1xf32> to vector<2x16x16xf32>
    %52 = arith.subf %48, %51 : vector<2x16x16xf32>
    %53 = math.exp %52 : vector<2x16x16xf32>
    %cst_17 = arith.constant dense<0.000000e+00> : vector<2x16xf32>
    %54 = vector.multi_reduction <add>, %53, %cst_17 [2] : vector<2x16x16xf32> to vector<2x16xf32>
    %55 = vector.shape_cast %54 : vector<2x16xf32> to vector<2x16x1xf32>
    %cst_18 = arith.constant dense<0.000000e+00> : vector<2x16x4xf32>
    %56 = tpu.matmul %53, %47, %cst_18 {dimension_numbers = #tpu.dot_dimension_numbers<[2], [1], [1], [2], [0, 0, 0, 1, 1, 2], [0], [0]>} : vector<2x16x16xf32>, vector<2x16x4xf32>, vector<2x16x4xf32> -> vector<2x16x4xf32>
    %57 = tpu.reciprocal %55 {approx = true} : vector<2x16x1xf32> -> vector<2x16x1xf32>
    %58 = vector.broadcast %57 : vector<2x16x1xf32> to vector<2x16x4xf32>
    %59 = arith.mulf %56, %58 : vector<2x16x4xf32>
    %60 = vector.shape_cast %59 : vector<2x16x4xf32> to vector<32x4xf32>
    %c0_19 = arith.constant 0 : index
    %c8 = arith.constant 8 : index
    %61 = vector.load %arg6[%c0_19, %c8] : memref<32x32xf32, #tpu.memory_space<vmem>>, vector<32x4xf32>
    tpu.vector_store %arg6[%c0_19, %c8], %60 {strides = array<i32>} : memref<32x32xf32, #tpu.memory_space<vmem>>, vector<32x4xf32>,
    %62 = vector.extract_strided_slice %6 {offsets = [0, 0, 12], sizes = [2, 16, 4], strides = [1, 1, 1]} : vector<2x16x32xf32> to vector<2x16x4xf32>
    %63 = vector.extract_strided_slice %8 {offsets = [0, 0, 12], sizes = [2, 16, 4], strides = [1, 1, 1]} : vector<2x16x32xf32> to vector<2x16x4xf32>
    %64 = vector.extract_strided_slice %10 {offsets = [0, 0, 12], sizes = [2, 16, 4], strides = [1, 1, 1]} : vector<2x16x32xf32> to vector<2x16x4xf32>
    %cst_20 = arith.constant dense<0.000000e+00> : vector<2x16x16xf32>
    %65 = tpu.matmul %62, %63, %cst_20 {dimension_numbers = #tpu.dot_dimension_numbers<[2], [2], [1], [1], [0, 0, 0, 1, 1, 1], [0], [0]>} : vector<2x16x4xf32>, vector<2x16x4xf32>, vector<2x16x16xf32> -> vector<2x16x16xf32>
    %cst_21 = arith.constant dense<0xFF800000> : vector<2x16xf32>
    %66 = vector.multi_reduction <maximumf>, %65, %cst_21 [2] : vector<2x16x16xf32> to vector<2x16xf32>
    %67 = vector.shape_cast %66 : vector<2x16xf32> to vector<2x16x1xf32>
    %68 = vector.broadcast %67 : vector<2x16x1xf32> to vector<2x16x16xf32>
    %69 = arith.subf %65, %68 : vector<2x16x16xf32>
    %70 = math.exp %69 : vector<2x16x16xf32>
    %cst_22 = arith.constant dense<0.000000e+00> : vector<2x16xf32>
    %71 = vector.multi_reduction <add>, %70, %cst_22 [2] : vector<2x16x16xf32> to vector<2x16xf32>
    %72 = vector.shape_cast %71 : vector<2x16xf32> to vector<2x16x1xf32>
    %cst_23 = arith.constant dense<0.000000e+00> : vector<2x16x4xf32>
    %73 = tpu.matmul %70, %64, %cst_23 {dimension_numbers = #tpu.dot_dimension_numbers<[2], [1], [1], [2], [0, 0, 0, 1, 1, 2], [0], [0]>} : vector<2x16x16xf32>, vector<2x16x4xf32>, vector<2x16x4xf32> -> vector<2x16x4xf32>
    %74 = tpu.reciprocal %72 {approx = true} : vector<2x16x1xf32> -> vector<2x16x1xf32>
    %75 = vector.broadcast %74 : vector<2x16x1xf32> to vector<2x16x4xf32>
    %76 = arith.mulf %73, %75 : vector<2x16x4xf32>
    %77 = vector.shape_cast %76 : vector<2x16x4xf32> to vector<32x4xf32>
    %c0_24 = arith.constant 0 : index
    %c12 = arith.constant 12 : index
    %78 = vector.load %arg6[%c0_24, %c12] : memref<32x32xf32, #tpu.memory_space<vmem>>, vector<32x4xf32>
    tpu.vector_store %arg6[%c0_24, %c12], %77 {strides = array<i32>} : memref<32x32xf32, #tpu.memory_space<vmem>>, vector<32x4xf32>,
    %79 = vector.extract_strided_slice %6 {offsets = [0, 0, 16], sizes = [2, 16, 4], strides = [1, 1, 1]} : vector<2x16x32xf32> to vector<2x16x4xf32>
    %80 = vector.extract_strided_slice %8 {offsets = [0, 0, 16], sizes = [2, 16, 4], strides = [1, 1, 1]} : vector<2x16x32xf32> to vector<2x16x4xf32>
    %81 = vector.extract_strided_slice %10 {offsets = [0, 0, 16], sizes = [2, 16, 4], strides = [1, 1, 1]} : vector<2x16x32xf32> to vector<2x16x4xf32>
    %cst_25 = arith.constant dense<0.000000e+00> : vector<2x16x16xf32>
    %82 = tpu.matmul %79, %80, %cst_25 {dimension_numbers = #tpu.dot_dimension_numbers<[2], [2], [1], [1], [0, 0, 0, 1, 1, 1], [0], [0]>} : vector<2x16x4xf32>, vector<2x16x4xf32>, vector<2x16x16xf32> -> vector<2x16x16xf32>
    %cst_26 = arith.constant dense<0xFF800000> : vector<2x16xf32>
    %83 = vector.multi_reduction <maximumf>, %82, %cst_26 [2] : vector<2x16x16xf32> to vector<2x16xf32>
    %84 = vector.shape_cast %83 : vector<2x16xf32> to vector<2x16x1xf32>
    %85 = vector.broadcast %84 : vector<2x16x1xf32> to vector<2x16x16xf32>
    %86 = arith.subf %82, %85 : vector<2x16x16xf32>
    %87 = math.exp %86 : vector<2x16x16xf32>
    %cst_27 = arith.constant dense<0.000000e+00> : vector<2x16xf32>
    %88 = vector.multi_reduction <add>, %87, %cst_27 [2] : vector<2x16x16xf32> to vector<2x16xf32>
    %89 = vector.shape_cast %88 : vector<2x16xf32> to vector<2x16x1xf32>
    %cst_28 = arith.constant dense<0.000000e+00> : vector<2x16x4xf32>
    %90 = tpu.matmul %87, %81, %cst_28 {dimension_numbers = #tpu.dot_dimension_numbers<[2], [1], [1], [2], [0, 0, 0, 1, 1, 2], [0], [0]>} : vector<2x16x16xf32>, vector<2x16x4xf32>, vector<2x16x4xf32> -> vector<2x16x4xf32>
    %91 = tpu.reciprocal %89 {approx = true} : vector<2x16x1xf32> -> vector<2x16x1xf32>
    %92 = vector.broadcast %91 : vector<2x16x1xf32> to vector<2x16x4xf32>
    %93 = arith.mulf %90, %92 : vector<2x16x4xf32>
    %94 = vector.shape_cast %93 : vector<2x16x4xf32> to vector<32x4xf32>
    %c0_29 = arith.constant 0 : index
    %c16 = arith.constant 16 : index
    %95 = vector.load %arg6[%c0_29, %c16] : memref<32x32xf32, #tpu.memory_space<vmem>>, vector<32x4xf32>
    tpu.vector_store %arg6[%c0_29, %c16], %94 {strides = array<i32>} : memref<32x32xf32, #tpu.memory_space<vmem>>, vector<32x4xf32>,
    %96 = vector.extract_strided_slice %6 {offsets = [0, 0, 20], sizes = [2, 16, 4], strides = [1, 1, 1]} : vector<2x16x32xf32> to vector<2x16x4xf32>
    %97 = vector.extract_strided_slice %8 {offsets = [0, 0, 20], sizes = [2, 16, 4], strides = [1, 1, 1]} : vector<2x16x32xf32> to vector<2x16x4xf32>
    %98 = vector.extract_strided_slice %10 {offsets = [0, 0, 20], sizes = [2, 16, 4], strides = [1, 1, 1]} : vector<2x16x32xf32> to vector<2x16x4xf32>
    %cst_30 = arith.constant dense<0.000000e+00> : vector<2x16x16xf32>
    %99 = tpu.matmul %96, %97, %cst_30 {dimension_numbers = #tpu.dot_dimension_numbers<[2], [2], [1], [1], [0, 0, 0, 1, 1, 1], [0], [0]>} : vector<2x16x4xf32>, vector<2x16x4xf32>, vector<2x16x16xf32> -> vector<2x16x16xf32>
    %cst_31 = arith.constant dense<0xFF800000> : vector<2x16xf32>
    %100 = vector.multi_reduction <maximumf>, %99, %cst_31 [2] : vector<2x16x16xf32> to vector<2x16xf32>
    %101 = vector.shape_cast %100 : vector<2x16xf32> to vector<2x16x1xf32>
    %102 = vector.broadcast %101 : vector<2x16x1xf32> to vector<2x16x16xf32>
    %103 = arith.subf %99, %102 : vector<2x16x16xf32>
    %104 = math.exp %103 : vector<2x16x16xf32>
    %cst_32 = arith.constant dense<0.000000e+00> : vector<2x16xf32>
    %105 = vector.multi_reduction <add>, %104, %cst_32 [2] : vector<2x16x16xf32> to vector<2x16xf32>
    %106 = vector.shape_cast %105 : vector<2x16xf32> to vector<2x16x1xf32>
    %cst_33 = arith.constant dense<0.000000e+00> : vector<2x16x4xf32>
    %107 = tpu.matmul %104, %98, %cst_33 {dimension_numbers = #tpu.dot_dimension_numbers<[2], [1], [1], [2], [0, 0, 0, 1, 1, 2], [0], [0]>} : vector<2x16x16xf32>, vector<2x16x4xf32>, vector<2x16x4xf32> -> vector<2x16x4xf32>
    %108 = tpu.reciprocal %106 {approx = true} : vector<2x16x1xf32> -> vector<2x16x1xf32>
    %109 = vector.broadcast %108 : vector<2x16x1xf32> to vector<2x16x4xf32>
    %110 = arith.mulf %107, %109 : vector<2x16x4xf32>
    %111 = vector.shape_cast %110 : vector<2x16x4xf32> to vector<32x4xf32>
    %c0_34 = arith.constant 0 : index
    %c20 = arith.constant 20 : index
    %112 = vector.load %arg6[%c0_34, %c20] : memref<32x32xf32, #tpu.memory_space<vmem>>, vector<32x4xf32>
    tpu.vector_store %arg6[%c0_34, %c20], %111 {strides = array<i32>} : memref<32x32xf32, #tpu.memory_space<vmem>>, vector<32x4xf32>,
    %113 = vector.extract_strided_slice %6 {offsets = [0, 0, 24], sizes = [2, 16, 4], strides = [1, 1, 1]} : vector<2x16x32xf32> to vector<2x16x4xf32>
    %114 = vector.extract_strided_slice %8 {offsets = [0, 0, 24], sizes = [2, 16, 4], strides = [1, 1, 1]} : vector<2x16x32xf32> to vector<2x16x4xf32>
    %115 = vector.extract_strided_slice %10 {offsets = [0, 0, 24], sizes = [2, 16, 4], strides = [1, 1, 1]} : vector<2x16x32xf32> to vector<2x16x4xf32>
    %cst_35 = arith.constant dense<0.000000e+00> : vector<2x16x16xf32>
    %116 = tpu.matmul %113, %114, %cst_35 {dimension_numbers = #tpu.dot_dimension_numbers<[2], [2], [1], [1], [0, 0, 0, 1, 1, 1], [0], [0]>} : vector<2x16x4xf32>, vector<2x16x4xf32>, vector<2x16x16xf32> -> vector<2x16x16xf32>
    %cst_36 = arith.constant dense<0xFF800000> : vector<2x16xf32>
    %117 = vector.multi_reduction <maximumf>, %116, %cst_36 [2] : vector<2x16x16xf32> to vector<2x16xf32>
    %118 = vector.shape_cast %117 : vector<2x16xf32> to vector<2x16x1xf32>
    %119 = vector.broadcast %118 : vector<2x16x1xf32> to vector<2x16x16xf32>
    %120 = arith.subf %116, %119 : vector<2x16x16xf32>
    %121 = math.exp %120 : vector<2x16x16xf32>
    %cst_37 = arith.constant dense<0.000000e+00> : vector<2x16xf32>
    %122 = vector.multi_reduction <add>, %121, %cst_37 [2] : vector<2x16x16xf32> to vector<2x16xf32>
    %123 = vector.shape_cast %122 : vector<2x16xf32> to vector<2x16x1xf32>
    %cst_38 = arith.constant dense<0.000000e+00> : vector<2x16x4xf32>
    %124 = tpu.matmul %121, %115, %cst_38 {dimension_numbers = #tpu.dot_dimension_numbers<[2], [1], [1], [2], [0, 0, 0, 1, 1, 2], [0], [0]>} : vector<2x16x16xf32>, vector<2x16x4xf32>, vector<2x16x4xf32> -> vector<2x16x4xf32>
    %125 = tpu.reciprocal %123 {approx = true} : vector<2x16x1xf32> -> vector<2x16x1xf32>
    %126 = vector.broadcast %125 : vector<2x16x1xf32> to vector<2x16x4xf32>
    %127 = arith.mulf %124, %126 : vector<2x16x4xf32>
    %128 = vector.shape_cast %127 : vector<2x16x4xf32> to vector<32x4xf32>
    %c0_39 = arith.constant 0 : index
    %c24 = arith.constant 24 : index
    %129 = vector.load %arg6[%c0_39, %c24] : memref<32x32xf32, #tpu.memory_space<vmem>>, vector<32x4xf32>
    tpu.vector_store %arg6[%c0_39, %c24], %128 {strides = array<i32>} : memref<32x32xf32, #tpu.memory_space<vmem>>, vector<32x4xf32>,
    %130 = vector.extract_strided_slice %6 {offsets = [0, 0, 28], sizes = [2, 16, 4], strides = [1, 1, 1]} : vector<2x16x32xf32> to vector<2x16x4xf32>
    %131 = vector.extract_strided_slice %8 {offsets = [0, 0, 28], sizes = [2, 16, 4], strides = [1, 1, 1]} : vector<2x16x32xf32> to vector<2x16x4xf32>
    %132 = vector.extract_strided_slice %10 {offsets = [0, 0, 28], sizes = [2, 16, 4], strides = [1, 1, 1]} : vector<2x16x32xf32> to vector<2x16x4xf32>
    %cst_40 = arith.constant dense<0.000000e+00> : vector<2x16x16xf32>
    %133 = tpu.matmul %130, %131, %cst_40 {dimension_numbers = #tpu.dot_dimension_numbers<[2], [2], [1], [1], [0, 0, 0, 1, 1, 1], [0], [0]>} : vector<2x16x4xf32>, vector<2x16x4xf32>, vector<2x16x16xf32> -> vector<2x16x16xf32>
    %cst_41 = arith.constant dense<0xFF800000> : vector<2x16xf32>
    %134 = vector.multi_reduction <maximumf>, %133, %cst_41 [2] : vector<2x16x16xf32> to vector<2x16xf32>
    %135 = vector.shape_cast %134 : vector<2x16xf32> to vector<2x16x1xf32>
    %136 = vector.broadcast %135 : vector<2x16x1xf32> to vector<2x16x16xf32>
    %137 = arith.subf %133, %136 : vector<2x16x16xf32>
    %138 = math.exp %137 : vector<2x16x16xf32>
    %cst_42 = arith.constant dense<0.000000e+00> : vector<2x16xf32>
    %139 = vector.multi_reduction <add>, %138, %cst_42 [2] : vector<2x16x16xf32> to vector<2x16xf32>
    %140 = vector.shape_cast %139 : vector<2x16xf32> to vector<2x16x1xf32>
    %cst_43 = arith.constant dense<0.000000e+00> : vector<2x16x4xf32>
    %141 = tpu.matmul %138, %132, %cst_43 {dimension_numbers = #tpu.dot_dimension_numbers<[2], [1], [1], [2], [0, 0, 0, 1, 1, 2], [0], [0]>} : vector<2x16x16xf32>, vector<2x16x4xf32>, vector<2x16x4xf32> -> vector<2x16x4xf32>
    %142 = tpu.reciprocal %140 {approx = true} : vector<2x16x1xf32> -> vector<2x16x1xf32>
    %143 = vector.broadcast %142 : vector<2x16x1xf32> to vector<2x16x4xf32>
    %144 = arith.mulf %141, %143 : vector<2x16x4xf32>
    %145 = vector.shape_cast %144 : vector<2x16x4xf32> to vector<32x4xf32>
    %c0_44 = arith.constant 0 : index
    %c28 = arith.constant 28 : index
    %146 = vector.load %arg6[%c0_44, %c28] : memref<32x32xf32, #tpu.memory_space<vmem>>, vector<32x4xf32>
    tpu.vector_store %arg6[%c0_44, %c28], %145 {strides = array<i32>} : memref<32x32xf32, #tpu.memory_space<vmem>>, vector<32x4xf32>,
    %c0_45 = arith.constant 0 : index
    %c0_46 = arith.constant 0 : index
    %147 = vector.load %arg6[%c0_45, %c0_46] : memref<32x32xf32, #tpu.memory_space<vmem>>, vector<32x32xf32>
    %c0_47 = arith.constant 0 : index
    %c0_48 = arith.constant 0 : index
    %148 = vector.load %arg3[%c0_47, %c0_48] : memref<32x32xf32, #tpu.memory_space<vmem>>, vector<32x32xf32>
    %cst_49 = arith.constant dense<0.000000e+00> : vector<32x32xf32>
    %149 = tpu.matmul %147, %148, %cst_49 {dimension_numbers = #tpu.dot_dimension_numbers<[1], [0], [0], [1], [0, 0, 1, 1], [], []>} : vector<32x32xf32>, vector<32x32xf32>, vector<32x32xf32> -> vector<32x32xf32>
    %c0_50 = arith.constant 0 : index
    %c0_51 = arith.constant 0 : index
    %150 = vector.load %arg4[%c0_50, %c0_51] : memref<1x32xf32, #tpu.memory_space<vmem>>, vector<1x32xf32>
    %151 = vector.broadcast %150 : vector<1x32xf32> to vector<32x32xf32>
    %152 = arith.addf %149, %151 : vector<32x32xf32>
    %c0_52 = arith.constant 0 : index
    %c0_53 = arith.constant 0 : index
    %153 = vector.load %arg5[%c0_52, %c0_53] : memref<32x32xf32, #tpu.memory_space<vmem>>, vector<32x32xf32>
    tpu.vector_store %arg5[%c0_52, %c0_53], %152 {strides = array<i32>} : memref<32x32xf32, #tpu.memory_space<vmem>>, vector<32x32xf32>,
    return
  }
  func.func @transform_0(%arg0: i32) -> (i32, i32) {
    %c0_i32 = arith.constant 0 : i32
    %c0_i32_0 = arith.constant 0 : i32
    return %arg0, %c0_i32 : i32, i32
  }
  func.func @transform_1(%arg0: i32) -> (i32, i32) {
    %c0_i32 = arith.constant 0 : i32
    %c0_i32_0 = arith.constant 0 : i32
    %c0_i32_1 = arith.constant 0 : i32
    return %c0_i32, %c0_i32_0 : i32, i32
  }
  func.func @transform_2(%arg0: i32) -> (i32, i32) {
    %c0_i32 = arith.constant 0 : i32
    %c0_i32_0 = arith.constant 0 : i32
    %c0_i32_1 = arith.constant 0 : i32
    return %c0_i32, %c0_i32_0 : i32, i32
  }
  func.func @transform_3(%arg0: i32) -> (i32, i32) {
    %c0_i32 = arith.constant 0 : i32
    %c0_i32_0 = arith.constant 0 : i32
    %c0_i32_1 = arith.constant 0 : i32
    return %c0_i32, %c0_i32_0 : i32, i32
  }
  func.func @transform_4(%arg0: i32) -> (i32, i32) {
    %c0_i32 = arith.constant 0 : i32
    %c0_i32_0 = arith.constant 0 : i32
    return %arg0, %c0_i32 : i32, i32
  }
}

</mosaic_0001>

<bundles_post_ra>
// kernel: tpu_custom_call.1
= control target key start
LH: loop header
LB: loop body
LE: loop exit
PB: predicated region body
PF: predicated region fallthrough
CT: control target
= control target key end

     0   :  { %9 = vsyncpa [#allocation4], 0  ;;  %s5152_s0 = inlined_call_operand.hbm [shape: f32[32,32], index: 0, kind: input, shape index: {}]   ;;  %s5153_s1 = inlined_call_operand.hbm [shape: f32[32,96], index: 1, kind: input, shape index: {}]   ;;  %s5154_s2 = inlined_call_operand.hbm [shape: f32[32,32], index: 2, kind: input, shape index: {}]   ;;  %s5155_s3 = inlined_call_operand.vmem [shape: f32[1,32], index: 3, kind: input, shape index: {}]   ;;  %s5156_s4 = inlined_call_operand.hbm [shape: f32[32,32], index: 4, kind: output, shape index: {}]  }
   0x1   :  { %10 = vsyncpa [#allocation7], 0 }
   0x2   :  { %11 = vsyncpa [#allocation5], 0  ;;  %s4406_s15 = smov [#allocation6]   ;;  %s4407_s17 = smov [#allocation3]  }
   0x3   :  { %s29_s16 = sshll.u32 %s4406_s15, 4  ;;  %s17_s18 = sshll.u32 %s4407_s17, 4  ;;  %s30_s16 = int_to_ptr.vmem [resolvable:$true] %s29_s16  ;;  %s18_s18 = int_to_ptr.vmem [resolvable:$true] %s17_s18 }
   0x4   :  { %s4328_s19 = scalar_lea.vmem %s30_s16, 512  ;;  %p4333_p1 = scmp.lt.s32.totalorder %s30_s16, %s30_s16 }
   0x5   :  { %p4329_p0 = scmp.ne.s32.totalorder %s30_s16, %s4328_s19  ;;  %p4334_p2 = scmp.lt.s32.totalorder %s4328_s19, %s4328_s19 }
   0x7   :  { %p4335_p3 = por %p4334_p2, %p4333_p1 }
   0x9   :  { %p4336_p4 = pnand %p4335_p3, %p4329_p0 }
   0xb   :  { %4339 = shalt.err (!%p4336_p4)
}
   0xc   :  { %s4408_s20 = smov 128   ;;  %s4409_s21 = smov 8  }
   0xd   :  { %35 = dma.hbm_to_vmem [thread:$0]  %s5153_s1, 512, %s30_s16, [#allocation7], %s4408_s20, %s4408_s20, %s4409_s21  }
   0xe   :  { %s4348_s24 = scalar_lea.vmem %s18_s18, 512  ;;  %p4353_p6 = scmp.lt.s32.totalorder %s18_s18, %s18_s18 }
   0xf   :  { %p4349_p5 = scmp.ne.s32.totalorder %s18_s18, %s4348_s24  ;;  %p4354_p7 = scmp.lt.s32.totalorder %s4348_s24, %s4348_s24 }
  0x11   :  { %p4355_p8 = por %p4354_p7, %p4353_p6 }
  0x13   :  { %p4356_p9 = pnand %p4355_p8, %p4349_p5 }
  0x15   :  { %4359 = shalt.err (!%p4356_p9)
}
  0x16   :  { %23 = dma.hbm_to_vmem [thread:$0]  %s5152_s0, 512, %s18_s18, [#allocation4], %s4408_s20, %s4408_s20, %s4409_s21  }
  0x17   :  { %s4410_s27 = smov [#allocation8]  }
  0x18   :  { %s41_s28 = sshll.u32 %s4410_s27, 4  ;;  %s42_s28 = int_to_ptr.vmem [resolvable:$true] %s41_s28 }
  0x19   :  { %s4368_s29 = scalar_lea.vmem %s42_s28, 512  ;;  %p4373_p11 = scmp.lt.s32.totalorder %s42_s28, %s42_s28 }
  0x1a   :  { %p4369_p10 = scmp.ne.s32.totalorder %s42_s28, %s4368_s29  ;;  %p4374_p12 = scmp.lt.s32.totalorder %s4368_s29, %s4368_s29 }
  0x1c   :  { %p4375_p13 = por %p4374_p12, %p4373_p11 }
  0x1e   :  { %p4376_p0 = pnand %p4375_p13, %p4369_p10 }
  0x20   :  { %4379 = shalt.err (!%p4376_p0)
}
  0x21   :  { %47 = dma.hbm_to_vmem [thread:$0]  %s5154_s2, 512, %s42_s28, [#allocation7], %s4408_s20, %s4408_s20, %s4409_s21  }
  0x22   :  { %4400 = dma.done.wait [#allocation4], 512  }
  0x23   :  { %4401 = vsyncadd [#allocation4], 4294966784 }
  0x24   :  { %4402 = dma.done.wait [#allocation7], 1024  }
  0x25   :  { %4403 = vsyncadd [#allocation7], 4294966272  ;;  %vm67_vm0 = vcmask 261120   ;;  %v66_v0 = vld [vmem:[#allocation6 + $0x18] sm:$0xff]  ;;  %v65_v1 = vld [vmem:[#allocation6 + $0x10] sm:$0xff]  ;;  %s4411_s0 = smov 96  }
  0x26   :  { %3905 = vmatprep.subr.mxu1 %v66_v0  ;;  %v59_v2 = vld [vmem:[#allocation3] sm:$0xff]  ;;  %v64_v3 = vld [vmem:[#allocation6 + $0x8] sm:$0xff]  ;;  %v61_v6 = vld [vmem:[#allocation3 + $0x10] sm:$0xff]  ;;  %vm175_vm1 = vcmask 31744   ;;  %s4412_s2 = smov 64   ;;  %s4413_s5 = smov 92  }
  0x27   :  { %3906 = vmatpush3.msra.mxu1 %v66_v0  ;;  %3913 = vmatprep.mubr.msk.f32.mxu1 %vm67_vm0, %v59_v2  ;;  %v63_v4 = vld [vmem:[#allocation6] sm:$0xff]  ;;  %v60_v5 = vld [vmem:[#allocation3 + $0x8] sm:$0xff]  ;;  %v62_v7 = vld [vmem:[#allocation3 + $0x18] sm:$0xff]  ;;  %vm352_vm2 = vcmask 130048   ;;  %s4414_s6 = smov 124   ;;  %s4415_s7 = smov 60  }
  0x28   :  { %3907 = vmatprep.subr.mxu1 %v65_v1  ;;  %s4416_s8 = smov 88   ;;  %s4417_s9 = smov 120   ;;  %vm991_vm3 = vcmask 64544   ;;  %vm1412_vm4 = vcmask 97344   ;;  %vm1833_vm5 = vcmask 130144   ;;  %vm2254_vm6 = vcmask 162944  }
  0x29   :  { %3908 = vmatpush3.msra.mxu1 %v65_v1  ;;  %s4418_s10 = smov 56   ;;  %s4419_s11 = smov 84   ;;  %vm2675_vm7 = vcmask 195744   ;;  %vm3096_vm8 = vcmask 228544   ;;  %vm3517_vm9 = vcmask 261344  }
  0x2a   :  { %3909 = vmatprep.subr.mxu1 %v64_v3  ;;  %s4420_s12 = smov 116   ;;  %s4421_s13 = smov 52  }
  0x2b   :  { %3910 = vmatpush3.msra.mxu1 %v64_v3  ;;  %s4422_s14 = smov 80   ;;  %s4423_s15 = smov 112  }
  0x2c   :  { %3911 = vmatprep.subr.mxu1 %v63_v4  ;;  %s4424_s16 = smov 48   ;;  %s4425_s17 = smov 76  }
  0x2d   :  { %3912 = vmatpush3.msra.mxu1 %v63_v4  ;;  %s4426_s18 = smov 108   ;;  %s4427_s19 = smov 44  }
  0x2e   :  { %3914 = vmatmul.mubr.msk.f32.vlgmr.msra.gmra.mxu1 %vm67_vm0, %v60_v5  ;;  %s4428_s22 = smov 72   ;;  %s4429_s23 = smov 104  }
  0x2f   :  { %3916 = vmatprep.mubr.msk.f32.mxu1 %vm67_vm0, %v61_v6  ;;  %s4430_s24 = smov 40   ;;  %s4431_s25 = smov 68  }
  0x30   :  { %s4432_s26 = smov 100   ;;  %s4433_s27 = smov 36  }
  0x31   :  { %s4434_s28 = smov 4   ;;  %s4435_s29 = smov 12  }
  0x32   :  { %3917 = vmatmul.mubr.msk.f32.gmra.mxu1 %vm67_vm0, %v62_v7  ;;  %s4436_s1 = smov 16   ;;  %s4437_s30 = smov 20  }
  0xee   :  { %v4488_v8 = vpop.f32.mrf.mxu1 }
  0xef   :  { %173 = vrot.lane.b32.xlu0 %v4488_v8, %s4411_s0  ;;  %v4525_v17 = vmul.f32 0.5, %v4488_v8 }
  0xf0   :  { %v4491_v9 = vpop.f32.mrf.mxu1 }
  0xf1   :  { %v4494_v10 = vmul.f32 0.5, %v4491_v9 }
  0xf2   :  { %v4496_v11 = vpop.f32.mrf.mxu1 }
  0xf3   :  { %171 = vrot.lane.b32.xlu0 %v4491_v9, %s4411_s0  ;;  %3923 = vmatprep.mubr.msk.f32.mxu1 %vm175_vm1, %v4494_v10  ;;  %v4532_v19 = vmul.f32 0.5, %v4496_v11 }
  0xf4   :  { %265 = vrot.lane.b32.xlu1 %v4496_v11, %s4411_s0  ;;  %v4502_v12 = vpop.f32.mrf.mxu1 }
  0xf5   :  { %v4505_v13 = vmul.f32 0.5, %v4502_v12 }
  0xf7   :  { %389 = vrot.lane.b32.xlu0 %v4491_v9, %s4412_s2  ;;  %3930 = vmatprep.mubr.msk.f32.mxu0 %vm175_vm1, %v4505_v13 }
  0xf8   :  { %263 = vrot.lane.b32.xlu1 %v4502_v12, %s4411_s0  ;;  %s4438_s0 = smov 24  }
  0xfb   :  { %476 = vrot.lane.b32.xlu0 %v4502_v12, %s4412_s2 }
  0xfc   :  { %391 = vrot.lane.b32.xlu1 %v4488_v8, %s4412_s2 }
 0x100   :  { %478 = vrot.lane.b32.xlu1 %v4496_v11, %s4412_s2  ;;  %s4439_s2 = smov 28  }
 0x104   :  { %581 = vrot.lane.b32.xlu1 %v4488_v8, %s4413_s5 }
 0x108   :  { %579 = vrot.lane.b32.xlu1 %v4491_v9, %s4413_s5 }
 0x161   :  { %v174_v14 = vpop.permute.xlu0 %173 }
 0x162   :  { %3919 = vmatprep.subr.msk.mxu1 %vm175_vm1, %v174_v14 }
 0x163   :  { %3920 = vmatpush3.xpose.msk.msra.mxu1 %vm175_vm1, %v174_v14 }
 0x165   :  { %v172_v15 = vpop.permute.xlu0 %171 }
 0x166   :  { %v266_v16 = vpop.permute.xlu1 %265  ;;  %3921 = vmatprep.subr.msk.mxu1 %vm175_vm1, %v172_v15 }
 0x167   :  { %3926 = vmatprep.subr.msk.mxu0 %vm175_vm1, %v266_v16  ;;  %3922 = vmatpush3.xpose.msk.msra.mxu1 %vm175_vm1, %v172_v15 }
 0x168   :  { %3927 = vmatpush3.xpose.msk.msra.mxu0 %vm175_vm1, %v266_v16 }
 0x169   :  { %v390_v21 = vpop.permute.xlu0 %389 }
 0x16a   :  { %v264_v18 = vpop.permute.xlu1 %263  ;;  %3924 = vmatmul.mubr.msk.f32.vlgmr.msra.gmra.mxu1 %vm175_vm1, %v4525_v17 }
 0x16b   :  { %3928 = vmatprep.subr.msk.mxu0 %vm175_vm1, %v264_v18 }
 0x16c   :  { %3929 = vmatpush3.xpose.msk.msra.mxu0 %vm175_vm1, %v264_v18 }
 0x16d   :  { %v477_v33 = vpop.permute.xlu0 %476 }
 0x16e   :  { %v392_v20 = vpop.permute.xlu1 %391 }
 0x16f   :  { %3931 = vmatmul.mubr.msk.f32.vlgmr.msra.gmra.mxu0 %vm175_vm1, %v4532_v19  ;;  %3933 = vmatprep.subr.mxu1 %v392_v20 }
 0x170   :  { %3934 = vmatpush3.msra.mxu1 %v392_v20 }
 0x171   :  { %3935 = vmatprep.subr.mxu1 %v390_v21 }
 0x172   :  { %3936 = vmatpush3.msra.mxu1 %v390_v21  ;;  %v4536_v22 = vpop.permute.xlu1 %478 }
 0x173   :  { %3940 = vmatprep.subr.mxu1 %v4536_v22 }
 0x176   :  { %v582_v23 = vpop.permute.xlu1 %581 }
 0x177   :  { %3947 = vmatprep.subr.msk.mxu0 %vm175_vm1, %v582_v23 }
 0x178   :  { %3948 = vmatpush3.xpose.msk.msra.mxu0 %vm175_vm1, %v582_v23 }
 0x17a   :  { %v580_v24 = vpop.permute.xlu1 %579 }
 0x17b   :  { %3949 = vmatprep.subr.msk.mxu0 %vm175_vm1, %v580_v24 }
 0x17c   :  { %3950 = vmatpush3.xpose.msk.msra.mxu0 %vm175_vm1, %v580_v24 }
 0x22a   :  { %v3925_v25 = vpop.f32.mrf.mxu1 }
 0x22b   :  { %v356_v26 = vsel %vm352_vm2, %v3925_v25, -inf }
 0x22c   :  { %357 = vmax.xlane.f32.xlu1 %v356_v26  ;;  %v252_v27 = vpop.f32.mrf.mxu1 }
 0x22d   :  { %v353_v28 = vsel %vm352_vm2, %v252_v27, -inf }
 0x22e   :  { %354 = vmax.xlane.f32.xlu0 %v353_v28 }
 0x22f   :  { %v3932_v29 = vpop.f32.mrf.mxu0 }
 0x230   :  { %v362_v30 = vsel %vm352_vm2, %v3932_v29, -inf }
 0x231   :  { %v343_v31 = vpop.f32.mrf.mxu0 }
 0x232   :  { %363 = vmax.xlane.f32.xlu0 %v362_v30  ;;  %v359_v32 = vsel %vm352_vm2, %v343_v31, -inf }
 0x236   :  { %360 = vmax.xlane.f32.xlu0 %v359_v32 }
 0x23d   :  { %575 = vrot.lane.b32.xlu1 %v4494_v10, %s4414_s6 }
 0x241   :  { %670 = vrot.lane.b32.xlu1 %v4502_v12, %s4413_s5 }
 0x245   :  { %668 = vrot.lane.b32.xlu1 %v4532_v19, %s4414_s6 }
 0x249   :  { %795 = vrot.lane.b32.xlu1 %v4488_v8, %s4415_s7 }
 0x24c   :  { %672 = vrot.lane.b32.xlu0 %v4496_v11, %s4413_s5 }
 0x24d   :  { %882 = vrot.lane.b32.xlu1 %v4496_v11, %s4415_s7 }
 0x250   :  { %577 = vrot.lane.b32.xlu0 %v4525_v17, %s4414_s6 }
 0x251   :  { %1002 = vrot.lane.b32.xlu1 %v4488_v8, %s4416_s8 }
 0x254   :  { %666 = vrot.lane.b32.xlu0 %v4505_v13, %s4414_s6 }
 0x255   :  { %1000 = vrot.lane.b32.xlu1 %v4491_v9, %s4416_s8 }
 0x258   :  { %793 = vrot.lane.b32.xlu0 %v4491_v9, %s4415_s7 }
 0x25c   :  { %880 = vrot.lane.b32.xlu0 %v4502_v12, %s4415_s7  ;;  %s4440_s7 = smov [#allocation9]  }
 0x2b5   :  { %v358_v34 = vpop.xlane.xlu1 %357 }
 0x2b6   :  { %v366_v35 = vsub.f32 %v3925_v25, %v358_v34 }
 0x2b7   :  { %v355_v36 = vpop.xlane.xlu0 %354 }
 0x2b8   :  { %v365_v37 = vsub.f32 %v252_v27, %v355_v36  ;;  %v371_v38 = vmul.f32 1.442695, %v366_v35 }
 0x2b9   :  { %v576_v39 = vpop.permute.xlu1 %575 }
 0x2ba   :  { %v369_v40 = vmul.f32 1.442695, %v365_v37  ;;  %3951 = vmatprep.mubr.msk.f32.mxu0 %vm175_vm1, %v576_v39 }
 0x2bb   :  { %v364_v41 = vpop.xlane.xlu0 %363 }
 0x2bc   :  { %4192 = vpow2.f32 %v369_v40  ;;  %v368_v42 = vsub.f32 %v3932_v29, %v364_v41 }
 0x2bd   :  { %4194 = vpow2.f32 %v371_v38  ;;  %v671_v43 = vpop.permute.xlu1 %670 }
 0x2be   :  { %v375_v46 = vmul.f32 1.442695, %v368_v42 }
 0x2bf   :  { %v361_v44 = vpop.xlane.xlu0 %360 }
 0x2c0   :  { %v367_v45 = vsub.f32 %v343_v31, %v361_v44 }
 0x2c1   :  { %v669_v47 = vpop.permute.xlu1 %668 }
 0x2c2   :  { %v373_v48 = vmul.f32 1.442695, %v367_v45 }
 0x2c3   :  { %v673_v49 = vpop.permute.xlu0 %672 }
 0x2c4   :  { %4196 = vpow2.f32 %v373_v48 }
 0x2c5   :  { %4198 = vpow2.f32 %v375_v46  ;;  %v796_v50 = vpop.permute.xlu1 %795 }
 0x2c6   :  { %3961 = vmatprep.subr.mxu0 %v796_v50 }
 0x2c7   :  { %v578_v51 = vpop.permute.xlu0 %577 }
 0x2c8   :  { %3952 = vmatmul.mubr.msk.f32.vlgmr.msra.gmra.mxu0 %vm175_vm1, %v578_v51 }
 0x2c9   :  { %v4565_v52 = vpop.eup %4192  ;;  %3962 = vmatpush3.msra.mxu0 %v796_v50  ;;  %v883_v54 = vpop.permute.xlu1 %882 }
 0x2ca   :  { %v4567_v53 = vpop.eup %4194  ;;  %3937 = vmatprep.mubr.msk.f32.mxu1 %vm352_vm2, %v4565_v52 }
 0x2cb   :  { %3938 = vmatmul.mubr.msk.f32.vlgmr.msra.gmra.mxu1 %vm352_vm2, %v4567_v53  ;;  %v667_v55 = vpop.permute.xlu0 %666 }
 0x2cc   :  { %3941 = vmatpush3.msra.mxu1 %v4536_v22 }
 0x2cd   :  { %3942 = vmatprep.subr.mxu1 %v477_v33  ;;  %v4577_v58 = vpop.permute.xlu1 %1002 }
 0x2ce   :  { %3943 = vmatpush3.msra.mxu1 %v477_v33 }
 0x2cf   :  { %3954 = vmatprep.subr.msk.mxu1 %vm175_vm1, %v673_v49  ;;  %v794_v56 = vpop.permute.xlu0 %793 }
 0x2d0   :  { %3963 = vmatprep.subr.mxu0 %v794_v56 }
 0x2d1   :  { %v4575_v57 = vpop.eup %4196  ;;  %3964 = vmatpush3.msra.mxu0 %v794_v56  ;;  %v1001_v15 = vpop.permute.xlu1 %1000 }
 0x2d2   :  { %v4579_v59 = vpop.eup %4198  ;;  %3944 = vmatprep.mubr.msk.f32.mxu1 %vm352_vm2, %v4575_v57  ;;  %3975 = vmatprep.subr.msk.mxu0 %vm175_vm1, %v4577_v58 }
 0x2d3   :  { %3945 = vmatmul.mubr.msk.f32.vlgmr.msra.gmra.mxu1 %vm352_vm2, %v4579_v59  ;;  %v881_v60 = vpop.permute.xlu0 %880 }
 0x2d4   :  { %3955 = vmatpush3.xpose.msk.msra.mxu1 %vm175_vm1, %v673_v49  ;;  %3958 = vmatprep.mubr.msk.f32.mxu1 %vm175_vm1, %v667_v55 }
 0x2d5   :  { %3956 = vmatprep.subr.msk.mxu1 %vm175_vm1, %v671_v43 }
 0x2d8   :  { %3957 = vmatpush3.xpose.msk.msra.mxu1 %vm175_vm1, %v671_v43 }
 0x2d9   :  { %3968 = vmatprep.subr.mxu1 %v883_v54 }
 0x2db   :  { %3959 = vmatmul.mubr.msk.f32.vlgmr.msra.gmra.mxu1 %vm175_vm1, %v669_v47 }
 0x2dc   :  { %3969 = vmatpush3.msra.mxu1 %v883_v54 }
 0x2dd   :  { %3970 = vmatprep.subr.mxu1 %v881_v60 }
 0x2de   :  { %3971 = vmatpush3.msra.mxu1 %v881_v60 }
 0x388   :  { %v3953_v61 = vpop.f32.mrf.mxu0 }
 0x389   :  { %v760_v62 = vsel %vm352_vm2, %v3953_v61, -inf }
 0x38a   :  { %761 = vmax.xlane.f32.xlu1 %v760_v62  ;;  %v657_v63 = vpop.f32.mrf.mxu0 }
 0x38b   :  { %v757_v0 = vsel %vm352_vm2, %v657_v63, -inf  ;;  %v4594_v1 = vpop.f32.mrf.mxu1 }
 0x38c   :  { %758 = vmax.xlane.f32.xlu0 %v757_v0  ;;  %5157 = vst [vmem:[#allocation13_spill] sm:$0xff] %v4594_v1 }
 0x38d   :  { %v4596_v2 = vpop.f32.mrf.mxu1 }
 0x393   :  { %v4598_v3 = vpop.f32.mrf.mxu1 }
 0x394   :  { %5158 = vst [vmem:[#allocation14_spill] sm:$0xff] %v4598_v3 }
 0x395   :  { %v4600_v4 = vpop.f32.mrf.mxu1 }
 0x396   :  { %5159 = vst [vmem:[#allocation15_spill] sm:$0xff] %v4600_v4 }
 0x39b   :  { %v3960_v5 = vpop.f32.mrf.mxu1  ;;  %996 = vrot.lane.b32.xlu1 %v4494_v10, %s4417_s9 }
 0x39c   :  { %v766_v6 = vsel %vm352_vm2, %v3960_v5, -inf }
 0x39d   :  { %767 = vmax.xlane.f32.xlu0 %v766_v6  ;;  %v748_v7 = vpop.f32.mrf.mxu1 }
 0x39e   :  { %v763_v14 = vsel %vm352_vm2, %v748_v7, -inf }
 0x39f   :  { %1091 = vrot.lane.b32.xlu1 %v4502_v12, %s4416_s8 }
 0x3a1   :  { %764 = vmax.xlane.f32.xlu0 %v763_v14 }
 0x3a3   :  { %1089 = vrot.lane.b32.xlu1 %v4532_v19, %s4417_s9 }
 0x3a7   :  { %1216 = vrot.lane.b32.xlu1 %v4488_v8, %s4418_s10 }
 0x3ab   :  { %1303 = vrot.lane.b32.xlu1 %v4496_v11, %s4418_s10 }
 0x3af   :  { %1423 = vrot.lane.b32.xlu1 %v4488_v8, %s4419_s11 }
 0x3b3   :  { %1421 = vrot.lane.b32.xlu1 %v4491_v9, %s4419_s11 }
 0x3b7   :  { %1093 = vrot.lane.b32.xlu0 %v4496_v11, %s4416_s8  ;;  %s3643_s8 = sshll.u32 %s4440_s7, 4  ;;  %s3644_s8 = int_to_ptr.vmem [resolvable:$true] %s3643_s8 }
 0x3b8   :  { %p4385_p2 = scmp.lt.s32.totalorder %s3644_s8, %s3644_s8 }
 0x3bb   :  { %998 = vrot.lane.b32.xlu0 %v4525_v17, %s4417_s9 }
 0x3bf   :  { %1087 = vrot.lane.b32.xlu0 %v4505_v13, %s4417_s9 }
 0x3c3   :  { %1214 = vrot.lane.b32.xlu0 %v4491_v9, %s4418_s10 }
 0x3c7   :  { %1301 = vrot.lane.b32.xlu0 %v4502_v12, %s4418_s10 }
 0x413   :  { %v762_v16 = vpop.xlane.xlu1 %761 }
 0x414   :  { %v770_v18 = vsub.f32 %v3953_v61, %v762_v16 }
 0x415   :  { %v759_v20 = vpop.xlane.xlu0 %758 }
 0x416   :  { %v769_v21 = vsub.f32 %v657_v63, %v759_v20  ;;  %v775_v22 = vmul.f32 1.442695, %v770_v18 }
 0x417   :  { %v997_v24 = vpop.permute.xlu1 %996 }
 0x418   :  { %v773_v23 = vmul.f32 1.442695, %v769_v21 }
 0x41a   :  { %4200 = vpow2.f32 %v773_v23 }
 0x41b   :  { %4202 = vpow2.f32 %v775_v22  ;;  %v1092_v25 = vpop.permute.xlu1 %1091 }
 0x41f   :  { %v1090_v29 = vpop.permute.xlu1 %1089 }
 0x423   :  { %v1217_v35 = vpop.permute.xlu1 %1216 }
 0x426   :  { %v768_v26 = vpop.xlane.xlu0 %767 }
 0x427   :  { %v4620_v27 = vpop.eup %4200  ;;  %v772_v30 = vsub.f32 %v3960_v5, %v768_v26  ;;  %v1304_v38 = vpop.permute.xlu1 %1303 }
 0x428   :  { %v4622_v28 = vpop.eup %4202  ;;  %3965 = vmatprep.mubr.msk.f32.mxu0 %vm352_vm2, %v4620_v27 }
 0x429   :  { %3966 = vmatmul.mubr.msk.f32.vlgmr.msra.gmra.mxu0 %vm352_vm2, %v4622_v28  ;;  %v779_v33 = vmul.f32 1.442695, %v772_v30 }
 0x42a   :  { %3976 = vmatpush3.xpose.msk.msra.mxu0 %vm175_vm1, %v4577_v58  ;;  %v765_v31 = vpop.xlane.xlu0 %764  ;;  %3979 = vmatprep.mubr.msk.f32.mxu0 %vm175_vm1, %v997_v24 }
 0x42b   :  { %v771_v32 = vsub.f32 %v748_v7, %v765_v31  ;;  %3977 = vmatprep.subr.msk.mxu0 %vm175_vm1, %v1001_v15  ;;  %v4637_v42 = vpop.permute.xlu1 %1423 }
 0x42d   :  { %v777_v34 = vmul.f32 1.442695, %v771_v32 }
 0x42e   :  { %3978 = vmatpush3.xpose.msk.msra.mxu0 %vm175_vm1, %v1001_v15  ;;  %v1094_v36 = vpop.permute.xlu0 %1093 }
 0x42f   :  { %4204 = vpow2.f32 %v777_v34  ;;  %3982 = vmatprep.subr.msk.mxu1 %vm175_vm1, %v1094_v36  ;;  %3989 = vmatprep.subr.mxu0 %v1217_v35  ;;  %v1422_v61 = vpop.permute.xlu1 %1421 }
 0x430   :  { %4206 = vpow2.f32 %v779_v33 }
 0x432   :  { %v999_v37 = vpop.permute.xlu0 %998 }
 0x433   :  { %3980 = vmatmul.mubr.msk.f32.vlgmr.msra.gmra.mxu0 %vm175_vm1, %v999_v37 }
 0x434   :  { %3990 = vmatpush3.msra.mxu0 %v1217_v35 }
 0x436   :  { %v1088_v39 = vpop.permute.xlu0 %1087 }
 0x43a   :  { %v1215_v40 = vpop.permute.xlu0 %1214 }
 0x43b   :  { %3991 = vmatprep.subr.mxu0 %v1215_v40 }
 0x43c   :  { %v4635_v41 = vpop.eup %4204  ;;  %3992 = vmatpush3.msra.mxu0 %v1215_v40 }
 0x43d   :  { %v4639_v43 = vpop.eup %4206  ;;  %3972 = vmatprep.mubr.msk.f32.mxu1 %vm352_vm2, %v4635_v41  ;;  %4003 = vmatprep.subr.msk.mxu0 %vm175_vm1, %v4637_v42 }
 0x43e   :  { %3973 = vmatmul.mubr.msk.f32.vlgmr.msra.gmra.mxu1 %vm352_vm2, %v4639_v43  ;;  %v1302_v44 = vpop.permute.xlu0 %1301 }
 0x43f   :  { %3983 = vmatpush3.xpose.msk.msra.mxu1 %vm175_vm1, %v1094_v36  ;;  %3986 = vmatprep.mubr.msk.f32.mxu1 %vm175_vm1, %v1088_v39 }
 0x440   :  { %3984 = vmatprep.subr.msk.mxu1 %vm175_vm1, %v1092_v25 }
 0x443   :  { %3985 = vmatpush3.xpose.msk.msra.mxu1 %vm175_vm1, %v1092_v25 }
 0x444   :  { %3996 = vmatprep.subr.mxu1 %v1304_v38 }
 0x446   :  { %3987 = vmatmul.mubr.msk.f32.vlgmr.msra.gmra.mxu1 %vm175_vm1, %v1090_v29 }
 0x447   :  { %3997 = vmatpush3.msra.mxu1 %v1304_v38 }
 0x448   :  { %3998 = vmatprep.subr.mxu1 %v1302_v44 }
 0x449   :  { %3999 = vmatpush3.msra.mxu1 %v1302_v44 }
 0x4e9   :  { %v4652_v45 = vpop.f32.mrf.mxu0 }
 0x4eb   :  { %v4654_v46 = vpop.f32.mrf.mxu0 }
 0x4f3   :  { %v3981_v47 = vpop.f32.mrf.mxu0 }
 0x4f4   :  { %v1181_v48 = vsel %vm352_vm2, %v3981_v47, -inf }
 0x4f5   :  { %1182 = vmax.xlane.f32.xlu1 %v1181_v48  ;;  %v1078_v49 = vpop.f32.mrf.mxu0 }
 0x4f6   :  { %v1178_v50 = vsel %vm352_vm2, %v1078_v49, -inf }
 0x4f7   :  { %1179 = vmax.xlane.f32.xlu0 %v1178_v50 }
 0x4fe   :  { %v4658_v51 = vpop.f32.mrf.mxu1 }
 0x500   :  { %v4660_v54 = vpop.f32.mrf.mxu1 }
 0x506   :  { %v3988_v55 = vpop.f32.mrf.mxu1  ;;  %1417 = vrot.lane.b32.xlu1 %v4494_v10, %s4420_s12 }
 0x507   :  { %v1187_v56 = vsel %vm352_vm2, %v3988_v55, -inf }
 0x508   :  { %1188 = vmax.xlane.f32.xlu0 %v1187_v56  ;;  %v1169_v58 = vpop.f32.mrf.mxu1 }
 0x509   :  { %v1184_v60 = vsel %vm352_vm2, %v1169_v58, -inf }
 0x50a   :  { %1512 = vrot.lane.b32.xlu1 %v4502_v12, %s4419_s11 }
 0x50c   :  { %1185 = vmax.xlane.f32.xlu0 %v1184_v60 }
 0x50e   :  { %1510 = vrot.lane.b32.xlu1 %v4532_v19, %s4420_s12 }
 0x512   :  { %1637 = vrot.lane.b32.xlu1 %v4488_v8, %s4421_s13 }
 0x516   :  { %1724 = vrot.lane.b32.xlu1 %v4496_v11, %s4421_s13 }
 0x51a   :  { %1844 = vrot.lane.b32.xlu1 %v4488_v8, %s4422_s14 }
 0x51e   :  { %1842 = vrot.lane.b32.xlu1 %v4491_v9, %s4422_s14 }
 0x522   :  { %1514 = vrot.lane.b32.xlu0 %v4496_v11, %s4419_s11 }
 0x526   :  { %1419 = vrot.lane.b32.xlu0 %v4525_v17, %s4420_s12 }
 0x52a   :  { %1508 = vrot.lane.b32.xlu0 %v4505_v13, %s4420_s12 }
 0x52e   :  { %1635 = vrot.lane.b32.xlu0 %v4491_v9, %s4421_s13 }
 0x532   :  { %1722 = vrot.lane.b32.xlu0 %v4502_v12, %s4421_s13 }
 0x57e   :  { %v1183_v62 = vpop.xlane.xlu1 %1182 }
 0x57f   :  { %v1191_v63 = vsub.f32 %v3981_v47, %v1183_v62 }
 0x580   :  { %v1180_v0 = vpop.xlane.xlu0 %1179 }
 0x581   :  { %v1190_v5 = vsub.f32 %v1078_v49, %v1180_v0  ;;  %v1196_v6 = vmul.f32 1.442695, %v1191_v63 }
 0x582   :  { %v1418_v14 = vpop.permute.xlu1 %1417 }
 0x583   :  { %v1194_v7 = vmul.f32 1.442695, %v1190_v5 }
 0x585   :  { %4208 = vpow2.f32 %v1194_v7 }
 0x586   :  { %4210 = vpow2.f32 %v1196_v6  ;;  %v1513_v15 = vpop.permute.xlu1 %1512 }
 0x58a   :  { %v1511_v21 = vpop.permute.xlu1 %1510 }
 0x58e   :  { %v1638_v29 = vpop.permute.xlu1 %1637 }
 0x591   :  { %v1189_v16 = vpop.xlane.xlu0 %1188 }
 0x592   :  { %v4680_v18 = vpop.eup %4208  ;;  %v1193_v22 = vsub.f32 %v3988_v55, %v1189_v16  ;;  %v1725_v32 = vpop.permute.xlu1 %1724 }
 0x593   :  { %v4682_v20 = vpop.eup %4210  ;;  %3993 = vmatprep.mubr.msk.f32.mxu0 %vm352_vm2, %v4680_v18 }
 0x594   :  { %3994 = vmatmul.mubr.msk.f32.vlgmr.msra.gmra.mxu0 %vm352_vm2, %v4682_v20  ;;  %v1200_v25 = vmul.f32 1.442695, %v1193_v22 }
 0x595   :  { %4004 = vmatpush3.xpose.msk.msra.mxu0 %vm175_vm1, %v4637_v42  ;;  %v1186_v23 = vpop.xlane.xlu0 %1185  ;;  %4007 = vmatprep.mubr.msk.f32.mxu0 %vm175_vm1, %v1418_v14 }
 0x596   :  { %v1192_v24 = vsub.f32 %v1169_v58, %v1186_v23  ;;  %4005 = vmatprep.subr.msk.mxu0 %vm175_vm1, %v1422_v61  ;;  %v4697_v36 = vpop.permute.xlu1 %1844 }
 0x598   :  { %v1198_v26 = vmul.f32 1.442695, %v1192_v24 }
 0x599   :  { %4006 = vmatpush3.xpose.msk.msra.mxu0 %vm175_vm1, %v1422_v61  ;;  %v1515_v30 = vpop.permute.xlu0 %1514 }
 0x59a   :  { %4212 = vpow2.f32 %v1198_v26  ;;  %4010 = vmatprep.subr.msk.mxu1 %vm175_vm1, %v1515_v30  ;;  %4017 = vmatprep.subr.mxu0 %v1638_v29  ;;  %v1843_v61 = vpop.permute.xlu1 %1842 }
 0x59b   :  { %4214 = vpow2.f32 %v1200_v25 }
 0x59d   :  { %v1420_v31 = vpop.permute.xlu0 %1419 }
 0x59e   :  { %4008 = vmatmul.mubr.msk.f32.vlgmr.msra.gmra.mxu0 %vm175_vm1, %v1420_v31 }
 0x59f   :  { %4018 = vmatpush3.msra.mxu0 %v1638_v29 }
 0x5a1   :  { %v1509_v33 = vpop.permute.xlu0 %1508 }
 0x5a5   :  { %v1636_v34 = vpop.permute.xlu0 %1635 }
 0x5a6   :  { %4019 = vmatprep.subr.mxu0 %v1636_v34 }
 0x5a7   :  { %v4695_v35 = vpop.eup %4212  ;;  %4020 = vmatpush3.msra.mxu0 %v1636_v34 }
 0x5a8   :  { %v4699_v37 = vpop.eup %4214  ;;  %4000 = vmatprep.mubr.msk.f32.mxu1 %vm352_vm2, %v4695_v35  ;;  %4031 = vmatprep.subr.msk.mxu0 %vm175_vm1, %v4697_v36 }
 0x5a9   :  { %4001 = vmatmul.mubr.msk.f32.vlgmr.msra.gmra.mxu1 %vm352_vm2, %v4699_v37  ;;  %v1723_v38 = vpop.permute.xlu0 %1722 }
 0x5aa   :  { %4011 = vmatpush3.xpose.msk.msra.mxu1 %vm175_vm1, %v1515_v30  ;;  %4014 = vmatprep.mubr.msk.f32.mxu1 %vm175_vm1, %v1509_v33 }
 0x5ab   :  { %4012 = vmatprep.subr.msk.mxu1 %vm175_vm1, %v1513_v15 }
 0x5ae   :  { %4013 = vmatpush3.xpose.msk.msra.mxu1 %vm175_vm1, %v1513_v15 }
 0x5af   :  { %4024 = vmatprep.subr.mxu1 %v1725_v32 }
 0x5b1   :  { %4015 = vmatmul.mubr.msk.f32.vlgmr.msra.gmra.mxu1 %vm175_vm1, %v1511_v21 }
 0x5b2   :  { %4025 = vmatpush3.msra.mxu1 %v1725_v32 }
 0x5b3   :  { %4026 = vmatprep.subr.mxu1 %v1723_v38 }
 0x5b4   :  { %4027 = vmatpush3.msra.mxu1 %v1723_v38 }
 0x654   :  { %v4712_v39 = vpop.f32.mrf.mxu0 }
 0x656   :  { %v4714_v40 = vpop.f32.mrf.mxu0 }
 0x65e   :  { %v4009_v42 = vpop.f32.mrf.mxu0 }
 0x65f   :  { %v1602_v44 = vsel %vm352_vm2, %v4009_v42, -inf }
 0x660   :  { %1603 = vmax.xlane.f32.xlu1 %v1602_v44  ;;  %v1499_v47 = vpop.f32.mrf.mxu0 }
 0x661   :  { %v1599_v48 = vsel %vm352_vm2, %v1499_v47, -inf }
 0x662   :  { %1600 = vmax.xlane.f32.xlu0 %v1599_v48 }
 0x669   :  { %v4718_v49 = vpop.f32.mrf.mxu1 }
 0x66b   :  { %v4720_v50 = vpop.f32.mrf.mxu1 }
 0x671   :  { %v4016_v55 = vpop.f32.mrf.mxu1  ;;  %1838 = vrot.lane.b32.xlu1 %v4494_v10, %s4423_s15 }
 0x672   :  { %v1608_v56 = vsel %vm352_vm2, %v4016_v55, -inf }
 0x673   :  { %1609 = vmax.xlane.f32.xlu0 %v1608_v56  ;;  %v1590_v58 = vpop.f32.mrf.mxu1 }
 0x674   :  { %v1605_v60 = vsel %vm352_vm2, %v1590_v58, -inf }
 0x675   :  { %1933 = vrot.lane.b32.xlu1 %v4502_v12, %s4422_s14 }
 0x677   :  { %1606 = vmax.xlane.f32.xlu0 %v1605_v60 }
 0x679   :  { %1931 = vrot.lane.b32.xlu1 %v4532_v19, %s4423_s15 }
 0x67d   :  { %2058 = vrot.lane.b32.xlu1 %v4488_v8, %s4424_s16 }
 0x681   :  { %2145 = vrot.lane.b32.xlu1 %v4496_v11, %s4424_s16 }
 0x685   :  { %2265 = vrot.lane.b32.xlu1 %v4488_v8, %s4425_s17 }
 0x689   :  { %2263 = vrot.lane.b32.xlu1 %v4491_v9, %s4425_s17 }
 0x68d   :  { %1935 = vrot.lane.b32.xlu0 %v4496_v11, %s4422_s14 }
 0x691   :  { %1840 = vrot.lane.b32.xlu0 %v4525_v17, %s4423_s15 }
 0x695   :  { %1929 = vrot.lane.b32.xlu0 %v4505_v13, %s4423_s15 }
 0x699   :  { %2056 = vrot.lane.b32.xlu0 %v4491_v9, %s4424_s16 }
 0x69d   :  { %2143 = vrot.lane.b32.xlu0 %v4502_v12, %s4424_s16 }
 0x6e9   :  { %v1604_v62 = vpop.xlane.xlu1 %1603 }
 0x6ea   :  { %v1612_v63 = vsub.f32 %v4009_v42, %v1604_v62 }
 0x6eb   :  { %v1601_v0 = vpop.xlane.xlu0 %1600 }
 0x6ec   :  { %v1611_v5 = vsub.f32 %v1499_v47, %v1601_v0  ;;  %v1617_v6 = vmul.f32 1.442695, %v1612_v63 }
 0x6ed   :  { %v1839_v14 = vpop.permute.xlu1 %1838 }
 0x6ee   :  { %v1615_v7 = vmul.f32 1.442695, %v1611_v5 }
 0x6f0   :  { %4216 = vpow2.f32 %v1615_v7 }
 0x6f1   :  { %4218 = vpow2.f32 %v1617_v6  ;;  %v1934_v15 = vpop.permute.xlu1 %1933 }
 0x6f5   :  { %v1932_v23 = vpop.permute.xlu1 %1931 }
 0x6f9   :  { %v2059_v31 = vpop.permute.xlu1 %2058 }
 0x6fc   :  { %v1610_v16 = vpop.xlane.xlu0 %1609 }
 0x6fd   :  { %v4740_v21 = vpop.eup %4216  ;;  %v1614_v24 = vsub.f32 %v4016_v55, %v1610_v16  ;;  %v2146_v34 = vpop.permute.xlu1 %2145 }
 0x6fe   :  { %v4742_v22 = vpop.eup %4218  ;;  %4021 = vmatprep.mubr.msk.f32.mxu0 %vm352_vm2, %v4740_v21 }
 0x6ff   :  { %4022 = vmatmul.mubr.msk.f32.vlgmr.msra.gmra.mxu0 %vm352_vm2, %v4742_v22  ;;  %v1621_v29 = vmul.f32 1.442695, %v1614_v24 }
 0x700   :  { %4032 = vmatpush3.xpose.msk.msra.mxu0 %vm175_vm1, %v4697_v36  ;;  %v1607_v25 = vpop.xlane.xlu0 %1606  ;;  %4035 = vmatprep.mubr.msk.f32.mxu0 %vm175_vm1, %v1839_v14 }
 0x701   :  { %v1613_v26 = vsub.f32 %v1590_v58, %v1607_v25  ;;  %4033 = vmatprep.subr.msk.mxu0 %vm175_vm1, %v1843_v61  ;;  %v4757_v44 = vpop.permute.xlu1 %2265 }
 0x703   :  { %v1619_v30 = vmul.f32 1.442695, %v1613_v26 }
 0x704   :  { %4034 = vmatpush3.xpose.msk.msra.mxu0 %vm175_vm1, %v1843_v61  ;;  %v1936_v32 = vpop.permute.xlu0 %1935 }
 0x705   :  { %4220 = vpow2.f32 %v1619_v30  ;;  %4038 = vmatprep.subr.msk.mxu1 %vm175_vm1, %v1936_v32  ;;  %4045 = vmatprep.subr.mxu0 %v2059_v31 }
 0x706   :  { %4222 = vpow2.f32 %v1621_v29 }
 0x708   :  { %v1841_v33 = vpop.permute.xlu0 %1840 }
 0x709   :  { %4036 = vmatmul.mubr.msk.f32.vlgmr.msra.gmra.mxu0 %vm175_vm1, %v1841_v33 }
 0x70a   :  { %4046 = vmatpush3.msra.mxu0 %v2059_v31 }
 0x70c   :  { %v1930_v36 = vpop.permute.xlu0 %1929 }
 0x710   :  { %v2057_v38 = vpop.permute.xlu0 %2056 }
 0x711   :  { %4047 = vmatprep.subr.mxu0 %v2057_v38 }
 0x712   :  { %v4755_v42 = vpop.eup %4220  ;;  %4048 = vmatpush3.msra.mxu0 %v2057_v38 }
 0x713   :  { %v4759_v47 = vpop.eup %4222  ;;  %4028 = vmatprep.mubr.msk.f32.mxu1 %vm352_vm2, %v4755_v42  ;;  %4059 = vmatprep.subr.msk.mxu0 %vm175_vm1, %v4757_v44 }
 0x714   :  { %4029 = vmatmul.mubr.msk.f32.vlgmr.msra.gmra.mxu1 %vm352_vm2, %v4759_v47  ;;  %v2144_v48 = vpop.permute.xlu0 %2143 }
 0x715   :  { %4039 = vmatpush3.xpose.msk.msra.mxu1 %vm175_vm1, %v1936_v32  ;;  %4042 = vmatprep.mubr.msk.f32.mxu1 %vm175_vm1, %v1930_v36 }
 0x716   :  { %4040 = vmatprep.subr.msk.mxu1 %vm175_vm1, %v1934_v15 }
 0x719   :  { %4041 = vmatpush3.xpose.msk.msra.mxu1 %vm175_vm1, %v1934_v15  ;;  %v2264_v15 = vpop.permute.xlu1 %2263 }
 0x71a   :  { %4052 = vmatprep.subr.mxu1 %v2146_v34 }
 0x71c   :  { %4043 = vmatmul.mubr.msk.f32.vlgmr.msra.gmra.mxu1 %vm175_vm1, %v1932_v23 }
 0x71d   :  { %4053 = vmatpush3.msra.mxu1 %v2146_v34 }
 0x71e   :  { %4054 = vmatprep.subr.mxu1 %v2144_v48 }
 0x71f   :  { %4055 = vmatpush3.msra.mxu1 %v2144_v48 }
 0x7bf   :  { %v4772_v55 = vpop.f32.mrf.mxu0 }
 0x7c1   :  { %v4774_v56 = vpop.f32.mrf.mxu0 }
 0x7c9   :  { %v4037_v58 = vpop.f32.mrf.mxu0 }
 0x7ca   :  { %v2023_v60 = vsel %vm352_vm2, %v4037_v58, -inf }
 0x7cb   :  { %2024 = vmax.xlane.f32.xlu1 %v2023_v60  ;;  %v1920_v61 = vpop.f32.mrf.mxu0 }
 0x7cc   :  { %v2020_v62 = vsel %vm352_vm2, %v1920_v61, -inf }
 0x7cd   :  { %2021 = vmax.xlane.f32.xlu0 %v2020_v62 }
 0x7d4   :  { %v4778_v63 = vpop.f32.mrf.mxu1 }
 0x7d6   :  { %v4780_v0 = vpop.f32.mrf.mxu1 }
 0x7dc   :  { %v4044_v5 = vpop.f32.mrf.mxu1  ;;  %2259 = vrot.lane.b32.xlu1 %v4494_v10, %s4426_s18 }
 0x7dd   :  { %v2029_v6 = vsel %vm352_vm2, %v4044_v5, -inf }
 0x7de   :  { %2030 = vmax.xlane.f32.xlu0 %v2029_v6  ;;  %v2011_v7 = vpop.f32.mrf.mxu1 }
 0x7df   :  { %v2026_v14 = vsel %vm352_vm2, %v2011_v7, -inf }
 0x7e0   :  { %2354 = vrot.lane.b32.xlu1 %v4502_v12, %s4425_s17 }
 0x7e2   :  { %2027 = vmax.xlane.f32.xlu0 %v2026_v14 }
 0x7e4   :  { %2352 = vrot.lane.b32.xlu1 %v4532_v19, %s4426_s18 }
 0x7e8   :  { %2479 = vrot.lane.b32.xlu1 %v4488_v8, %s4427_s19 }
 0x7ec   :  { %2566 = vrot.lane.b32.xlu1 %v4496_v11, %s4427_s19 }
 0x7f0   :  { %2686 = vrot.lane.b32.xlu1 %v4488_v8, %s4428_s22 }
 0x7f4   :  { %2684 = vrot.lane.b32.xlu1 %v4491_v9, %s4428_s22 }
 0x7f8   :  { %2356 = vrot.lane.b32.xlu0 %v4496_v11, %s4425_s17 }
 0x7fc   :  { %2261 = vrot.lane.b32.xlu0 %v4525_v17, %s4426_s18 }
 0x800   :  { %2350 = vrot.lane.b32.xlu0 %v4505_v13, %s4426_s18 }
 0x804   :  { %2477 = vrot.lane.b32.xlu0 %v4491_v9, %s4427_s19 }
 0x808   :  { %2564 = vrot.lane.b32.xlu0 %v4502_v12, %s4427_s19 }
 0x854   :  { %v2025_v16 = vpop.xlane.xlu1 %2024 }
 0x855   :  { %v2033_v23 = vsub.f32 %v4037_v58, %v2025_v16 }
 0x856   :  { %v2022_v24 = vpop.xlane.xlu0 %2021 }
 0x857   :  { %v2032_v25 = vsub.f32 %v1920_v61, %v2022_v24  ;;  %v2038_v26 = vmul.f32 1.442695, %v2033_v23 }
 0x858   :  { %v2260_v30 = vpop.permute.xlu1 %2259 }
 0x859   :  { %v2036_v29 = vmul.f32 1.442695, %v2032_v25 }
 0x85b   :  { %4224 = vpow2.f32 %v2036_v29 }
 0x85c   :  { %4226 = vpow2.f32 %v2038_v26  ;;  %v2355_v31 = vpop.permute.xlu1 %2354 }
 0x860   :  { %v2353_v36 = vpop.permute.xlu1 %2352 }
 0x864   :  { %v2480_v62 = vpop.permute.xlu1 %2479 }
 0x867   :  { %v2031_v32 = vpop.xlane.xlu0 %2030 }
 0x868   :  { %v4800_v33 = vpop.eup %4224  ;;  %v2035_v38 = vsub.f32 %v4044_v5, %v2031_v32 }
 0x869   :  { %v4802_v34 = vpop.eup %4226  ;;  %4049 = vmatprep.mubr.msk.f32.mxu0 %vm352_vm2, %v4800_v33 }
 0x86a   :  { %4050 = vmatmul.mubr.msk.f32.vlgmr.msra.gmra.mxu0 %vm352_vm2, %v4802_v34  ;;  %v2042_v60 = vmul.f32 1.442695, %v2035_v38 }
 0x86b   :  { %4060 = vmatpush3.xpose.msk.msra.mxu0 %vm175_vm1, %v4757_v44  ;;  %v2028_v48 = vpop.xlane.xlu0 %2027  ;;  %4063 = vmatprep.mubr.msk.f32.mxu0 %vm175_vm1, %v2260_v30  ;;  %v2567_v44 = vpop.permute.xlu1 %2566 }
 0x86c   :  { %v2034_v58 = vsub.f32 %v2011_v7, %v2028_v48  ;;  %4061 = vmatprep.subr.msk.mxu0 %vm175_vm1, %v2264_v15 }
 0x86e   :  { %v2040_v61 = vmul.f32 1.442695, %v2034_v58 }
 0x86f   :  { %4062 = vmatpush3.xpose.msk.msra.mxu0 %vm175_vm1, %v2264_v15  ;;  %v2357_v5 = vpop.permute.xlu0 %2356  ;;  %v4817_v23 = vpop.permute.xlu1 %2686 }
 0x870   :  { %4228 = vpow2.f32 %v2040_v61  ;;  %4066 = vmatprep.subr.msk.mxu1 %vm175_vm1, %v2357_v5  ;;  %4073 = vmatprep.subr.mxu0 %v2480_v62 }
 0x871   :  { %4230 = vpow2.f32 %v2042_v60 }
 0x873   :  { %v2262_v6 = vpop.permute.xlu0 %2261 }
 0x874   :  { %4064 = vmatmul.mubr.msk.f32.vlgmr.msra.gmra.mxu0 %vm175_vm1, %v2262_v6 }
 0x875   :  { %4074 = vmatpush3.msra.mxu0 %v2480_v62  ;;  %v2685_v62 = vpop.permute.xlu1 %2684 }
 0x877   :  { %v2351_v14 = vpop.permute.xlu0 %2350 }
 0x87b   :  { %v2478_v7 = vpop.permute.xlu0 %2477 }
 0x87c   :  { %4075 = vmatprep.subr.mxu0 %v2478_v7 }
 0x87d   :  { %v4815_v16 = vpop.eup %4228  ;;  %4076 = vmatpush3.msra.mxu0 %v2478_v7 }
 0x87e   :  { %v4819_v15 = vpop.eup %4230  ;;  %4056 = vmatprep.mubr.msk.f32.mxu1 %vm352_vm2, %v4815_v16  ;;  %4087 = vmatprep.subr.msk.mxu0 %vm175_vm1, %v4817_v23 }
 0x87f   :  { %4057 = vmatmul.mubr.msk.f32.vlgmr.msra.gmra.mxu1 %vm352_vm2, %v4819_v15  ;;  %v2565_v24 = vpop.permute.xlu0 %2564 }
 0x880   :  { %4067 = vmatpush3.xpose.msk.msra.mxu1 %vm175_vm1, %v2357_v5  ;;  %4070 = vmatprep.mubr.msk.f32.mxu1 %vm175_vm1, %v2351_v14 }
 0x881   :  { %4068 = vmatprep.subr.msk.mxu1 %vm175_vm1, %v2355_v31 }
 0x884   :  { %4069 = vmatpush3.xpose.msk.msra.mxu1 %vm175_vm1, %v2355_v31 }
 0x885   :  { %4080 = vmatprep.subr.mxu1 %v2567_v44 }
 0x887   :  { %4071 = vmatmul.mubr.msk.f32.vlgmr.msra.gmra.mxu1 %vm175_vm1, %v2353_v36 }
 0x888   :  { %4081 = vmatpush3.msra.mxu1 %v2567_v44 }
 0x889   :  { %4082 = vmatprep.subr.mxu1 %v2565_v24 }
 0x88a   :  { %4083 = vmatpush3.msra.mxu1 %v2565_v24 }
 0x92a   :  { %v4832_v25 = vpop.f32.mrf.mxu0 }
 0x92c   :  { %v4834_v26 = vpop.f32.mrf.mxu0 }
 0x934   :  { %v4065_v29 = vpop.f32.mrf.mxu0 }
 0x935   :  { %v2444_v30 = vsel %vm352_vm2, %v4065_v29, -inf }
 0x936   :  { %2445 = vmax.xlane.f32.xlu1 %v2444_v30  ;;  %v2341_v32 = vpop.f32.mrf.mxu0 }
 0x937   :  { %v2441_v38 = vsel %vm352_vm2, %v2341_v32, -inf }
 0x938   :  { %2442 = vmax.xlane.f32.xlu0 %v2441_v38 }
 0x93f   :  { %v4838_v31 = vpop.f32.mrf.mxu1 }
 0x940   :  { %5160 = vst [vmem:[#allocation16_spill] sm:$0xff] %v4838_v31 }
 0x941   :  { %v4840_v48 = vpop.f32.mrf.mxu1 }
 0x942   :  { %5161 = vst [vmem:[#allocation17_spill] sm:$0xff] %v4840_v48 }
 0x947   :  { %v4072_v36 = vpop.f32.mrf.mxu1  ;;  %2680 = vrot.lane.b32.xlu1 %v4494_v10, %s4429_s23 }
 0x948   :  { %v2450_v58 = vsel %vm352_vm2, %v4072_v36, -inf }
 0x949   :  { %2451 = vmax.xlane.f32.xlu0 %v2450_v58  ;;  %v2432_v60 = vpop.f32.mrf.mxu1 }
 0x94a   :  { %v2447_v61 = vsel %vm352_vm2, %v2432_v60, -inf }
 0x94b   :  { %2775 = vrot.lane.b32.xlu1 %v4502_v12, %s4428_s22 }
 0x94d   :  { %2448 = vmax.xlane.f32.xlu0 %v2447_v61 }
 0x94f   :  { %2773 = vrot.lane.b32.xlu1 %v4532_v19, %s4429_s23 }
 0x953   :  { %2900 = vrot.lane.b32.xlu1 %v4488_v8, %s4430_s24 }
 0x957   :  { %2987 = vrot.lane.b32.xlu1 %v4496_v11, %s4430_s24 }
 0x95b   :  { %3107 = vrot.lane.b32.xlu1 %v4488_v8, %s4431_s25 }
 0x95f   :  { %3105 = vrot.lane.b32.xlu1 %v4491_v9, %s4431_s25 }
 0x963   :  { %2777 = vrot.lane.b32.xlu0 %v4496_v11, %s4428_s22 }
 0x967   :  { %2682 = vrot.lane.b32.xlu0 %v4525_v17, %s4429_s23 }
 0x96b   :  { %2771 = vrot.lane.b32.xlu0 %v4505_v13, %s4429_s23 }
 0x96f   :  { %2898 = vrot.lane.b32.xlu0 %v4491_v9, %s4430_s24 }
 0x973   :  { %2985 = vrot.lane.b32.xlu0 %v4502_v12, %s4430_s24 }
 0x9bf   :  { %v2446_v5 = vpop.xlane.xlu1 %2445 }
 0x9c0   :  { %v2454_v6 = vsub.f32 %v4065_v29, %v2446_v5 }
 0x9c1   :  { %v2443_v44 = vpop.xlane.xlu0 %2442 }
 0x9c2   :  { %v2453_v14 = vsub.f32 %v2341_v32, %v2443_v44  ;;  %v2459_v7 = vmul.f32 1.442695, %v2454_v6 }
 0x9c3   :  { %v2681_v30 = vpop.permute.xlu1 %2680 }
 0x9c4   :  { %v2457_v24 = vmul.f32 1.442695, %v2453_v14 }
 0x9c6   :  { %4232 = vpow2.f32 %v2457_v24 }
 0x9c7   :  { %4234 = vpow2.f32 %v2459_v7  ;;  %v2776_v38 = vpop.permute.xlu1 %2775 }
 0x9cb   :  { %v2774_v48 = vpop.permute.xlu1 %2773 }
 0x9cf   :  { %v2901_v44 = vpop.permute.xlu1 %2900 }
 0x9d2   :  { %v2452_v58 = vpop.xlane.xlu0 %2451 }
 0x9d3   :  { %v4860_v61 = vpop.eup %4232  ;;  %v2456_v3 = vsub.f32 %v4072_v36, %v2452_v58 }
 0x9d4   :  { %v4862_v31 = vpop.eup %4234  ;;  %4077 = vmatprep.mubr.msk.f32.mxu0 %vm352_vm2, %v4860_v61 }
 0x9d5   :  { %4078 = vmatmul.mubr.msk.f32.vlgmr.msra.gmra.mxu0 %vm352_vm2, %v4862_v31  ;;  %v2463_v5 = vmul.f32 1.442695, %v2456_v3 }
 0x9d6   :  { %4088 = vmatpush3.xpose.msk.msra.mxu0 %vm175_vm1, %v4817_v23  ;;  %v2449_v29 = vpop.xlane.xlu0 %2448  ;;  %4091 = vmatprep.mubr.msk.f32.mxu0 %vm175_vm1, %v2681_v30  ;;  %v2988_v23 = vpop.permute.xlu1 %2987 }
 0x9d7   :  { %v2455_v32 = vsub.f32 %v2432_v60, %v2449_v29  ;;  %4089 = vmatprep.subr.msk.mxu0 %vm175_vm1, %v2685_v62 }
 0x9d9   :  { %v2461_v6 = vmul.f32 1.442695, %v2455_v32 }
 0x9da   :  { %4090 = vmatpush3.xpose.msk.msra.mxu0 %vm175_vm1, %v2685_v62  ;;  %v2778_v36 = vpop.permute.xlu0 %2777  ;;  %v3108_v3 = vpop.permute.xlu1 %3107 }
 0x9db   :  { %4236 = vpow2.f32 %v2461_v6  ;;  %4094 = vmatprep.subr.msk.mxu1 %vm175_vm1, %v2778_v36  ;;  %4101 = vmatprep.subr.mxu0 %v2901_v44 }
 0x9dc   :  { %4238 = vpow2.f32 %v2463_v5 }
 0x9de   :  { %v2683_v14 = vpop.permute.xlu0 %2682 }
 0x9df   :  { %4092 = vmatmul.mubr.msk.f32.vlgmr.msra.gmra.mxu0 %vm175_vm1, %v2683_v14 }
 0x9e0   :  { %4102 = vmatpush3.msra.mxu0 %v2901_v44 }
 0x9e2   :  { %v2772_v7 = vpop.permute.xlu0 %2771 }
 0x9e6   :  { %v2899_v60 = vpop.permute.xlu0 %2898 }
 0x9e7   :  { %4103 = vmatprep.subr.mxu0 %v2899_v60 }
 0x9e8   :  { %v4875_v24 = vpop.eup %4236  ;;  %4104 = vmatpush3.msra.mxu0 %v2899_v60 }
 0x9e9   :  { %v4877_v30 = vpop.eup %4238  ;;  %4084 = vmatprep.mubr.msk.f32.mxu1 %vm352_vm2, %v4875_v24  ;;  %4115 = vmatprep.subr.msk.mxu0 %vm175_vm1, %v3108_v3 }
 0x9ea   :  { %4085 = vmatmul.mubr.msk.f32.vlgmr.msra.gmra.mxu1 %vm352_vm2, %v4877_v30  ;;  %v2986_v62 = vpop.permute.xlu0 %2985 }
 0x9eb   :  { %4095 = vmatpush3.xpose.msk.msra.mxu1 %vm175_vm1, %v2778_v36  ;;  %4098 = vmatprep.mubr.msk.f32.mxu1 %vm175_vm1, %v2772_v7 }
 0x9ec   :  { %4096 = vmatprep.subr.msk.mxu1 %vm175_vm1, %v2776_v38 }
 0x9ef   :  { %4097 = vmatpush3.xpose.msk.msra.mxu1 %vm175_vm1, %v2776_v38 }
 0x9f0   :  { %4108 = vmatprep.subr.mxu1 %v2988_v23 }
 0x9f2   :  { %4099 = vmatmul.mubr.msk.f32.vlgmr.msra.gmra.mxu1 %vm175_vm1, %v2774_v48 }
 0x9f3   :  { %4109 = vmatpush3.msra.mxu1 %v2988_v23 }
 0x9f4   :  { %4110 = vmatprep.subr.mxu1 %v2986_v62 }
 0x9f5   :  { %4111 = vmatpush3.msra.mxu1 %v2986_v62 }
 0xa95   :  { %v4889_v58 = vpop.f32.mrf.mxu0 }
 0xa97   :  { %v4891_v29 = vpop.f32.mrf.mxu0 }
 0xa9f   :  { %v4093_v32 = vpop.f32.mrf.mxu0 }
 0xaa0   :  { %v2865_v5 = vsel %vm352_vm2, %v4093_v32, -inf }
 0xaa1   :  { %2866 = vmax.xlane.f32.xlu1 %v2865_v5  ;;  %v2762_v6 = vpop.f32.mrf.mxu0 }
 0xaa2   :  { %v2862_v44 = vsel %vm352_vm2, %v2762_v6, -inf }
 0xaa3   :  { %2863 = vmax.xlane.f32.xlu0 %v2862_v44 }
 0xaaa   :  { %v4895_v38 = vpop.f32.mrf.mxu1 }
 0xaab   :  { %5162 = vst [vmem:[#allocation18_spill] sm:$0xff] %v4895_v38 }
 0xaac   :  { %v4897_v36 = vpop.f32.mrf.mxu1 }
 0xaad   :  { %5163 = vst [vmem:[#allocation19_spill] sm:$0xff] %v4897_v36 }
 0xab2   :  { %v4100_v48 = vpop.f32.mrf.mxu1  ;;  %3101 = vrot.lane.b32.xlu1 %v4494_v10, %s4432_s26  ;;  %v3106_v10 = vpop.permute.xlu1 %3105 }
 0xab3   :  { %v2871_v14 = vsel %vm352_vm2, %v4100_v48, -inf }
 0xab4   :  { %2872 = vmax.xlane.f32.xlu0 %v2871_v14  ;;  %v2853_v23 = vpop.f32.mrf.mxu1 }
 0xab5   :  { %v2868_v7 = vsel %vm352_vm2, %v2853_v23, -inf }
 0xab6   :  { %3196 = vrot.lane.b32.xlu1 %v4502_v12, %s4431_s25 }
 0xab8   :  { %2869 = vmax.xlane.f32.xlu0 %v2868_v7 }
 0xaba   :  { %3194 = vrot.lane.b32.xlu1 %v4532_v19, %s4432_s26 }
 0xabe   :  { %3321 = vrot.lane.b32.xlu1 %v4488_v8, %s4433_s27 }
 0xace   :  { %3198 = vrot.lane.b32.xlu0 %v4496_v11, %s4431_s25 }
 0xad2   :  { %3103 = vrot.lane.b32.xlu0 %v4525_v17, %s4432_s26 }
 0xad6   :  { %3192 = vrot.lane.b32.xlu0 %v4505_v13, %s4432_s26 }
 0xb2a   :  { %v2867_v60 = vpop.xlane.xlu1 %2866 }
 0xb2b   :  { %v2875_v62 = vsub.f32 %v4093_v32, %v2867_v60 }
 0xb2c   :  { %v2864_v5 = vpop.xlane.xlu0 %2863 }
 0xb2d   :  { %v2874_v44 = vsub.f32 %v2762_v6, %v2864_v5  ;;  %v2880_v14 = vmul.f32 1.442695, %v2875_v62 }
 0xb2e   :  { %v3102_v19 = vpop.permute.xlu1 %3101 }
 0xb2f   :  { %v2878_v7 = vmul.f32 1.442695, %v2874_v44 }
 0xb31   :  { %4240 = vpow2.f32 %v2878_v7 }
 0xb32   :  { %4242 = vpow2.f32 %v2880_v14  ;;  %v3197_v38 = vpop.permute.xlu1 %3196 }
 0xb36   :  { %v3195_v4 = vpop.permute.xlu1 %3194 }
 0xb3a   :  { %v3322_v62 = vpop.permute.xlu1 %3321 }
 0xb3d   :  { %v2873_v36 = vpop.xlane.xlu0 %2872 }
 0xb3e   :  { %v4911_v8 = vpop.eup %4240  ;;  %v2877_v17 = vsub.f32 %v4100_v48, %v2873_v36 }
 0xb3f   :  { %v4913_v1 = vpop.eup %4242  ;;  %4105 = vmatprep.mubr.msk.f32.mxu0 %vm352_vm2, %v4911_v8 }
 0xb40   :  { %4106 = vmatmul.mubr.msk.f32.vlgmr.msra.gmra.mxu0 %vm352_vm2, %v4913_v1  ;;  %v2884_v6 = vmul.f32 1.442695, %v2877_v17 }
 0xb41   :  { %4116 = vmatpush3.xpose.msk.msra.mxu0 %vm175_vm1, %v3108_v3  ;;  %v2870_v13 = vpop.xlane.xlu0 %2869  ;;  %4119 = vmatprep.mubr.msk.f32.mxu0 %vm175_vm1, %v3102_v19 }
 0xb42   :  { %v2876_v32 = vsub.f32 %v2853_v23, %v2870_v13  ;;  %4117 = vmatprep.subr.msk.mxu0 %vm175_vm1, %v3106_v10 }
 0xb44   :  { %v2882_v60 = vmul.f32 1.442695, %v2876_v32 }
 0xb45   :  { %4118 = vmatpush3.xpose.msk.msra.mxu0 %vm175_vm1, %v3106_v10  ;;  %v3199_v36 = vpop.permute.xlu0 %3198 }
 0xb46   :  { %4244 = vpow2.f32 %v2882_v60  ;;  %4122 = vmatprep.subr.msk.mxu1 %vm175_vm1, %v3199_v36  ;;  %4129 = vmatprep.subr.mxu0 %v3322_v62 }
 0xb47   :  { %4246 = vpow2.f32 %v2884_v6 }
 0xb49   :  { %v3104_v48 = vpop.permute.xlu0 %3103 }
 0xb4a   :  { %4120 = vmatmul.mubr.msk.f32.vlgmr.msra.gmra.mxu0 %vm175_vm1, %v3104_v48  ;;  %v790_v48 = vsel %vm352_vm2, %v4639_v43, 0.0  ;;  %v1205_v43 = vsel %vm352_vm2, %v4682_v20, 0.0  ;;  %v2465_v20 = vsel %vm352_vm2, %v4860_v61, 0.0 }
 0xb4b   :  { %4130 = vmatpush3.msra.mxu0 %v3322_v62  ;;  %v784_v62 = vsel %vm352_vm2, %v4622_v28, 0.0  ;;  %v2468_v28 = vsel %vm352_vm2, %v4862_v31, 0.0 }
 0xb4d   :  { %v3193_v5 = vpop.permute.xlu0 %3192 }
 0xb53   :  { %v4925_v3 = vpop.eup %4244 }
 0xb54   :  { %v4927_v23 = vpop.eup %4246  ;;  %4112 = vmatprep.mubr.msk.f32.mxu1 %vm352_vm2, %v4925_v3 }
 0xb55   :  { %4113 = vmatmul.mubr.msk.f32.vlgmr.msra.gmra.mxu1 %vm352_vm2, %v4927_v23 }
 0xb56   :  { %4123 = vmatpush3.xpose.msk.msra.mxu1 %vm175_vm1, %v3199_v36  ;;  %4126 = vmatprep.mubr.msk.f32.mxu1 %vm175_vm1, %v3193_v5  ;;  %v2044_v36 = vsel %vm352_vm2, %v4800_v33, 0.0  ;;  %v1211_v33 = vsel %vm352_vm2, %v4699_v37, 0.0  ;;  %v787_v37 = vsel %vm352_vm2, %v4635_v41, 0.0 }
 0xb57   :  { %4124 = vmatprep.subr.msk.mxu1 %vm175_vm1, %v3197_v38 }
 0xb5a   :  { %4125 = vmatpush3.xpose.msk.msra.mxu1 %vm175_vm1, %v3197_v38 }
 0xb5d   :  { %4127 = vmatmul.mubr.msk.f32.vlgmr.msra.gmra.mxu1 %vm175_vm1, %v3195_v4 }
 0xc00   :  { %v4938_v10 = vpop.f32.mrf.mxu0 }
 0xc02   :  { %v4940_v44 = vpop.f32.mrf.mxu0 }
 0xc0a   :  { %v4121_v14 = vpop.f32.mrf.mxu0 }
 0xc0b   :  { %v3286_v7 = vsel %vm352_vm2, %v4121_v14, -inf }
 0xc0c   :  { %3287 = vmax.xlane.f32.xlu1 %v3286_v7  ;;  %v3183_v19 = vpop.f32.mrf.mxu0 }
 0xc0d   :  { %v3283_v17 = vsel %vm352_vm2, %v3183_v19, -inf }
 0xc0e   :  { %3284 = vmax.xlane.f32.xlu0 %v3283_v17 }
 0xc15   :  { %v4944_v13 = vpop.f32.mrf.mxu1 }
 0xc17   :  { %v4946_v32 = vpop.f32.mrf.mxu1 }
 0xc1d   :  { %v4948_v6 = vpop.f32.mrf.mxu1  ;;  %3408 = vrot.lane.b32.xlu1 %v4496_v11, %s4433_s27  ;;  %v1623_v11 = vsel %vm352_vm2, %v4740_v21, 0.0  ;;  %v1202_v21 = vsel %vm352_vm2, %v4680_v18, 0.0  ;;  %v1632_v18 = vsel %vm352_vm2, %v4759_v47, 0.0  ;;  %v1629_v47 = vsel %vm352_vm2, %v4755_v42, 0.0 }
 0xc1e   :  { %v3292_v4 = vsel %vm352_vm2, %v4948_v6, -inf }
 0xc1f   :  { %3293 = vmax.xlane.f32.xlu0 %v3292_v4  ;;  %v4954_v38 = vpop.f32.mrf.mxu1 }
 0xc20   :  { %v3289_v60 = vsel %vm352_vm2, %v4954_v38, -inf }
 0xc21   :  { %3406 = vrot.lane.b32.xlu1 %v4502_v12, %s4433_s27  ;;  %v2047_v12 = vsel %vm352_vm2, %v4802_v34, 0.0  ;;  %v1626_v34 = vsel %vm352_vm2, %v4742_v22, 0.0  ;;  %v2886_v22 = vsel %vm352_vm2, %v4911_v8, 0.0 }
 0xc23   :  { %3290 = vmax.xlane.f32.xlu0 %v3289_v60 }
 0xc39   :  { %3319 = vrot.lane.b32.xlu0 %v4491_v9, %s4433_s27  ;;  %v781_v9 = vsel %vm352_vm2, %v4620_v27, 0.0  ;;  %v2889_v27 = vsel %vm352_vm2, %v4913_v1, 0.0  ;;  %v1208_v1 = vsel %vm352_vm2, %v4695_v35, 0.0 }
 0xc45   :  { %785 = vadd.xlane.f32.xlu1 %v784_v62 }
 0xc49   :  { %1624 = vadd.xlane.f32.xlu1 %v1623_v11 }
 0xc4d   :  { %2045 = vadd.xlane.f32.xlu1 %v2044_v36 }
 0xc51   :  { %2048 = vadd.xlane.f32.xlu1 %v2047_v12  ;;  %v2471_v12 = vsel %vm352_vm2, %v4875_v24, 0.0  ;;  %v2053_v24 = vsel %vm352_vm2, %v4819_v15, 0.0 }
 0xc55   :  { %791 = vadd.xlane.f32.xlu1 %v790_v48 }
 0xc58   :  { %782 = vadd.xlane.f32.xlu0 %v781_v9  ;;  %v2050_v9 = vsel %vm352_vm2, %v4815_v16, 0.0  ;;  %v2474_v16 = vsel %vm352_vm2, %v4877_v30, 0.0 }
 0xc59   :  { %2469 = vadd.xlane.f32.xlu1 %v2468_v28 }
 0xc5c   :  { %1203 = vadd.xlane.f32.xlu0 %v1202_v21  ;;  %v2892_v21 = vsel %vm352_vm2, %v4925_v3, 0.0  ;;  %v383_v3 = vsel %vm352_vm2, %v4575_v57, 0.0  ;;  %v386_v57 = vsel %vm352_vm2, %v4579_v59, 0.0 }
 0xc5d   :  { %1212 = vadd.xlane.f32.xlu1 %v1211_v33  ;;  %v2895_v33 = vsel %vm352_vm2, %v4927_v23, 0.0 }
 0xc60   :  { %1206 = vadd.xlane.f32.xlu0 %v1205_v43 }
 0xc61   :  { %2890 = vadd.xlane.f32.xlu1 %v2889_v27 }
 0xc64   :  { %1627 = vadd.xlane.f32.xlu0 %v1626_v34 }
 0xc65   :  { %1633 = vadd.xlane.f32.xlu1 %v1632_v18 }
 0xc68   :  { %788 = vadd.xlane.f32.xlu0 %v787_v37 }
 0xc6c   :  { %2466 = vadd.xlane.f32.xlu0 %v2465_v20 }
 0xc70   :  { %1209 = vadd.xlane.f32.xlu0 %v1208_v1 }
 0xc74   :  { %2887 = vadd.xlane.f32.xlu0 %v2886_v22 }
 0xc78   :  { %1630 = vadd.xlane.f32.xlu0 %v1629_v47 }
 0xc95   :  { %v3288_v31 = vpop.xlane.xlu1 %3287 }
 0xc96   :  { %v3296_v5 = vsub.f32 %v4121_v14, %v3288_v31 }
 0xc97   :  { %v3285_v41 = vpop.xlane.xlu0 %3284 }
 0xc98   :  { %v3301_v7 = vmul.f32 1.442695, %v3296_v5  ;;  %v3295_v17 = vsub.f32 %v3183_v19, %v3285_v41 }
 0xc99   :  { %v3409_v4 = vpop.permute.xlu1 %3408 }
 0xc9a   :  { %4248 = vpow2.f32 %v3301_v7  ;;  %v3299_v61 = vmul.f32 1.442695, %v3295_v17  ;;  %4136 = vmatprep.subr.mxu1 %v3409_v4 }
 0xc9b   :  { %4137 = vmatpush3.msra.mxu1 %v3409_v4 }
 0xc9c   :  { %4250 = vpow2.f32 %v3299_v61 }
 0xc9d   :  { %v3407_v35 = vpop.permute.xlu1 %3406 }
 0xc9e   :  { %4138 = vmatprep.subr.mxu1 %v3407_v35 }
 0xc9f   :  { %4139 = vmatpush3.msra.mxu1 %v3407_v35 }
 0xca7   :  { %v4249_v8 = vpop.eup %4248 }
 0xca8   :  { %v3294_v60 = vpop.xlane.xlu0 %3293  ;;  %v3310_v62 = vsel %vm352_vm2, %v4249_v8, 0.0 }
 0xca9   :  { %v4251_v42 = vpop.eup %4250  ;;  %v3298_v11 = vsub.f32 %v4948_v6, %v3294_v60  ;;  %3311 = vadd.xlane.f32.xlu1 %v3310_v62 }
 0xcaa   :  { %4133 = vmatprep.mubr.msk.f32.mxu0 %vm352_vm2, %v4251_v42  ;;  %v3307_v14 = vsel %vm352_vm2, %v4251_v42, 0.0 }
 0xcab   :  { %v3305_v19 = vmul.f32 1.442695, %v3298_v11  ;;  %3308 = vadd.xlane.f32.xlu0 %v3307_v14 }
 0xcac   :  { %v3291_v36 = vpop.xlane.xlu0 %3290 }
 0xcad   :  { %v3297_v48 = vsub.f32 %v4954_v38, %v3291_v36  ;;  %2472 = vadd.xlane.f32.xlu1 %v2471_v12  ;;  %4252 = vpow2.f32 %v3305_v19  ;;  %v377_v38 = vsel %vm352_vm2, %v4565_v52, 0.0  ;;  %v380_v52 = vsel %vm352_vm2, %v4567_v53, 0.0 }
 0xcaf   :  { %v3303_v28 = vmul.f32 1.442695, %v3297_v48  ;;  %2051 = vadd.xlane.f32.xlu0 %v2050_v9 }
 0xcb0   :  { %v3320_v6 = vpop.permute.xlu0 %3319 }
 0xcb1   :  { %4254 = vpow2.f32 %v3303_v28  ;;  %4131 = vmatprep.subr.mxu0 %v3320_v6  ;;  %2893 = vadd.xlane.f32.xlu1 %v2892_v21 }
 0xcb2   :  { %4132 = vmatpush3.msra.mxu0 %v3320_v6 }
 0xcb3   :  { %4134 = vmatmul.mubr.msk.f32.vlgmr.msra.gmra.mxu0 %vm352_vm2, %v4249_v8  ;;  %2054 = vadd.xlane.f32.xlu0 %v2053_v24 }
 0xcb5   :  { %378 = vadd.xlane.f32.xlu1 %v377_v38 }
 0xcb7   :  { %2475 = vadd.xlane.f32.xlu0 %v2474_v16 }
 0xcb9   :  { %384 = vadd.xlane.f32.xlu1 %v383_v3 }
 0xcba   :  { %v4253_v43 = vpop.eup %4252 }
 0xcbb   :  { %2896 = vadd.xlane.f32.xlu0 %v2895_v33  ;;  %v3316_v27 = vsel %vm352_vm2, %v4253_v43, 0.0 }
 0xcbe   :  { %v5020_v15 = vpop.eup %4254 }
 0xcbf   :  { %4140 = vmatprep.mubr.msk.f32.mxu1 %vm352_vm2, %v5020_v15  ;;  %3317 = vadd.xlane.f32.xlu0 %v3316_v27 }
 0xcc0   :  { %4141 = vmatmul.mubr.msk.f32.vlgmr.msra.gmra.mxu1 %vm352_vm2, %v4253_v43 }
 0xcc3   :  { %381 = vadd.xlane.f32.xlu0 %v380_v52 }
 0xcc7   :  { %387 = vadd.xlane.f32.xlu0 %v386_v57 }
 0xcce   :  { %v786_v30 = vpop.xlane.xlu1 %785 }
 0xccf   :  { %4256 = vrcp.f32 %v786_v30 }
 0xcd2   :  { %v1625_v23 = vpop.xlane.xlu1 %1624 }
 0xcd3   :  { %4258 = vrcp.f32 %v1625_v23 }
 0xcd6   :  { %v2046_v34 = vpop.xlane.xlu1 %2045 }
 0xcd7   :  { %4260 = vrcp.f32 %v2046_v34 }
 0xcda   :  { %v2049_v18 = vpop.xlane.xlu1 %2048 }
 0xcdb   :  { %4262 = vrcp.f32 %v2049_v18 }
 0xcdc   :  { %v4257_v37 = vpop.eup %4256 }
 0xcdd   :  { %v972_v20 = vmul.f32 %v4257_v37, %v4652_v45 }
 0xcde   :  { %v792_v1 = vpop.xlane.xlu1 %791 }
 0xcdf   :  { %4264 = vrcp.f32 %v792_v1  ;;  %981 = vrot.lane.b32.xlu0 %v972_v20, %s4434_s28 }
 0xce0   :  { %v4259_v53 = vpop.eup %4258 }
 0xce1   :  { %v783_v22 = vpop.xlane.xlu0 %782  ;;  %v1813_v59 = vmul.f32 %v4259_v53, %v4774_v56 }
 0xce2   :  { %4266 = vrcp.f32 %v783_v22  ;;  %v2470_v47 = vpop.xlane.xlu1 %2469 }
 0xce3   :  { %4268 = vrcp.f32 %v2470_v47  ;;  %1821 = vrot.lane.b32.xlu0 %v1813_v59, %s4435_s29 }
 0xce4   :  { %v4261_v31 = vpop.eup %4260 }
 0xce5   :  { %v2234_v5 = vmul.f32 %v4261_v31, %v4834_v26  ;;  %v5164_v31 = vld [vmem:[#allocation15_spill] sm:$0xff] }
 0xce6   :  { %v1213_v41 = vpop.xlane.xlu1 %1212 }
 0xce7   :  { %4270 = vrcp.f32 %v1213_v41  ;;  %2242 = vrot.lane.b32.xlu0 %v2234_v5, %s4436_s1 }
 0xce8   :  { %v4263_v45 = vpop.eup %4262 }
 0xce9   :  { %v2235_v7 = vmul.f32 %v4263_v45, %v4832_v25 }
 0xcea   :  { %v2891_v17 = vpop.xlane.xlu1 %2890 }
 0xceb   :  { %4272 = vrcp.f32 %v2891_v17  ;;  %2244 = vrot.lane.b32.xlu0 %v2235_v7, %s4436_s1  ;;  %v5165_v7 = vld [vmem:[#allocation13_spill] sm:$0xff] }
 0xcec   :  { %v4265_v56 = vpop.eup %4264 }
 0xced   :  { %v974_v4 = vmul.f32 %v4265_v56, %v4658_v51 }
 0xcee   :  { %v1634_v61 = vpop.xlane.xlu1 %1633 }
 0xcef   :  { %v4267_v35 = vpop.eup %4266  ;;  %4274 = vrcp.f32 %v1634_v61  ;;  %985 = vrot.lane.b32.xlu0 %v974_v4, %s4434_s28  ;;  %v5166_v4 = vld [vmem:[#allocation14_spill] sm:$0xff] }
 0xcf0   :  { %v4269_v26 = vpop.eup %4268  ;;  %v971_v8 = vmul.f32 %v4267_v35, %v4654_v46 }
 0xcf1   :  { %v2656_v60 = vmul.f32 %v4269_v26, %v4889_v58  ;;  %v1204_v58 = vpop.xlane.xlu0 %1203 }
 0xcf2   :  { %979 = vrot.lane.b32.xlu1 %v971_v8, %s4434_s28  ;;  %4276 = vrcp.f32 %v1204_v58 }
 0xcf3   :  { %2665 = vrot.lane.b32.xlu0 %v2656_v60, %s4437_s30 }
 0xcf4   :  { %v4271_v25 = vpop.eup %4270 }
 0xcf5   :  { %v1395_v62 = vmul.f32 %v4271_v25, %v4718_v49  ;;  %v1207_v14 = vpop.xlane.xlu0 %1206  ;;  %v3313_v49 = vsel %vm352_vm2, %v5020_v15, 0.0  ;;  %v3529_v25 = vld [vmem:[#allocation8 + $0x18] sm:$0xff] }
 0xcf6   :  { %4278 = vrcp.f32 %v1207_v14  ;;  %4143 = vmatprep.subr.mxu0 %v3529_v25 }
 0xcf7   :  { %1406 = vrot.lane.b32.xlu0 %v1395_v62, %s4409_s21  ;;  %4144 = vmatpush3.msra.mxu0 %v3529_v25 }
 0xcf8   :  { %v4273_v51 = vpop.eup %4272 }
 0xcf9   :  { %v3077_v42 = vmul.f32 %v4273_v51, %v4938_v10  ;;  %v1628_v19 = vpop.xlane.xlu0 %1627  ;;  %v3528_v51 = vld [vmem:[#allocation8 + $0x10] sm:$0xff] }
 0xcfa   :  { %4280 = vrcp.f32 %v1628_v19  ;;  %4145 = vmatprep.subr.mxu0 %v3528_v51 }
 0xcfb   :  { %3086 = vrot.lane.b32.xlu0 %v3077_v42, %s4438_s0  ;;  %4146 = vmatpush3.msra.mxu0 %v3528_v51  ;;  %v3527_v42 = vld [vmem:[#allocation8 + $0x8] sm:$0xff] }
 0xcfc   :  { %v4275_v11 = vpop.eup %4274  ;;  %4147 = vmatprep.subr.mxu0 %v3527_v42 }
 0xcfd   :  { %v1816_v46 = vmul.f32 %v4275_v11, %v4778_v63  ;;  %v789_v36 = vpop.xlane.xlu0 %788  ;;  %4148 = vmatpush3.msra.mxu0 %v3527_v42 }
 0xcfe   :  { %4282 = vrcp.f32 %v789_v36 }
 0xcff   :  { %1827 = vrot.lane.b32.xlu0 %v1816_v46, %s4435_s29  ;;  %v4277_v10 = vpop.eup %4276  ;;  %v3526_v46 = vld [vmem:[#allocation8] sm:$0xff] }
 0xd00   :  { %v1392_v63 = vmul.f32 %v4277_v10, %v4714_v40  ;;  %4149 = vmatprep.subr.mxu0 %v3526_v46 }
 0xd01   :  { %v2467_v12 = vpop.xlane.xlu0 %2466  ;;  %4150 = vmatpush3.msra.mxu0 %v3526_v46 }
 0xd02   :  { %4284 = vrcp.f32 %v2467_v12 }
 0xd03   :  { %v4279_v9 = vpop.eup %4278 }
 0xd04   :  { %v1393_v6 = vmul.f32 %v4279_v9, %v4712_v39  ;;  %v5167_v9 = vld [vmem:[#allocation19_spill] sm:$0xff] }
 0xd05   :  { %v1210_v48 = vpop.xlane.xlu0 %1209 }
 0xd06   :  { %4286 = vrcp.f32 %v1210_v48 }
 0xd07   :  { %v4281_v21 = vpop.eup %4280 }
 0xd08   :  { %v1814_v24 = vmul.f32 %v4281_v21, %v4772_v55  ;;  %v5168_v21 = vld [vmem:[#allocation17_spill] sm:$0xff] }
 0xd09   :  { %v2888_v28 = vpop.xlane.xlu0 %2887 }
 0xd0a   :  { %4288 = vrcp.f32 %v2888_v28 }
 0xd0b   :  { %v4283_v38 = vpop.eup %4282 }
 0xd0c   :  { %v973_v40 = vmul.f32 %v4283_v38, %v4660_v54 }
 0xd0d   :  { %v1631_v16 = vpop.xlane.xlu0 %1630 }
 0xd0e   :  { %4290 = vrcp.f32 %v1631_v16 }
 0xd0f   :  { %v4285_v3 = vpop.eup %4284 }
 0xd10   :  { %v2655_v39 = vmul.f32 %v4285_v3, %v4891_v29 }
 0xd13   :  { %v4287_v15 = vpop.eup %4286 }
 0xd14   :  { %v1394_v55 = vmul.f32 %v4287_v15, %v4720_v50 }
 0xd16   :  { %3314 = vadd.xlane.f32.xlu1 %v3313_v49 }
 0xd17   :  { %v4289_v57 = vpop.eup %4288 }
 0xd18   :  { %v3076_v54 = vmul.f32 %v4289_v57, %v4940_v44 }
 0xd1b   :  { %v4291_v34 = vpop.eup %4290 }
 0xd1c   :  { %v1815_v37 = vmul.f32 %v4291_v34, %v4780_v0 }
 0xd27   :  { %1400 = vrot.lane.b32.xlu1 %v1392_v63, %s4409_s21 }
 0xd2b   :  { %1402 = vrot.lane.b32.xlu1 %v1393_v6, %s4409_s21 }
 0xd2f   :  { %1823 = vrot.lane.b32.xlu1 %v1814_v24, %s4435_s29 }
 0xd32   :  { %v3312_v33 = vpop.xlane.xlu1 %3311 }
 0xd33   :  { %983 = vrot.lane.b32.xlu1 %v973_v40, %s4434_s28  ;;  %v5169_v40 = vld [vmem:[#allocation16_spill] sm:$0xff] }
 0xd34   :  { %v3309_v43 = vpop.xlane.xlu0 %3308 }
 0xd36   :  { %v2473_v27 = vpop.xlane.xlu1 %2472 }
 0xd37   :  { %2663 = vrot.lane.b32.xlu1 %v2655_v39, %s4437_s30 }
 0xd38   :  { %v2052_v52 = vpop.xlane.xlu0 %2051 }
 0xd3a   :  { %v2894_v30 = vpop.xlane.xlu1 %2893 }
 0xd3b   :  { %1404 = vrot.lane.b32.xlu1 %v1394_v55, %s4409_s21 }
 0xd3c   :  { %v2055_v23 = vpop.xlane.xlu0 %2054 }
 0xd3e   :  { %v379_v18 = vpop.xlane.xlu1 %378 }
 0xd3f   :  { %4292 = vrcp.f32 %v379_v18  ;;  %3084 = vrot.lane.b32.xlu1 %v3076_v54, %s4438_s0 }
 0xd40   :  { %v2476_v29 = vpop.xlane.xlu0 %2475 }
 0xd42   :  { %v385_v20 = vpop.xlane.xlu1 %384 }
 0xd43   :  { %4294 = vrcp.f32 %v385_v20  ;;  %1825 = vrot.lane.b32.xlu1 %v1815_v37, %s4435_s29 }
 0xd44   :  { %v2897_v50 = vpop.xlane.xlu0 %2896 }
 0xd48   :  { %v5068_v1 = vpop.xlane.xlu0 %3317 }
 0xd4c   :  { %v4293_v53 = vpop.eup %4292  ;;  %v382_v22 = vpop.xlane.xlu0 %381 }
 0xd4d   :  { %4296 = vrcp.f32 %v382_v22  ;;  %v567_v44 = vmul.f32 %v4293_v53, %v4596_v2 }
 0xd4f   :  { %571 = vst.msk [vmem:[#allocation2] sm:$0xff] %vm175_vm1, %v567_v44 }
 0xd50   :  { %v4295_v59 = vpop.eup %4294  ;;  %v388_v47 = vpop.xlane.xlu0 %387 }
 0xd51   :  { %4298 = vrcp.f32 %v388_v47  ;;  %v569_v5 = vmul.f32 %v4295_v59, %v5164_v31 }
 0xd52   :  { %4300 = vrcp.f32 %v3312_v33 }
 0xd53   :  { %573 = vst.msk [vmem:[#allocation2 + $0x10] sm:$0xff] %vm175_vm1, %v569_v5  ;;  %4302 = vrcp.f32 %v3309_v43  ;;  %v5170_v43 = vld [vmem:[#allocation18_spill] sm:$0xff] }
 0xd54   :  { %v982_v0 = vpop.permute.xlu0 %981  ;;  %4304 = vrcp.f32 %v2473_v27 }
 0xd55   :  { %4306 = vrcp.f32 %v2052_v52 }
 0xd56   :  { %4308 = vrcp.f32 %v2894_v30 }
 0xd57   :  { %4310 = vrcp.f32 %v2055_v23 }
 0xd58   :  { %v5074_v41 = vpop.permute.xlu0 %1821  ;;  %4312 = vrcp.f32 %v2476_v29 }
 0xd59   :  { %4314 = vrcp.f32 %v2897_v50 }
 0xd5a   :  { %v4297_v45 = vpop.eup %4296  ;;  %4316 = vrcp.f32 %v5068_v1 }
 0xd5b   :  { %v568_v17 = vmul.f32 %v4297_v45, %v5165_v7 }
 0xd5c   :  { %v5077_v56 = vpop.permute.xlu0 %2242 }
 0xd5d   :  { %572 = vst.msk [vmem:[#allocation2 + $0x8] sm:$0xff] %vm175_vm1, %v568_v17 }
 0xd5e   :  { %v4299_v2 = vpop.eup %4298  ;;  %993 = vst.msk [vmem:[#allocation2 + $0x8] sm:$0xff] %vm991_vm3, %v982_v0 }
 0xd5f   :  { %v570_v61 = vmul.f32 %v4299_v2, %v5166_v4  ;;  %v4301_v58 = vpop.eup %4300  ;;  %v3756_v4 = vld [vmem:[%s5155_s3] ss:$0 sm:$0xff]  ;;  %s4380_s3 = scalar_lea.vmem %s3644_s8, 512 }
 0xd60   :  { %v5082_v35 = vpop.permute.xlu0 %2244  ;;  %v4303_v19 = vpop.eup %4302  ;;  %p4381_p1 = scmp.ne.s32.totalorder %s3644_s8, %s4380_s3  ;;  %p4386_p3 = scmp.lt.s32.totalorder %s4380_s3, %s4380_s3 }
 0xd61   :  { %574 = vst.msk [vmem:[#allocation2 + $0x18] sm:$0xff] %vm175_vm1, %v570_v61  ;;  %v4305_v12 = vpop.eup %4304 }
 0xd62   :  { %v4307_v63 = vpop.eup %4306  ;;  %v2657_v28 = vmul.f32 %v4305_v12, %v5167_v9  ;;  %p4387_p4 = por %p4386_p3, %p4385_p2 }
 0xd63   :  { %v4309_v6 = vpop.eup %4308  ;;  %v2236_v24 = vmul.f32 %v4307_v63, %v5168_v21 }
 0xd64   :  { %v980_v26 = vpop.permute.xlu1 %979  ;;  %v986_v8 = vpop.permute.xlu0 %985  ;;  %v3078_v16 = vmul.f32 %v4309_v6, %v4946_v32  ;;  %p4388_p5 = pnand %p4387_p4, %p4381_p1 }
 0xd65   :  { %992 = vst.msk [vmem:[#allocation2] sm:$0xff] %vm991_vm3, %v980_v26  ;;  %995 = vst.msk [vmem:[#allocation2 + $0x18] sm:$0xff] %vm991_vm3, %v986_v8  ;;  %v4311_v38 = vpop.eup %4310 }
 0xd66   :  { %v2237_v3 = vmul.f32 %v4311_v38, %v5169_v40  ;;  %v4313_v33 = vpop.eup %4312 }
 0xd67   :  { %v2658_v39 = vmul.f32 %v4313_v33, %v5170_v43  ;;  %v4315_v15 = vpop.eup %4314 }
 0xd68   :  { %v5087_v60 = vpop.permute.xlu0 %2665  ;;  %v3079_v27 = vmul.f32 %v4315_v15, %v4944_v13  ;;  %v4317_v55 = vpop.eup %4316 }
 0xd6c   :  { %v1407_v62 = vpop.permute.xlu0 %1406 }
 0xd6d   :  { %1416 = vst.msk [vmem:[#allocation2 + $0x18] sm:$0xff] %vm1412_vm4, %v1407_v62 }
 0xd70   :  { %v3087_v11 = vpop.permute.xlu0 %3086 }
 0xd73   :  { %v4135_v14 = vpop.f32.mrf.mxu0 }
 0xd74   :  { %v3498_v49 = vmul.f32 %v4301_v58, %v4135_v14  ;;  %v1828_v36 = vpop.permute.xlu0 %1827 }
 0xd75   :  { %v3397_v10 = vpop.f32.mrf.mxu0  ;;  %1837 = vst.msk [vmem:[#allocation2 + $0x18] sm:$0xff] %vm1833_vm5, %v1828_v36 }
 0xd76   :  { %v3497_v48 = vmul.f32 %v4303_v19, %v3397_v10  ;;  %3507 = vrot.lane.b32.xlu0 %v3498_v49, %s4439_s2 }
 0xd78   :  { %3505 = vrot.lane.b32.xlu1 %v3497_v48, %s4439_s2 }
 0xd7a   :  { %2667 = vrot.lane.b32.xlu0 %v2657_v28, %s4437_s30 }
 0xd7c   :  { %2246 = vrot.lane.b32.xlu1 %v2236_v24, %s4436_s1 }
 0xd7e   :  { %3088 = vrot.lane.b32.xlu0 %v3078_v16, %s4438_s0 }
 0xd80   :  { %2248 = vrot.lane.b32.xlu1 %v2237_v3, %s4436_s1  ;;  %v4142_v52 = vpop.f32.mrf.mxu1 }
 0xd81   :  { %v3500_v57 = vmul.f32 %v4317_v55, %v4142_v52 }
 0xd82   :  { %v3484_v34 = vpop.f32.mrf.mxu1 }
 0xd84   :  { %2669 = vrot.lane.b32.xlu1 %v2658_v39, %s4437_s30 }
 0xd88   :  { %3090 = vrot.lane.b32.xlu1 %v3079_v27, %s4438_s0 }
 0xd8c   :  { %3511 = vrot.lane.b32.xlu1 %v3500_v57, %s4439_s2 }
 0xd9f   :  { %v3315_v32 = vpop.xlane.xlu1 %3314 }
 0xda0   :  { %4318 = vrcp.f32 %v3315_v32 }
 0xda3   :  { %v1401_v30 = vpop.permute.xlu1 %1400 }
 0xda4   :  { %1413 = vst.msk [vmem:[#allocation2] sm:$0xff] %vm1412_vm4, %v1401_v30 }
 0xda5   :  { %1834 = vst.msk [vmem:[#allocation2] sm:$0xff] %vm1833_vm5, %v5074_v41 }
 0xda6   :  { %2255 = vst.msk [vmem:[#allocation2] sm:$0xff] %vm2254_vm6, %v5077_v56 }
 0xda7   :  { %v1403_v13 = vpop.permute.xlu1 %1402 }
 0xda8   :  { %1414 = vst.msk [vmem:[#allocation2 + $0x8] sm:$0xff] %vm1412_vm4, %v1403_v13 }
 0xdab   :  { %v1824_v23 = vpop.permute.xlu1 %1823 }
 0xdac   :  { %1835 = vst.msk [vmem:[#allocation2 + $0x8] sm:$0xff] %vm1833_vm5, %v1824_v23 }
 0xdad   :  { %v4319_v54 = vpop.eup %4318  ;;  %2256 = vst.msk [vmem:[#allocation2 + $0x8] sm:$0xff] %vm2254_vm6, %v5082_v35 }
 0xdae   :  { %v3499_v18 = vmul.f32 %v4319_v54, %v3484_v34  ;;  %2677 = vst.msk [vmem:[#allocation2 + $0x8] sm:$0xff] %vm2675_vm7, %v5087_v60 }
 0xdaf   :  { %v984_v29 = vpop.permute.xlu1 %983  ;;  %3098 = vst.msk [vmem:[#allocation2 + $0x8] sm:$0xff] %vm3096_vm8, %v3087_v11 }
 0xdb0   :  { %994 = vst.msk [vmem:[#allocation2 + $0x10] sm:$0xff] %vm991_vm3, %v984_v29  ;;  %3509 = vrot.lane.b32.xlu0 %v3499_v18, %s4439_s2 }
 0xdb3   :  { %v2664_v37 = vpop.permute.xlu1 %2663 }
 0xdb4   :  { %2676 = vst.msk [vmem:[#allocation2] sm:$0xff] %vm2675_vm7, %v2664_v37 }
 0xdb7   :  { %v1405_v20 = vpop.permute.xlu1 %1404 }
 0xdb8   :  { %1415 = vst.msk [vmem:[#allocation2 + $0x10] sm:$0xff] %vm1412_vm4, %v1405_v20 }
 0xdbb   :  { %v3085_v50 = vpop.permute.xlu1 %3084 }
 0xdbc   :  { %3097 = vst.msk [vmem:[#allocation2] sm:$0xff] %vm3096_vm8, %v3085_v50 }
 0xdbf   :  { %v1826_v1 = vpop.permute.xlu1 %1825 }
 0xdc0   :  { %1836 = vst.msk [vmem:[#allocation2 + $0x10] sm:$0xff] %vm1833_vm5, %v1826_v1 }
 0xde8   :  { %v3508_v53 = vpop.permute.xlu0 %3507 }
 0xde9   :  { %3519 = vst.msk [vmem:[#allocation2 + $0x8] sm:$0xff] %vm3517_vm9, %v3508_v53 }
 0xdea   :  { %v3506_v22 = vpop.permute.xlu1 %3505 }
 0xdeb   :  { %3518 = vst.msk [vmem:[#allocation2] sm:$0xff] %vm3517_vm9, %v3506_v22 }
 0xdec   :  { %v2668_v44 = vpop.permute.xlu0 %2667 }
 0xdee   :  { %v2247_v59 = vpop.permute.xlu1 %2246 }
 0xdef   :  { %2257 = vst.msk [vmem:[#allocation2 + $0x10] sm:$0xff] %vm2254_vm6, %v2247_v59 }
 0xdf0   :  { %2678 = vst.msk [vmem:[#allocation2 + $0x10] sm:$0xff] %vm2675_vm7, %v2668_v44  ;;  %v3089_v47 = vpop.permute.xlu0 %3088  ;;  %v3523_v0 = vld [vmem:[#allocation2 + $0x8] sm:$0xff] }
 0xdf1   :  { %3099 = vst.msk [vmem:[#allocation2 + $0x10] sm:$0xff] %vm3096_vm8, %v3089_v47 }
 0xdf2   :  { %v2249_v31 = vpop.permute.xlu1 %2248  ;;  %v3522_v5 = vld [vmem:[#allocation2] sm:$0xff] }
 0xdf3   :  { %2258 = vst.msk [vmem:[#allocation2 + $0x18] sm:$0xff] %vm2254_vm6, %v2249_v31  ;;  %4151 = vmatprep.mubr.msk.f32.mxu0 %vm67_vm0, %v3522_v5 }
 0xdf4   :  { %4152 = vmatmul.mubr.msk.f32.vlgmr.msra.gmra.mxu0 %vm67_vm0, %v3523_v0 }
 0xdf6   :  { %v2670_v41 = vpop.permute.xlu1 %2669 }
 0xdf7   :  { %2679 = vst.msk [vmem:[#allocation2 + $0x18] sm:$0xff] %vm2675_vm7, %v2670_v41 }
 0xdfa   :  { %v3091_v45 = vpop.permute.xlu1 %3090 }
 0xdfb   :  { %3100 = vst.msk [vmem:[#allocation2 + $0x18] sm:$0xff] %vm3096_vm8, %v3091_v45 }
 0xdfe   :  { %v3512_v7 = vpop.permute.xlu1 %3511 }
 0xdff   :  { %3521 = vst.msk [vmem:[#allocation2 + $0x18] sm:$0xff] %vm3517_vm9, %v3512_v7 }
 0xe06   :  { %v3525_v2 = vld [vmem:[#allocation2 + $0x18] sm:$0xff] }
 0xe22   :  { %v3510_v17 = vpop.permute.xlu0 %3509 }
 0xe23   :  { %3520 = vst.msk [vmem:[#allocation2 + $0x10] sm:$0xff] %vm3517_vm9, %v3510_v17 }
 0xe2a   :  { %v3524_v56 = vld [vmem:[#allocation2 + $0x10] sm:$0xff] }
 0xe2b   :  { %4154 = vmatprep.mubr.msk.f32.mxu0 %vm67_vm0, %v3524_v56 }
 0xe2c   :  { %4155 = vmatmul.mubr.msk.f32.gmra.mxu0 %vm67_vm0, %v3525_v2 }
 0xeb4   :  { %v4153_v61 = vpop.f32.mrf.mxu0 }
 0xeb5   :  { %v3621_v35 = vadd.f32 %v4153_v61, %v3756_v4 }
 0xeb6   :  { %v3615_v26 = vpop.f32.mrf.mxu0 }
 0xeb7   :  { %3635 = vst.msk [vmem:[#allocation9 + $0x8] sm:$0xff] %vm67_vm0, %v3621_v35  ;;  %v3616_v8 = vadd.f32 %v3756_v4, %v3615_v26 }
 0xeb9   :  { %3634 = vst.msk [vmem:[#allocation9] sm:$0xff] %vm67_vm0, %v3616_v8 }
 0xeec   :  { %v4156_v60 = vpop.f32.mrf.mxu0 }
 0xeed   :  { %v3631_v25 = vadd.f32 %v4156_v60, %v3756_v4 }
 0xeee   :  { %v3625_v62 = vpop.f32.mrf.mxu0 }
 0xeef   :  { %3637 = vst.msk [vmem:[#allocation9 + $0x18] sm:$0xff] %vm67_vm0, %v3631_v25  ;;  %v3626_v51 = vadd.f32 %v3756_v4, %v3625_v62 }
 0xef1   :  { %3636 = vst.msk [vmem:[#allocation9 + $0x10] sm:$0xff] %vm67_vm0, %v3626_v51 }
 0xef2   :  { %4391 = shalt.err (!%p4388_p5)
}
 0xef3   :  { %3649 = dma.vmem_to_hbm [thread:$0]  %s3644_s8, 512, %s5156_s4, [#allocation5], %s4408_s20, %s4408_s20, %s4409_s21  }
 0xef4   :  { %4404 = dma.done.wait [#allocation5], 512  }
 0xef5   :  { %4405 = vsyncadd [#allocation5], 4294966784 }
 0xef6   :  { %3653 = vsyncpa [#allocation4], 1 }
 0xef7   :  { %3654 = vsyncpa [#allocation7], 1 }
 0xef8   :  { %3655 = vsyncpa [#allocation5], 1 }

// kernel: tpu_custom_call.1
= control target key start
LH: loop header
LB: loop body
LE: loop exit
PB: predicated region body
PF: predicated region fallthrough
CT: control target
= control target key end

     0   :  { %9 = vsyncpa [#allocation4], 0  ;;  %s5152_s0 = inlined_call_operand.hbm [shape: f32[32,32], index: 0, kind: input, shape index: {}]   ;;  %s5153_s1 = inlined_call_operand.hbm [shape: f32[32,96], index: 1, kind: input, shape index: {}]   ;;  %s5154_s2 = inlined_call_operand.hbm [shape: f32[32,32], index: 2, kind: input, shape index: {}]   ;;  %s5155_s3 = inlined_call_operand.vmem [shape: f32[1,32], index: 3, kind: input, shape index: {}]   ;;  %s5156_s4 = inlined_call_operand.hbm [shape: f32[32,32], index: 4, kind: output, shape index: {}]  }
   0x1   :  { %10 = vsyncpa [#allocation7], 0 }
   0x2   :  { %11 = vsyncpa [#allocation5], 0  ;;  %s4406_s15 = smov [#allocation6]   ;;  %s4407_s17 = smov [#allocation3]  }
   0x3   :  { %s29_s16 = sshll.u32 %s4406_s15, 4  ;;  %s17_s18 = sshll.u32 %s4407_s17, 4  ;;  %s30_s16 = int_to_ptr.vmem [resolvable:$true] %s29_s16  ;;  %s18_s18 = int_to_ptr.vmem [resolvable:$true] %s17_s18 }
   0x4   :  { %s4328_s19 = scalar_lea.vmem %s30_s16, 512  ;;  %p4333_p1 = scmp.lt.s32.totalorder %s30_s16, %s30_s16 }
   0x5   :  { %p4329_p0 = scmp.ne.s32.totalorder %s30_s16, %s4328_s19  ;;  %p4334_p2 = scmp.lt.s32.totalorder %s4328_s19, %s4328_s19 }
   0x7   :  { %p4335_p3 = por %p4334_p2, %p4333_p1 }
   0x9   :  { %p4336_p4 = pnand %p4335_p3, %p4329_p0 }
   0xb   :  { %4339 = shalt.err (!%p4336_p4)
}
   0xc   :  { %s4408_s20 = smov 128   ;;  %s4409_s21 = smov 8  }
   0xd   :  { %35 = dma.hbm_to_vmem [thread:$0]  %s5153_s1, 512, %s30_s16, [#allocation7], %s4408_s20, %s4408_s20, %s4409_s21  }
   0xe   :  { %s4348_s24 = scalar_lea.vmem %s18_s18, 512  ;;  %p4353_p6 = scmp.lt.s32.totalorder %s18_s18, %s18_s18 }
   0xf   :  { %p4349_p5 = scmp.ne.s32.totalorder %s18_s18, %s4348_s24  ;;  %p4354_p7 = scmp.lt.s32.totalorder %s4348_s24, %s4348_s24 }
  0x11   :  { %p4355_p8 = por %p4354_p7, %p4353_p6 }
  0x13   :  { %p4356_p9 = pnand %p4355_p8, %p4349_p5 }
  0x15   :  { %4359 = shalt.err (!%p4356_p9)
}
  0x16   :  { %23 = dma.hbm_to_vmem [thread:$0]  %s5152_s0, 512, %s18_s18, [#allocation4], %s4408_s20, %s4408_s20, %s4409_s21  }
  0x17   :  { %s4410_s27 = smov [#allocation8]  }
  0x18   :  { %s41_s28 = sshll.u32 %s4410_s27, 4  ;;  %s42_s28 = int_to_ptr.vmem [resolvable:$true] %s41_s28 }
  0x19   :  { %s4368_s29 = scalar_lea.vmem %s42_s28, 512  ;;  %p4373_p11 = scmp.lt.s32.totalorder %s42_s28, %s42_s28 }
  0x1a   :  { %p4369_p10 = scmp.ne.s32.totalorder %s42_s28, %s4368_s29  ;;  %p4374_p12 = scmp.lt.s32.totalorder %s4368_s29, %s4368_s29 }
  0x1c   :  { %p4375_p13 = por %p4374_p12, %p4373_p11 }
  0x1e   :  { %p4376_p0 = pnand %p4375_p13, %p4369_p10 }
  0x20   :  { %4379 = shalt.err (!%p4376_p0)
}
  0x21   :  { %47 = dma.hbm_to_vmem [thread:$0]  %s5154_s2, 512, %s42_s28, [#allocation7], %s4408_s20, %s4408_s20, %s4409_s21  }
  0x22   :  { %4400 = dma.done.wait [#allocation4], 512  }
  0x23   :  { %4401 = vsyncadd [#allocation4], 4294966784 }
  0x24   :  { %4402 = dma.done.wait [#allocation7], 1024  }
  0x25   :  { %4403 = vsyncadd [#allocation7], 4294966272  ;;  %vm67_vm0 = vcmask 261120   ;;  %v66_v0 = vld [vmem:[#allocation6 + $0x18] sm:$0xff]  ;;  %v65_v1 = vld [vmem:[#allocation6 + $0x10] sm:$0xff]  ;;  %s4411_s0 = smov 96  }
  0x26   :  { %3905 = vmatprep.subr.mxu1 %v66_v0  ;;  %v59_v2 = vld [vmem:[#allocation3] sm:$0xff]  ;;  %v64_v3 = vld [vmem:[#allocation6 + $0x8] sm:$0xff]  ;;  %v61_v6 = vld [vmem:[#allocation3 + $0x10] sm:$0xff]  ;;  %vm175_vm1 = vcmask 31744   ;;  %s4412_s2 = smov 64   ;;  %s4413_s5 = smov 92  }
  0x27   :  { %3906 = vmatpush3.msra.mxu1 %v66_v0  ;;  %3913 = vmatprep.mubr.msk.f32.mxu1 %vm67_vm0, %v59_v2  ;;  %v63_v4 = vld [vmem:[#allocation6] sm:$0xff]  ;;  %v60_v5 = vld [vmem:[#allocation3 + $0x8] sm:$0xff]  ;;  %v62_v7 = vld [vmem:[#allocation3 + $0x18] sm:$0xff]  ;;  %vm352_vm2 = vcmask 130048   ;;  %s4414_s6 = smov 124   ;;  %s4415_s7 = smov 60  }
  0x28   :  { %3907 = vmatprep.subr.mxu1 %v65_v1  ;;  %s4416_s8 = smov 88   ;;  %s4417_s9 = smov 120   ;;  %vm991_vm3 = vcmask 64544   ;;  %vm1412_vm4 = vcmask 97344   ;;  %vm1833_vm5 = vcmask 130144   ;;  %vm2254_vm6 = vcmask 162944  }
  0x29   :  { %3908 = vmatpush3.msra.mxu1 %v65_v1  ;;  %s4418_s10 = smov 56   ;;  %s4419_s11 = smov 84   ;;  %vm2675_vm7 = vcmask 195744   ;;  %vm3096_vm8 = vcmask 228544   ;;  %vm3517_vm9 = vcmask 261344  }
  0x2a   :  { %3909 = vmatprep.subr.mxu1 %v64_v3  ;;  %s4420_s12 = smov 116   ;;  %s4421_s13 = smov 52  }
  0x2b   :  { %3910 = vmatpush3.msra.mxu1 %v64_v3  ;;  %s4422_s14 = smov 80   ;;  %s4423_s15 = smov 112  }
  0x2c   :  { %3911 = vmatprep.subr.mxu1 %v63_v4  ;;  %s4424_s16 = smov 48   ;;  %s4425_s17 = smov 76  }
  0x2d   :  { %3912 = vmatpush3.msra.mxu1 %v63_v4  ;;  %s4426_s18 = smov 108   ;;  %s4427_s19 = smov 44  }
  0x2e   :  { %3914 = vmatmul.mubr.msk.f32.vlgmr.msra.gmra.mxu1 %vm67_vm0, %v60_v5  ;;  %s4428_s22 = smov 72   ;;  %s4429_s23 = smov 104  }
  0x2f   :  { %3916 = vmatprep.mubr.msk.f32.mxu1 %vm67_vm0, %v61_v6  ;;  %s4430_s24 = smov 40   ;;  %s4431_s25 = smov 68  }
  0x30   :  { %s4432_s26 = smov 100   ;;  %s4433_s27 = smov 36  }
  0x31   :  { %s4434_s28 = smov 4   ;;  %s4435_s29 = smov 12  }
  0x32   :  { %3917 = vmatmul.mubr.msk.f32.gmra.mxu1 %vm67_vm0, %v62_v7  ;;  %s4436_s1 = smov 16   ;;  %s4437_s30 = smov 20  }
  0xee   :  { %v4488_v8 = vpop.f32.mrf.mxu1 }
  0xef   :  { %173 = vrot.lane.b32.xlu0 %v4488_v8, %s4411_s0  ;;  %v4525_v17 = vmul.f32 0.5, %v4488_v8 }
  0xf0   :  { %v4491_v9 = vpop.f32.mrf.mxu1 }
  0xf1   :  { %v4494_v10 = vmul.f32 0.5, %v4491_v9 }
  0xf2   :  { %v4496_v11 = vpop.f32.mrf.mxu1 }
  0xf3   :  { %171 = vrot.lane.b32.xlu0 %v4491_v9, %s4411_s0  ;;  %3923 = vmatprep.mubr.msk.f32.mxu1 %vm175_vm1, %v4494_v10  ;;  %v4532_v19 = vmul.f32 0.5, %v4496_v11 }
  0xf4   :  { %265 = vrot.lane.b32.xlu1 %v4496_v11, %s4411_s0  ;;  %v4502_v12 = vpop.f32.mrf.mxu1 }
  0xf5   :  { %v4505_v13 = vmul.f32 0.5, %v4502_v12 }
  0xf7   :  { %389 = vrot.lane.b32.xlu0 %v4491_v9, %s4412_s2  ;;  %3930 = vmatprep.mubr.msk.f32.mxu0 %vm175_vm1, %v4505_v13 }
  0xf8   :  { %263 = vrot.lane.b32.xlu1 %v4502_v12, %s4411_s0  ;;  %s4438_s0 = smov 24  }
  0xfb   :  { %476 = vrot.lane.b32.xlu0 %v4502_v12, %s4412_s2 }
  0xfc   :  { %391 = vrot.lane.b32.xlu1 %v4488_v8, %s4412_s2 }
 0x100   :  { %478 = vrot.lane.b32.xlu1 %v4496_v11, %s4412_s2  ;;  %s4439_s2 = smov 28  }
 0x104   :  { %581 = vrot.lane.b32.xlu1 %v4488_v8, %s4413_s5 }
 0x108   :  { %579 = vrot.lane.b32.xlu1 %v4491_v9, %s4413_s5 }
 0x161   :  { %v174_v14 = vpop.permute.xlu0 %173 }
 0x162   :  { %3919 = vmatprep.subr.msk.mxu1 %vm175_vm1, %v174_v14 }
 0x163   :  { %3920 = vmatpush3.xpose.msk.msra.mxu1 %vm175_vm1, %v174_v14 }
 0x165   :  { %v172_v15 = vpop.permute.xlu0 %171 }
 0x166   :  { %v266_v16 = vpop.permute.xlu1 %265  ;;  %3921 = vmatprep.subr.msk.mxu1 %vm175_vm1, %v172_v15 }
 0x167   :  { %3926 = vmatprep.subr.msk.mxu0 %vm175_vm1, %v266_v16  ;;  %3922 = vmatpush3.xpose.msk.msra.mxu1 %vm175_vm1, %v172_v15 }
 0x168   :  { %3927 = vmatpush3.xpose.msk.msra.mxu0 %vm175_vm1, %v266_v16 }
 0x169   :  { %v390_v21 = vpop.permute.xlu0 %389 }
 0x16a   :  { %v264_v18 = vpop.permute.xlu1 %263  ;;  %3924 = vmatmul.mubr.msk.f32.vlgmr.msra.gmra.mxu1 %vm175_vm1, %v4525_v17 }
 0x16b   :  { %3928 = vmatprep.subr.msk.mxu0 %vm175_vm1, %v264_v18 }
 0x16c   :  { %3929 = vmatpush3.xpose.msk.msra.mxu0 %vm175_vm1, %v264_v18 }
 0x16d   :  { %v477_v33 = vpop.permute.xlu0 %476 }
 0x16e   :  { %v392_v20 = vpop.permute.xlu1 %391 }
 0x16f   :  { %3931 = vmatmul.mubr.msk.f32.vlgmr.msra.gmra.mxu0 %vm175_vm1, %v4532_v19  ;;  %3933 = vmatprep.subr.mxu1 %v392_v20 }
 0x170   :  { %3934 = vmatpush3.msra.mxu1 %v392_v20 }
 0x171   :  { %3935 = vmatprep.subr.mxu1 %v390_v21 }
 0x172   :  { %3936 = vmatpush3.msra.mxu1 %v390_v21  ;;  %v4536_v22 = vpop.permute.xlu1 %478 }
 0x173   :  { %3940 = vmatprep.subr.mxu1 %v4536_v22 }
 0x176   :  { %v582_v23 = vpop.permute.xlu1 %581 }
 0x177   :  { %3947 = vmatprep.subr.msk.mxu0 %vm175_vm1, %v582_v23 }
 0x178   :  { %3948 = vmatpush3.xpose.msk.msra.mxu0 %vm175_vm1, %v582_v23 }
 0x17a   :  { %v580_v24 = vpop.permute.xlu1 %579 }
 0x17b   :  { %3949 = vmatprep.subr.msk.mxu0 %vm175_vm1, %v580_v24 }
 0x17c   :  { %3950 = vmatpush3.xpose.msk.msra.mxu0 %vm175_vm1, %v580_v24 }
 0x22a   :  { %v3925_v25 = vpop.f32.mrf.mxu1 }
 0x22b   :  { %v356_v26 = vsel %vm352_vm2, %v3925_v25, -inf }
 0x22c   :  { %357 = vmax.xlane.f32.xlu1 %v356_v26  ;;  %v252_v27 = vpop.f32.mrf.mxu1 }
 0x22d   :  { %v353_v28 = vsel %vm352_vm2, %v252_v27, -inf }
 0x22e   :  { %354 = vmax.xlane.f32.xlu0 %v353_v28 }
 0x22f   :  { %v3932_v29 = vpop.f32.mrf.mxu0 }
 0x230   :  { %v362_v30 = vsel %vm352_vm2, %v3932_v29, -inf }
 0x231   :  { %v343_v31 = vpop.f32.mrf.mxu0 }
 0x232   :  { %363 = vmax.xlane.f32.xlu0 %v362_v30  ;;  %v359_v32 = vsel %vm352_vm2, %v343_v31, -inf }
 0x236   :  { %360 = vmax.xlane.f32.xlu0 %v359_v32 }
 0x23d   :  { %575 = vrot.lane.b32.xlu1 %v4494_v10, %s4414_s6 }
 0x241   :  { %670 = vrot.lane.b32.xlu1 %v4502_v12, %s4413_s5 }
 0x245   :  { %668 = vrot.lane.b32.xlu1 %v4532_v19, %s4414_s6 }
 0x249   :  { %795 = vrot.lane.b32.xlu1 %v4488_v8, %s4415_s7 }
 0x24c   :  { %672 = vrot.lane.b32.xlu0 %v4496_v11, %s4413_s5 }
 0x24d   :  { %882 = vrot.lane.b32.xlu1 %v4496_v11, %s4415_s7 }
 0x250   :  { %577 = vrot.lane.b32.xlu0 %v4525_v17, %s4414_s6 }
 0x251   :  { %1002 = vrot.lane.b32.xlu1 %v4488_v8, %s4416_s8 }
 0x254   :  { %666 = vrot.lane.b32.xlu0 %v4505_v13, %s4414_s6 }
 0x255   :  { %1000 = vrot.lane.b32.xlu1 %v4491_v9, %s4416_s8 }
 0x258   :  { %793 = vrot.lane.b32.xlu0 %v4491_v9, %s4415_s7 }
 0x25c   :  { %880 = vrot.lane.b32.xlu0 %v4502_v12, %s4415_s7  ;;  %s4440_s7 = smov [#allocation9]  }
 0x2b5   :  { %v358_v34 = vpop.xlane.xlu1 %357 }
 0x2b6   :  { %v366_v35 = vsub.f32 %v3925_v25, %v358_v34 }
 0x2b7   :  { %v355_v36 = vpop.xlane.xlu0 %354 }
 0x2b8   :  { %v365_v37 = vsub.f32 %v252_v27, %v355_v36  ;;  %v371_v38 = vmul.f32 1.442695, %v366_v35 }
 0x2b9   :  { %v576_v39 = vpop.permute.xlu1 %575 }
 0x2ba   :  { %v369_v40 = vmul.f32 1.442695, %v365_v37  ;;  %3951 = vmatprep.mubr.msk.f32.mxu0 %vm175_vm1, %v576_v39 }
 0x2bb   :  { %v364_v41 = vpop.xlane.xlu0 %363 }
 0x2bc   :  { %4192 = vpow2.f32 %v369_v40  ;;  %v368_v42 = vsub.f32 %v3932_v29, %v364_v41 }
 0x2bd   :  { %4194 = vpow2.f32 %v371_v38  ;;  %v671_v43 = vpop.permute.xlu1 %670 }
 0x2be   :  { %v375_v46 = vmul.f32 1.442695, %v368_v42 }
 0x2bf   :  { %v361_v44 = vpop.xlane.xlu0 %360 }
 0x2c0   :  { %v367_v45 = vsub.f32 %v343_v31, %v361_v44 }
 0x2c1   :  { %v669_v47 = vpop.permute.xlu1 %668 }
 0x2c2   :  { %v373_v48 = vmul.f32 1.442695, %v367_v45 }
 0x2c3   :  { %v673_v49 = vpop.permute.xlu0 %672 }
 0x2c4   :  { %4196 = vpow2.f32 %v373_v48 }
 0x2c5   :  { %4198 = vpow2.f32 %v375_v46  ;;  %v796_v50 = vpop.permute.xlu1 %795 }
 0x2c6   :  { %3961 = vmatprep.subr.mxu0 %v796_v50 }
 0x2c7   :  { %v578_v51 = vpop.permute.xlu0 %577 }
 0x2c8   :  { %3952 = vmatmul.mubr.msk.f32.vlgmr.msra.gmra.mxu0 %vm175_vm1, %v578_v51 }
 0x2c9   :  { %v4565_v52 = vpop.eup %4192  ;;  %3962 = vmatpush3.msra.mxu0 %v796_v50  ;;  %v883_v54 = vpop.permute.xlu1 %882 }
 0x2ca   :  { %v4567_v53 = vpop.eup %4194  ;;  %3937 = vmatprep.mubr.msk.f32.mxu1 %vm352_vm2, %v4565_v52 }
 0x2cb   :  { %3938 = vmatmul.mubr.msk.f32.vlgmr.msra.gmra.mxu1 %vm352_vm2, %v4567_v53  ;;  %v667_v55 = vpop.permute.xlu0 %666 }
 0x2cc   :  { %3941 = vmatpush3.msra.mxu1 %v4536_v22 }
 0x2cd   :  { %3942 = vmatprep.subr.mxu1 %v477_v33  ;;  %v4577_v58 = vpop.permute.xlu1 %1002 }
 0x2ce   :  { %3943 = vmatpush3.msra.mxu1 %v477_v33 }
 0x2cf   :  { %3954 = vmatprep.subr.msk.mxu1 %vm175_vm1, %v673_v49  ;;  %v794_v56 = vpop.permute.xlu0 %793 }
 0x2d0   :  { %3963 = vmatprep.subr.mxu0 %v794_v56 }
 0x2d1   :  { %v4575_v57 = vpop.eup %4196  ;;  %3964 = vmatpush3.msra.mxu0 %v794_v56  ;;  %v1001_v15 = vpop.permute.xlu1 %1000 }
 0x2d2   :  { %v4579_v59 = vpop.eup %4198  ;;  %3944 = vmatprep.mubr.msk.f32.mxu1 %vm352_vm2, %v4575_v57  ;;  %3975 = vmatprep.subr.msk.mxu0 %vm175_vm1, %v4577_v58 }
 0x2d3   :  { %3945 = vmatmul.mubr.msk.f32.vlgmr.msra.gmra.mxu1 %vm352_vm2, %v4579_v59  ;;  %v881_v60 = vpop.permute.xlu0 %880 }
 0x2d4   :  { %3955 = vmatpush3.xpose.msk.msra.mxu1 %vm175_vm1, %v673_v49  ;;  %3958 = vmatprep.mubr.msk.f32.mxu1 %vm175_vm1, %v667_v55 }
 0x2d5   :  { %3956 = vmatprep.subr.msk.mxu1 %vm175_vm1, %v671_v43 }
 0x2d8   :  { %3957 = vmatpush3.xpose.msk.msra.mxu1 %vm175_vm1, %v671_v43 }
 0x2d9   :  { %3968 = vmatprep.subr.mxu1 %v883_v54 }
 0x2db   :  { %3959 = vmatmul.mubr.msk.f32.vlgmr.msra.gmra.mxu1 %vm175_vm1, %v669_v47 }
 0x2dc   :  { %3969 = vmatpush3.msra.mxu1 %v883_v54 }
 0x2dd   :  { %3970 = vmatprep.subr.mxu1 %v881_v60 }
 0x2de   :  { %3971 = vmatpush3.msra.mxu1 %v881_v60 }
 0x388   :  { %v3953_v61 = vpop.f32.mrf.mxu0 }
 0x389   :  { %v760_v62 = vsel %vm352_vm2, %v3953_v61, -inf }
 0x38a   :  { %761 = vmax.xlane.f32.xlu1 %v760_v62  ;;  %v657_v63 = vpop.f32.mrf.mxu0 }
 0x38b   :  { %v757_v0 = vsel %vm352_vm2, %v657_v63, -inf  ;;  %v4594_v1 = vpop.f32.mrf.mxu1 }
 0x38c   :  { %758 = vmax.xlane.f32.xlu0 %v757_v0  ;;  %5157 = vst [vmem:[#allocation13_spill] sm:$0xff] %v4594_v1 }
 0x38d   :  { %v4596_v2 = vpop.f32.mrf.mxu1 }
 0x393   :  { %v4598_v3 = vpop.f32.mrf.mxu1 }
 0x394   :  { %5158 = vst [vmem:[#allocation14_spill] sm:$0xff] %v4598_v3 }
 0x395   :  { %v4600_v4 = vpop.f32.mrf.mxu1 }
 0x396   :  { %5159 = vst [vmem:[#allocation15_spill] sm:$0xff] %v4600_v4 }
 0x39b   :  { %v3960_v5 = vpop.f32.mrf.mxu1  ;;  %996 = vrot.lane.b32.xlu1 %v4494_v10, %s4417_s9 }
 0x39c   :  { %v766_v6 = vsel %vm352_vm2, %v3960_v5, -inf }
 0x39d   :  { %767 = vmax.xlane.f32.xlu0 %v766_v6  ;;  %v748_v7 = vpop.f32.mrf.mxu1 }
 0x39e   :  { %v763_v14 = vsel %vm352_vm2, %v748_v7, -inf }
 0x39f   :  { %1091 = vrot.lane.b32.xlu1 %v4502_v12, %s4416_s8 }
 0x3a1   :  { %764 = vmax.xlane.f32.xlu0 %v763_v14 }
 0x3a3   :  { %1089 = vrot.lane.b32.xlu1 %v4532_v19, %s4417_s9 }
 0x3a7   :  { %1216 = vrot.lane.b32.xlu1 %v4488_v8, %s4418_s10 }
 0x3ab   :  { %1303 = vrot.lane.b32.xlu1 %v4496_v11, %s4418_s10 }
 0x3af   :  { %1423 = vrot.lane.b32.xlu1 %v4488_v8, %s4419_s11 }
 0x3b3   :  { %1421 = vrot.lane.b32.xlu1 %v4491_v9, %s4419_s11 }
 0x3b7   :  { %1093 = vrot.lane.b32.xlu0 %v4496_v11, %s4416_s8  ;;  %s3643_s8 = sshll.u32 %s4440_s7, 4  ;;  %s3644_s8 = int_to_ptr.vmem [resolvable:$true] %s3643_s8 }
 0x3b8   :  { %p4385_p2 = scmp.lt.s32.totalorder %s3644_s8, %s3644_s8 }
 0x3bb   :  { %998 = vrot.lane.b32.xlu0 %v4525_v17, %s4417_s9 }
 0x3bf   :  { %1087 = vrot.lane.b32.xlu0 %v4505_v13, %s4417_s9 }
 0x3c3   :  { %1214 = vrot.lane.b32.xlu0 %v4491_v9, %s4418_s10 }
 0x3c7   :  { %1301 = vrot.lane.b32.xlu0 %v4502_v12, %s4418_s10 }
 0x413   :  { %v762_v16 = vpop.xlane.xlu1 %761 }
 0x414   :  { %v770_v18 = vsub.f32 %v3953_v61, %v762_v16 }
 0x415   :  { %v759_v20 = vpop.xlane.xlu0 %758 }
 0x416   :  { %v769_v21 = vsub.f32 %v657_v63, %v759_v20  ;;  %v775_v22 = vmul.f32 1.442695, %v770_v18 }
 0x417   :  { %v997_v24 = vpop.permute.xlu1 %996 }
 0x418   :  { %v773_v23 = vmul.f32 1.442695, %v769_v21 }
 0x41a   :  { %4200 = vpow2.f32 %v773_v23 }
 0x41b   :  { %4202 = vpow2.f32 %v775_v22  ;;  %v1092_v25 = vpop.permute.xlu1 %1091 }
 0x41f   :  { %v1090_v29 = vpop.permute.xlu1 %1089 }
 0x423   :  { %v1217_v35 = vpop.permute.xlu1 %1216 }
 0x426   :  { %v768_v26 = vpop.xlane.xlu0 %767 }
 0x427   :  { %v4620_v27 = vpop.eup %4200  ;;  %v772_v30 = vsub.f32 %v3960_v5, %v768_v26  ;;  %v1304_v38 = vpop.permute.xlu1 %1303 }
 0x428   :  { %v4622_v28 = vpop.eup %4202  ;;  %3965 = vmatprep.mubr.msk.f32.mxu0 %vm352_vm2, %v4620_v27 }
 0x429   :  { %3966 = vmatmul.mubr.msk.f32.vlgmr.msra.gmra.mxu0 %vm352_vm2, %v4622_v28  ;;  %v779_v33 = vmul.f32 1.442695, %v772_v30 }
 0x42a   :  { %3976 = vmatpush3.xpose.msk.msra.mxu0 %vm175_vm1, %v4577_v58  ;;  %v765_v31 = vpop.xlane.xlu0 %764  ;;  %3979 = vmatprep.mubr.msk.f32.mxu0 %vm175_vm1, %v997_v24 }
 0x42b   :  { %v771_v32 = vsub.f32 %v748_v7, %v765_v31  ;;  %3977 = vmatprep.subr.msk.mxu0 %vm175_vm1, %v1001_v15  ;;  %v4637_v42 = vpop.permute.xlu1 %1423 }
 0x42d   :  { %v777_v34 = vmul.f32 1.442695, %v771_v32 }
 0x42e   :  { %3978 = vmatpush3.xpose.msk.msra.mxu0 %vm175_vm1, %v1001_v15  ;;  %v1094_v36 = vpop.permute.xlu0 %1093 }
 0x42f   :  { %4204 = vpow2.f32 %v777_v34  ;;  %3982 = vmatprep.subr.msk.mxu1 %vm175_vm1, %v1094_v36  ;;  %3989 = vmatprep.subr.mxu0 %v1217_v35  ;;  %v1422_v61 = vpop.permute.xlu1 %1421 }
 0x430   :  { %4206 = vpow2.f32 %v779_v33 }
 0x432   :  { %v999_v37 = vpop.permute.xlu0 %998 }
 0x433   :  { %3980 = vmatmul.mubr.msk.f32.vlgmr.msra.gmra.mxu0 %vm175_vm1, %v999_v37 }
 0x434   :  { %3990 = vmatpush3.msra.mxu0 %v1217_v35 }
 0x436   :  { %v1088_v39 = vpop.permute.xlu0 %1087 }
 0x43a   :  { %v1215_v40 = vpop.permute.xlu0 %1214 }
 0x43b   :  { %3991 = vmatprep.subr.mxu0 %v1215_v40 }
 0x43c   :  { %v4635_v41 = vpop.eup %4204  ;;  %3992 = vmatpush3.msra.mxu0 %v1215_v40 }
 0x43d   :  { %v4639_v43 = vpop.eup %4206  ;;  %3972 = vmatprep.mubr.msk.f32.mxu1 %vm352_vm2, %v4635_v41  ;;  %4003 = vmatprep.subr.msk.mxu0 %vm175_vm1, %v4637_v42 }
 0x43e   :  { %3973 = vmatmul.mubr.msk.f32.vlgmr.msra.gmra.mxu1 %vm352_vm2, %v4639_v43  ;;  %v1302_v44 = vpop.permute.xlu0 %1301 }
 0x43f   :  { %3983 = vmatpush3.xpose.msk.msra.mxu1 %vm175_vm1, %v1094_v36  ;;  %3986 = vmatprep.mubr.msk.f32.mxu1 %vm175_vm1, %v1088_v39 }
 0x440   :  { %3984 = vmatprep.subr.msk.mxu1 %vm175_vm1, %v1092_v25 }
 0x443   :  { %3985 = vmatpush3.xpose.msk.msra.mxu1 %vm175_vm1, %v1092_v25 }
 0x444   :  { %3996 = vmatprep.subr.mxu1 %v1304_v38 }
 0x446   :  { %3987 = vmatmul.mubr.msk.f32.vlgmr.msra.gmra.mxu1 %vm175_vm1, %v1090_v29 }
 0x447   :  { %3997 = vmatpush3.msra.mxu1 %v1304_v38 }
 0x448   :  { %3998 = vmatprep.subr.mxu1 %v1302_v44 }
 0x449   :  { %3999 = vmatpush3.msra.mxu1 %v1302_v44 }
 0x4e9   :  { %v4652_v45 = vpop.f32.mrf.mxu0 }
 0x4eb   :  { %v4654_v46 = vpop.f32.mrf.mxu0 }
 0x4f3   :  { %v3981_v47 = vpop.f32.mrf.mxu0 }
 0x4f4   :  { %v1181_v48 = vsel %vm352_vm2, %v3981_v47, -inf }
 0x4f5   :  { %1182 = vmax.xlane.f32.xlu1 %v1181_v48  ;;  %v1078_v49 = vpop.f32.mrf.mxu0 }
 0x4f6   :  { %v1178_v50 = vsel %vm352_vm2, %v1078_v49, -inf }
 0x4f7   :  { %1179 = vmax.xlane.f32.xlu0 %v1178_v50 }
 0x4fe   :  { %v4658_v51 = vpop.f32.mrf.mxu1 }
 0x500   :  { %v4660_v54 = vpop.f32.mrf.mxu1 }
 0x506   :  { %v3988_v55 = vpop.f32.mrf.mxu1  ;;  %1417 = vrot.lane.b32.xlu1 %v4494_v10, %s4420_s12 }
 0x507   :  { %v1187_v56 = vsel %vm352_vm2, %v3988_v55, -inf }
 0x508   :  { %1188 = vmax.xlane.f32.xlu0 %v1187_v56  ;;  %v1169_v58 = vpop.f32.mrf.mxu1 }
 0x509   :  { %v1184_v60 = vsel %vm352_vm2, %v1169_v58, -inf }
 0x50a   :  { %1512 = vrot.lane.b32.xlu1 %v4502_v12, %s4419_s11 }
 0x50c   :  { %1185 = vmax.xlane.f32.xlu0 %v1184_v60 }
 0x50e   :  { %1510 = vrot.lane.b32.xlu1 %v4532_v19, %s4420_s12 }
 0x512   :  { %1637 = vrot.lane.b32.xlu1 %v4488_v8, %s4421_s13 }
 0x516   :  { %1724 = vrot.lane.b32.xlu1 %v4496_v11, %s4421_s13 }
 0x51a   :  { %1844 = vrot.lane.b32.xlu1 %v4488_v8, %s4422_s14 }
 0x51e   :  { %1842 = vrot.lane.b32.xlu1 %v4491_v9, %s4422_s14 }
 0x522   :  { %1514 = vrot.lane.b32.xlu0 %v4496_v11, %s4419_s11 }
 0x526   :  { %1419 = vrot.lane.b32.xlu0 %v4525_v17, %s4420_s12 }
 0x52a   :  { %1508 = vrot.lane.b32.xlu0 %v4505_v13, %s4420_s12 }
 0x52e   :  { %1635 = vrot.lane.b32.xlu0 %v4491_v9, %s4421_s13 }
 0x532   :  { %1722 = vrot.lane.b32.xlu0 %v4502_v12, %s4421_s13 }
 0x57e   :  { %v1183_v62 = vpop.xlane.xlu1 %1182 }
 0x57f   :  { %v1191_v63 = vsub.f32 %v3981_v47, %v1183_v62 }
 0x580   :  { %v1180_v0 = vpop.xlane.xlu0 %1179 }
 0x581   :  { %v1190_v5 = vsub.f32 %v1078_v49, %v1180_v0  ;;  %v1196_v6 = vmul.f32 1.442695, %v1191_v63 }
 0x582   :  { %v1418_v14 = vpop.permute.xlu1 %1417 }
 0x583   :  { %v1194_v7 = vmul.f32 1.442695, %v1190_v5 }
 0x585   :  { %4208 = vpow2.f32 %v1194_v7 }
 0x586   :  { %4210 = vpow2.f32 %v1196_v6  ;;  %v1513_v15 = vpop.permute.xlu1 %1512 }
 0x58a   :  { %v1511_v21 = vpop.permute.xlu1 %1510 }
 0x58e   :  { %v1638_v29 = vpop.permute.xlu1 %1637 }
 0x591   :  { %v1189_v16 = vpop.xlane.xlu0 %1188 }
 0x592   :  { %v4680_v18 = vpop.eup %4208  ;;  %v1193_v22 = vsub.f32 %v3988_v55, %v1189_v16  ;;  %v1725_v32 = vpop.permute.xlu1 %1724 }
 0x593   :  { %v4682_v20 = vpop.eup %4210  ;;  %3993 = vmatprep.mubr.msk.f32.mxu0 %vm352_vm2, %v4680_v18 }
 0x594   :  { %3994 = vmatmul.mubr.msk.f32.vlgmr.msra.gmra.mxu0 %vm352_vm2, %v4682_v20  ;;  %v1200_v25 = vmul.f32 1.442695, %v1193_v22 }
 0x595   :  { %4004 = vmatpush3.xpose.msk.msra.mxu0 %vm175_vm1, %v4637_v42  ;;  %v1186_v23 = vpop.xlane.xlu0 %1185  ;;  %4007 = vmatprep.mubr.msk.f32.mxu0 %vm175_vm1, %v1418_v14 }
 0x596   :  { %v1192_v24 = vsub.f32 %v1169_v58, %v1186_v23  ;;  %4005 = vmatprep.subr.msk.mxu0 %vm175_vm1, %v1422_v61  ;;  %v4697_v36 = vpop.permute.xlu1 %1844 }
 0x598   :  { %v1198_v26 = vmul.f32 1.442695, %v1192_v24 }
 0x599   :  { %4006 = vmatpush3.xpose.msk.msra.mxu0 %vm175_vm1, %v1422_v61  ;;  %v1515_v30 = vpop.permute.xlu0 %1514 }
 0x59a   :  { %4212 = vpow2.f32 %v1198_v26  ;;  %4010 = vmatprep.subr.msk.mxu1 %vm175_vm1, %v1515_v30  ;;  %4017 = vmatprep.subr.mxu0 %v1638_v29  ;;  %v1843_v61 = vpop.permute.xlu1 %1842 }
 0x59b   :  { %4214 = vpow2.f32 %v1200_v25 }
 0x59d   :  { %v1420_v31 = vpop.permute.xlu0 %1419 }
 0x59e   :  { %4008 = vmatmul.mubr.msk.f32.vlgmr.msra.gmra.mxu0 %vm175_vm1, %v1420_v31 }
 0x59f   :  { %4018 = vmatpush3.msra.mxu0 %v1638_v29 }
 0x5a1   :  { %v1509_v33 = vpop.permute.xlu0 %1508 }
 0x5a5   :  { %v1636_v34 = vpop.permute.xlu0 %1635 }
 0x5a6   :  { %4019 = vmatprep.subr.mxu0 %v1636_v34 }
 0x5a7   :  { %v4695_v35 = vpop.eup %4212  ;;  %4020 = vmatpush3.msra.mxu0 %v1636_v34 }
 0x5a8   :  { %v4699_v37 = vpop.eup %4214  ;;  %4000 = vmatprep.mubr.msk.f32.mxu1 %vm352_vm2, %v4695_v35  ;;  %4031 = vmatprep.subr.msk.mxu0 %vm175_vm1, %v4697_v36 }
 0x5a9   :  { %4001 = vmatmul.mubr.msk.f32.vlgmr.msra.gmra.mxu1 %vm352_vm2, %v4699_v37  ;;  %v1723_v38 = vpop.permute.xlu0 %1722 }
 0x5aa   :  { %4011 = vmatpush3.xpose.msk.msra.mxu1 %vm175_vm1, %v1515_v30  ;;  %4014 = vmatprep.mubr.msk.f32.mxu1 %vm175_vm1, %v1509_v33 }
 0x5ab   :  { %4012 = vmatprep.subr.msk.mxu1 %vm175_vm1, %v1513_v15 }
 0x5ae   :  { %4013 = vmatpush3.xpose.msk.msra.mxu1 %vm175_vm1, %v1513_v15 }
 0x5af   :  { %4024 = vmatprep.subr.mxu1 %v1725_v32 }
 0x5b1   :  { %4015 = vmatmul.mubr.msk.f32.vlgmr.msra.gmra.mxu1 %vm175_vm1, %v1511_v21 }
 0x5b2   :  { %4025 = vmatpush3.msra.mxu1 %v1725_v32 }
 0x5b3   :  { %4026 = vmatprep.subr.mxu1 %v1723_v38 }
 0x5b4   :  { %4027 = vmatpush3.msra.mxu1 %v1723_v38 }
 0x654   :  { %v4712_v39 = vpop.f32.mrf.mxu0 }
 0x656   :  { %v4714_v40 = vpop.f32.mrf.mxu0 }
 0x65e   :  { %v4009_v42 = vpop.f32.mrf.mxu0 }
 0x65f   :  { %v1602_v44 = vsel %vm352_vm2, %v4009_v42, -inf }
 0x660   :  { %1603 = vmax.xlane.f32.xlu1 %v1602_v44  ;;  %v1499_v47 = vpop.f32.mrf.mxu0 }
 0x661   :  { %v1599_v48 = vsel %vm352_vm2, %v1499_v47, -inf }
 0x662   :  { %1600 = vmax.xlane.f32.xlu0 %v1599_v48 }
 0x669   :  { %v4718_v49 = vpop.f32.mrf.mxu1 }
 0x66b   :  { %v4720_v50 = vpop.f32.mrf.mxu1 }
 0x671   :  { %v4016_v55 = vpop.f32.mrf.mxu1  ;;  %1838 = vrot.lane.b32.xlu1 %v4494_v10, %s4423_s15 }
 0x672   :  { %v1608_v56 = vsel %vm352_vm2, %v4016_v55, -inf }
 0x673   :  { %1609 = vmax.xlane.f32.xlu0 %v1608_v56  ;;  %v1590_v58 = vpop.f32.mrf.mxu1 }
 0x674   :  { %v1605_v60 = vsel %vm352_vm2, %v1590_v58, -inf }
 0x675   :  { %1933 = vrot.lane.b32.xlu1 %v4502_v12, %s4422_s14 }
 0x677   :  { %1606 = vmax.xlane.f32.xlu0 %v1605_v60 }
 0x679   :  { %1931 = vrot.lane.b32.xlu1 %v4532_v19, %s4423_s15 }
 0x67d   :  { %2058 = vrot.lane.b32.xlu1 %v4488_v8, %s4424_s16 }
 0x681   :  { %2145 = vrot.lane.b32.xlu1 %v4496_v11, %s4424_s16 }
 0x685   :  { %2265 = vrot.lane.b32.xlu1 %v4488_v8, %s4425_s17 }
 0x689   :  { %2263 = vrot.lane.b32.xlu1 %v4491_v9, %s4425_s17 }
 0x68d   :  { %1935 = vrot.lane.b32.xlu0 %v4496_v11, %s4422_s14 }
 0x691   :  { %1840 = vrot.lane.b32.xlu0 %v4525_v17, %s4423_s15 }
 0x695   :  { %1929 = vrot.lane.b32.xlu0 %v4505_v13, %s4423_s15 }
 0x699   :  { %2056 = vrot.lane.b32.xlu0 %v4491_v9, %s4424_s16 }
 0x69d   :  { %2143 = vrot.lane.b32.xlu0 %v4502_v12, %s4424_s16 }
 0x6e9   :  { %v1604_v62 = vpop.xlane.xlu1 %1603 }
 0x6ea   :  { %v1612_v63 = vsub.f32 %v4009_v42, %v1604_v62 }
 0x6eb   :  { %v1601_v0 = vpop.xlane.xlu0 %1600 }
 0x6ec   :  { %v1611_v5 = vsub.f32 %v1499_v47, %v1601_v0  ;;  %v1617_v6 = vmul.f32 1.442695, %v1612_v63 }
 0x6ed   :  { %v1839_v14 = vpop.permute.xlu1 %1838 }
 0x6ee   :  { %v1615_v7 = vmul.f32 1.442695, %v1611_v5 }
 0x6f0   :  { %4216 = vpow2.f32 %v1615_v7 }
 0x6f1   :  { %4218 = vpow2.f32 %v1617_v6  ;;  %v1934_v15 = vpop.permute.xlu1 %1933 }
 0x6f5   :  { %v1932_v23 = vpop.permute.xlu1 %1931 }
 0x6f9   :  { %v2059_v31 = vpop.permute.xlu1 %2058 }
 0x6fc   :  { %v1610_v16 = vpop.xlane.xlu0 %1609 }
 0x6fd   :  { %v4740_v21 = vpop.eup %4216  ;;  %v1614_v24 = vsub.f32 %v4016_v55, %v1610_v16  ;;  %v2146_v34 = vpop.permute.xlu1 %2145 }
 0x6fe   :  { %v4742_v22 = vpop.eup %4218  ;;  %4021 = vmatprep.mubr.msk.f32.mxu0 %vm352_vm2, %v4740_v21 }
 0x6ff   :  { %4022 = vmatmul.mubr.msk.f32.vlgmr.msra.gmra.mxu0 %vm352_vm2, %v4742_v22  ;;  %v1621_v29 = vmul.f32 1.442695, %v1614_v24 }
 0x700   :  { %4032 = vmatpush3.xpose.msk.msra.mxu0 %vm175_vm1, %v4697_v36  ;;  %v1607_v25 = vpop.xlane.xlu0 %1606  ;;  %4035 = vmatprep.mubr.msk.f32.mxu0 %vm175_vm1, %v1839_v14 }
 0x701   :  { %v1613_v26 = vsub.f32 %v1590_v58, %v1607_v25  ;;  %4033 = vmatprep.subr.msk.mxu0 %vm175_vm1, %v1843_v61  ;;  %v4757_v44 = vpop.permute.xlu1 %2265 }
 0x703   :  { %v1619_v30 = vmul.f32 1.442695, %v1613_v26 }
 0x704   :  { %4034 = vmatpush3.xpose.msk.msra.mxu0 %vm175_vm1, %v1843_v61  ;;  %v1936_v32 = vpop.permute.xlu0 %1935 }
 0x705   :  { %4220 = vpow2.f32 %v1619_v30  ;;  %4038 = vmatprep.subr.msk.mxu1 %vm175_vm1, %v1936_v32  ;;  %4045 = vmatprep.subr.mxu0 %v2059_v31 }
 0x706   :  { %4222 = vpow2.f32 %v1621_v29 }
 0x708   :  { %v1841_v33 = vpop.permute.xlu0 %1840 }
 0x709   :  { %4036 = vmatmul.mubr.msk.f32.vlgmr.msra.gmra.mxu0 %vm175_vm1, %v1841_v33 }
 0x70a   :  { %4046 = vmatpush3.msra.mxu0 %v2059_v31 }
 0x70c   :  { %v1930_v36 = vpop.permute.xlu0 %1929 }
 0x710   :  { %v2057_v38 = vpop.permute.xlu0 %2056 }
 0x711   :  { %4047 = vmatprep.subr.mxu0 %v2057_v38 }
 0x712   :  { %v4755_v42 = vpop.eup %4220  ;;  %4048 = vmatpush3.msra.mxu0 %v2057_v38 }
 0x713   :  { %v4759_v47 = vpop.eup %4222  ;;  %4028 = vmatprep.mubr.msk.f32.mxu1 %vm352_vm2, %v4755_v42  ;;  %4059 = vmatprep.subr.msk.mxu0 %vm175_vm1, %v4757_v44 }
 0x714   :  { %4029 = vmatmul.mubr.msk.f32.vlgmr.msra.gmra.mxu1 %vm352_vm2, %v4759_v47  ;;  %v2144_v48 = vpop.permute.xlu0 %2143 }
 0x715   :  { %4039 = vmatpush3.xpose.msk.msra.mxu1 %vm175_vm1, %v1936_v32  ;;  %4042 = vmatprep.mubr.msk.f32.mxu1 %vm175_vm1, %v1930_v36 }
 0x716   :  { %4040 = vmatprep.subr.msk.mxu1 %vm175_vm1, %v1934_v15 }
 0x719   :  { %4041 = vmatpush3.xpose.msk.msra.mxu1 %vm175_vm1, %v1934_v15  ;;  %v2264_v15 = vpop.permute.xlu1 %2263 }
 0x71a   :  { %4052 = vmatprep.subr.mxu1 %v2146_v34 }
 0x71c   :  { %4043 = vmatmul.mubr.msk.f32.vlgmr.msra.gmra.mxu1 %vm175_vm1, %v1932_v23 }
 0x71d   :  { %4053 = vmatpush3.msra.mxu1 %v2146_v34 }
 0x71e   :  { %4054 = vmatprep.subr.mxu1 %v2144_v48 }
 0x71f   :  { %4055 = vmatpush3.msra.mxu1 %v2144_v48 }
 0x7bf   :  { %v4772_v55 = vpop.f32.mrf.mxu0 }
 0x7c1   :  { %v4774_v56 = vpop.f32.mrf.mxu0 }
 0x7c9   :  { %v4037_v58 = vpop.f32.mrf.mxu0 }
 0x7ca   :  { %v2023_v60 = vsel %vm352_vm2, %v4037_v58, -inf }
 0x7cb   :  { %2024 = vmax.xlane.f32.xlu1 %v2023_v60  ;;  %v1920_v61 = vpop.f32.mrf.mxu0 }
 0x7cc   :  { %v2020_v62 = vsel %vm352_vm2, %v1920_v61, -inf }
 0x7cd   :  { %2021 = vmax.xlane.f32.xlu0 %v2020_v62 }
 0x7d4   :  { %v4778_v63 = vpop.f32.mrf.mxu1 }
 0x7d6   :  { %v4780_v0 = vpop.f32.mrf.mxu1 }
 0x7dc   :  { %v4044_v5 = vpop.f32.mrf.mxu1  ;;  %2259 = vrot.lane.b32.xlu1 %v4494_v10, %s4426_s18 }
 0x7dd   :  { %v2029_v6 = vsel %vm352_vm2, %v4044_v5, -inf }
 0x7de   :  { %2030 = vmax.xlane.f32.xlu0 %v2029_v6  ;;  %v2011_v7 = vpop.f32.mrf.mxu1 }
 0x7df   :  { %v2026_v14 = vsel %vm352_vm2, %v2011_v7, -inf }
 0x7e0   :  { %2354 = vrot.lane.b32.xlu1 %v4502_v12, %s4425_s17 }
 0x7e2   :  { %2027 = vmax.xlane.f32.xlu0 %v2026_v14 }
 0x7e4   :  { %2352 = vrot.lane.b32.xlu1 %v4532_v19, %s4426_s18 }
 0x7e8   :  { %2479 = vrot.lane.b32.xlu1 %v4488_v8, %s4427_s19 }
 0x7ec   :  { %2566 = vrot.lane.b32.xlu1 %v4496_v11, %s4427_s19 }
 0x7f0   :  { %2686 = vrot.lane.b32.xlu1 %v4488_v8, %s4428_s22 }
 0x7f4   :  { %2684 = vrot.lane.b32.xlu1 %v4491_v9, %s4428_s22 }
 0x7f8   :  { %2356 = vrot.lane.b32.xlu0 %v4496_v11, %s4425_s17 }
 0x7fc   :  { %2261 = vrot.lane.b32.xlu0 %v4525_v17, %s4426_s18 }
 0x800   :  { %2350 = vrot.lane.b32.xlu0 %v4505_v13, %s4426_s18 }
 0x804   :  { %2477 = vrot.lane.b32.xlu0 %v4491_v9, %s4427_s19 }
 0x808   :  { %2564 = vrot.lane.b32.xlu0 %v4502_v12, %s4427_s19 }
 0x854   :  { %v2025_v16 = vpop.xlane.xlu1 %2024 }
 0x855   :  { %v2033_v23 = vsub.f32 %v4037_v58, %v2025_v16 }
 0x856   :  { %v2022_v24 = vpop.xlane.xlu0 %2021 }
 0x857   :  { %v2032_v25 = vsub.f32 %v1920_v61, %v2022_v24  ;;  %v2038_v26 = vmul.f32 1.442695, %v2033_v23 }
 0x858   :  { %v2260_v30 = vpop.permute.xlu1 %2259 }
 0x859   :  { %v2036_v29 = vmul.f32 1.442695, %v2032_v25 }
 0x85b   :  { %4224 = vpow2.f32 %v2036_v29 }
 0x85c   :  { %4226 = vpow2.f32 %v2038_v26  ;;  %v2355_v31 = vpop.permute.xlu1 %2354 }
 0x860   :  { %v2353_v36 = vpop.permute.xlu1 %2352 }
 0x864   :  { %v2480_v62 = vpop.permute.xlu1 %2479 }
 0x867   :  { %v2031_v32 = vpop.xlane.xlu0 %2030 }
 0x868   :  { %v4800_v33 = vpop.eup %4224  ;;  %v2035_v38 = vsub.f32 %v4044_v5, %v2031_v32 }
 0x869   :  { %v4802_v34 = vpop.eup %4226  ;;  %4049 = vmatprep.mubr.msk.f32.mxu0 %vm352_vm2, %v4800_v33 }
 0x86a   :  { %4050 = vmatmul.mubr.msk.f32.vlgmr.msra.gmra.mxu0 %vm352_vm2, %v4802_v34  ;;  %v2042_v60 = vmul.f32 1.442695, %v2035_v38 }
 0x86b   :  { %4060 = vmatpush3.xpose.msk.msra.mxu0 %vm175_vm1, %v4757_v44  ;;  %v2028_v48 = vpop.xlane.xlu0 %2027  ;;  %4063 = vmatprep.mubr.msk.f32.mxu0 %vm175_vm1, %v2260_v30  ;;  %v2567_v44 = vpop.permute.xlu1 %2566 }
 0x86c   :  { %v2034_v58 = vsub.f32 %v2011_v7, %v2028_v48  ;;  %4061 = vmatprep.subr.msk.mxu0 %vm175_vm1, %v2264_v15 }
 0x86e   :  { %v2040_v61 = vmul.f32 1.442695, %v2034_v58 }
 0x86f   :  { %4062 = vmatpush3.xpose.msk.msra.mxu0 %vm175_vm1, %v2264_v15  ;;  %v2357_v5 = vpop.permute.xlu0 %2356  ;;  %v4817_v23 = vpop.permute.xlu1 %2686 }
 0x870   :  { %4228 = vpow2.f32 %v2040_v61  ;;  %4066 = vmatprep.subr.msk.mxu1 %vm175_vm1, %v2357_v5  ;;  %4073 = vmatprep.subr.mxu0 %v2480_v62 }
 0x871   :  { %4230 = vpow2.f32 %v2042_v60 }
 0x873   :  { %v2262_v6 = vpop.permute.xlu0 %2261 }
 0x874   :  { %4064 = vmatmul.mubr.msk.f32.vlgmr.msra.gmra.mxu0 %vm175_vm1, %v2262_v6 }
 0x875   :  { %4074 = vmatpush3.msra.mxu0 %v2480_v62  ;;  %v2685_v62 = vpop.permute.xlu1 %2684 }
 0x877   :  { %v2351_v14 = vpop.permute.xlu0 %2350 }
 0x87b   :  { %v2478_v7 = vpop.permute.xlu0 %2477 }
 0x87c   :  { %4075 = vmatprep.subr.mxu0 %v2478_v7 }
 0x87d   :  { %v4815_v16 = vpop.eup %4228  ;;  %4076 = vmatpush3.msra.mxu0 %v2478_v7 }
 0x87e   :  { %v4819_v15 = vpop.eup %4230  ;;  %4056 = vmatprep.mubr.msk.f32.mxu1 %vm352_vm2, %v4815_v16  ;;  %4087 = vmatprep.subr.msk.mxu0 %vm175_vm1, %v4817_v23 }
 0x87f   :  { %4057 = vmatmul.mubr.msk.f32.vlgmr.msra.gmra.mxu1 %vm352_vm2, %v4819_v15  ;;  %v2565_v24 = vpop.permute.xlu0 %2564 }
 0x880   :  { %4067 = vmatpush3.xpose.msk.msra.mxu1 %vm175_vm1, %v2357_v5  ;;  %4070 = vmatprep.mubr.msk.f32.mxu1 %vm175_vm1, %v2351_v14 }
 0x881   :  { %4068 = vmatprep.subr.msk.mxu1 %vm175_vm1, %v2355_v31 }
 0x884   :  { %4069 = vmatpush3.xpose.msk.msra.mxu1 %vm175_vm1, %v2355_v31 }
 0x885   :  { %4080 = vmatprep.subr.mxu1 %v2567_v44 }
 0x887   :  { %4071 = vmatmul.mubr.msk.f32.vlgmr.msra.gmra.mxu1 %vm175_vm1, %v2353_v36 }
 0x888   :  { %4081 = vmatpush3.msra.mxu1 %v2567_v44 }
 0x889   :  { %4082 = vmatprep.subr.mxu1 %v2565_v24 }
 0x88a   :  { %4083 = vmatpush3.msra.mxu1 %v2565_v24 }
 0x92a   :  { %v4832_v25 = vpop.f32.mrf.mxu0 }
 0x92c   :  { %v4834_v26 = vpop.f32.mrf.mxu0 }
 0x934   :  { %v4065_v29 = vpop.f32.mrf.mxu0 }
 0x935   :  { %v2444_v30 = vsel %vm352_vm2, %v4065_v29, -inf }
 0x936   :  { %2445 = vmax.xlane.f32.xlu1 %v2444_v30  ;;  %v2341_v32 = vpop.f32.mrf.mxu0 }
 0x937   :  { %v2441_v38 = vsel %vm352_vm2, %v2341_v32, -inf }
 0x938   :  { %2442 = vmax.xlane.f32.xlu0 %v2441_v38 }
 0x93f   :  { %v4838_v31 = vpop.f32.mrf.mxu1 }
 0x940   :  { %5160 = vst [vmem:[#allocation16_spill] sm:$0xff] %v4838_v31 }
 0x941   :  { %v4840_v48 = vpop.f32.mrf.mxu1 }
 0x942   :  { %5161 = vst [vmem:[#allocation17_spill] sm:$0xff] %v4840_v48 }
 0x947   :  { %v4072_v36 = vpop.f32.mrf.mxu1  ;;  %2680 = vrot.lane.b32.xlu1 %v4494_v10, %s4429_s23 }
 0x948   :  { %v2450_v58 = vsel %vm352_vm2, %v4072_v36, -inf }
 0x949   :  { %2451 = vmax.xlane.f32.xlu0 %v2450_v58  ;;  %v2432_v60 = vpop.f32.mrf.mxu1 }
 0x94a   :  { %v2447_v61 = vsel %vm352_vm2, %v2432_v60, -inf }
 0x94b   :  { %2775 = vrot.lane.b32.xlu1 %v4502_v12, %s4428_s22 }
 0x94d   :  { %2448 = vmax.xlane.f32.xlu0 %v2447_v61 }
 0x94f   :  { %2773 = vrot.lane.b32.xlu1 %v4532_v19, %s4429_s23 }
 0x953   :  { %2900 = vrot.lane.b32.xlu1 %v4488_v8, %s4430_s24 }
 0x957   :  { %2987 = vrot.lane.b32.xlu1 %v4496_v11, %s4430_s24 }
 0x95b   :  { %3107 = vrot.lane.b32.xlu1 %v4488_v8, %s4431_s25 }
 0x95f   :  { %3105 = vrot.lane.b32.xlu1 %v4491_v9, %s4431_s25 }
 0x963   :  { %2777 = vrot.lane.b32.xlu0 %v4496_v11, %s4428_s22 }
 0x967   :  { %2682 = vrot.lane.b32.xlu0 %v4525_v17, %s4429_s23 }
 0x96b   :  { %2771 = vrot.lane.b32.xlu0 %v4505_v13, %s4429_s23 }
 0x96f   :  { %2898 = vrot.lane.b32.xlu0 %v4491_v9, %s4430_s24 }
 0x973   :  { %2985 = vrot.lane.b32.xlu0 %v4502_v12, %s4430_s24 }
 0x9bf   :  { %v2446_v5 = vpop.xlane.xlu1 %2445 }
 0x9c0   :  { %v2454_v6 = vsub.f32 %v4065_v29, %v2446_v5 }
 0x9c1   :  { %v2443_v44 = vpop.xlane.xlu0 %2442 }
 0x9c2   :  { %v2453_v14 = vsub.f32 %v2341_v32, %v2443_v44  ;;  %v2459_v7 = vmul.f32 1.442695, %v2454_v6 }
 0x9c3   :  { %v2681_v30 = vpop.permute.xlu1 %2680 }
 0x9c4   :  { %v2457_v24 = vmul.f32 1.442695, %v2453_v14 }
 0x9c6   :  { %4232 = vpow2.f32 %v2457_v24 }
 0x9c7   :  { %4234 = vpow2.f32 %v2459_v7  ;;  %v2776_v38 = vpop.permute.xlu1 %2775 }
 0x9cb   :  { %v2774_v48 = vpop.permute.xlu1 %2773 }
 0x9cf   :  { %v2901_v44 = vpop.permute.xlu1 %2900 }
 0x9d2   :  { %v2452_v58 = vpop.xlane.xlu0 %2451 }
 0x9d3   :  { %v4860_v61 = vpop.eup %4232  ;;  %v2456_v3 = vsub.f32 %v4072_v36, %v2452_v58 }
 0x9d4   :  { %v4862_v31 = vpop.eup %4234  ;;  %4077 = vmatprep.mubr.msk.f32.mxu0 %vm352_vm2, %v4860_v61 }
 0x9d5   :  { %4078 = vmatmul.mubr.msk.f32.vlgmr.msra.gmra.mxu0 %vm352_vm2, %v4862_v31  ;;  %v2463_v5 = vmul.f32 1.442695, %v2456_v3 }
 0x9d6   :  { %4088 = vmatpush3.xpose.msk.msra.mxu0 %vm175_vm1, %v4817_v23  ;;  %v2449_v29 = vpop.xlane.xlu0 %2448  ;;  %4091 = vmatprep.mubr.msk.f32.mxu0 %vm175_vm1, %v2681_v30  ;;  %v2988_v23 = vpop.permute.xlu1 %2987 }
 0x9d7   :  { %v2455_v32 = vsub.f32 %v2432_v60, %v2449_v29  ;;  %4089 = vmatprep.subr.msk.mxu0 %vm175_vm1, %v2685_v62 }
 0x9d9   :  { %v2461_v6 = vmul.f32 1.442695, %v2455_v32 }
 0x9da   :  { %4090 = vmatpush3.xpose.msk.msra.mxu0 %vm175_vm1, %v2685_v62  ;;  %v2778_v36 = vpop.permute.xlu0 %2777  ;;  %v3108_v3 = vpop.permute.xlu1 %3107 }
 0x9db   :  { %4236 = vpow2.f32 %v2461_v6  ;;  %4094 = vmatprep.subr.msk.mxu1 %vm175_vm1, %v2778_v36  ;;  %4101 = vmatprep.subr.mxu0 %v2901_v44 }
 0x9dc   :  { %4238 = vpow2.f32 %v2463_v5 }
 0x9de   :  { %v2683_v14 = vpop.permute.xlu0 %2682 }
 0x9df   :  { %4092 = vmatmul.mubr.msk.f32.vlgmr.msra.gmra.mxu0 %vm175_vm1, %v2683_v14 }
 0x9e0   :  { %4102 = vmatpush3.msra.mxu0 %v2901_v44 }
 0x9e2   :  { %v2772_v7 = vpop.permute.xlu0 %2771 }
 0x9e6   :  { %v2899_v60 = vpop.permute.xlu0 %2898 }
 0x9e7   :  { %4103 = vmatprep.subr.mxu0 %v2899_v60 }
 0x9e8   :  { %v4875_v24 = vpop.eup %4236  ;;  %4104 = vmatpush3.msra.mxu0 %v2899_v60 }
 0x9e9   :  { %v4877_v30 = vpop.eup %4238  ;;  %4084 = vmatprep.mubr.msk.f32.mxu1 %vm352_vm2, %v4875_v24  ;;  %4115 = vmatprep.subr.msk.mxu0 %vm175_vm1, %v3108_v3 }
 0x9ea   :  { %4085 = vmatmul.mubr.msk.f32.vlgmr.msra.gmra.mxu1 %vm352_vm2, %v4877_v30  ;;  %v2986_v62 = vpop.permute.xlu0 %2985 }
 0x9eb   :  { %4095 = vmatpush3.xpose.msk.msra.mxu1 %vm175_vm1, %v2778_v36  ;;  %4098 = vmatprep.mubr.msk.f32.mxu1 %vm175_vm1, %v2772_v7 }
 0x9ec   :  { %4096 = vmatprep.subr.msk.mxu1 %vm175_vm1, %v2776_v38 }
 0x9ef   :  { %4097 = vmatpush3.xpose.msk.msra.mxu1 %vm175_vm1, %v2776_v38 }
 0x9f0   :  { %4108 = vmatprep.subr.mxu1 %v2988_v23 }
 0x9f2   :  { %4099 = vmatmul.mubr.msk.f32.vlgmr.msra.gmra.mxu1 %vm175_vm1, %v2774_v48 }
 0x9f3   :  { %4109 = vmatpush3.msra.mxu1 %v2988_v23 }
 0x9f4   :  { %4110 = vmatprep.subr.mxu1 %v2986_v62 }
 0x9f5   :  { %4111 = vmatpush3.msra.mxu1 %v2986_v62 }
 0xa95   :  { %v4889_v58 = vpop.f32.mrf.mxu0 }
 0xa97   :  { %v4891_v29 = vpop.f32.mrf.mxu0 }
 0xa9f   :  { %v4093_v32 = vpop.f32.mrf.mxu0 }
 0xaa0   :  { %v2865_v5 = vsel %vm352_vm2, %v4093_v32, -inf }
 0xaa1   :  { %2866 = vmax.xlane.f32.xlu1 %v2865_v5  ;;  %v2762_v6 = vpop.f32.mrf.mxu0 }
 0xaa2   :  { %v2862_v44 = vsel %vm352_vm2, %v2762_v6, -inf }
 0xaa3   :  { %2863 = vmax.xlane.f32.xlu0 %v2862_v44 }
 0xaaa   :  { %v4895_v38 = vpop.f32.mrf.mxu1 }
 0xaab   :  { %5162 = vst [vmem:[#allocation18_spill] sm:$0xff] %v4895_v38 }
 0xaac   :  { %v4897_v36 = vpop.f32.mrf.mxu1 }
 0xaad   :  { %5163 = vst [vmem:[#allocation19_spill] sm:$0xff] %v4897_v36 }
 0xab2   :  { %v4100_v48 = vpop.f32.mrf.mxu1  ;;  %3101 = vrot.lane.b32.xlu1 %v4494_v10, %s4432_s26  ;;  %v3106_v10 = vpop.permute.xlu1 %3105 }
 0xab3   :  { %v2871_v14 = vsel %vm352_vm2, %v4100_v48, -inf }
 0xab4   :  { %2872 = vmax.xlane.f32.xlu0 %v2871_v14  ;;  %v2853_v23 = vpop.f32.mrf.mxu1 }
 0xab5   :  { %v2868_v7 = vsel %vm352_vm2, %v2853_v23, -inf }
 0xab6   :  { %3196 = vrot.lane.b32.xlu1 %v4502_v12, %s4431_s25 }
 0xab8   :  { %2869 = vmax.xlane.f32.xlu0 %v2868_v7 }
 0xaba   :  { %3194 = vrot.lane.b32.xlu1 %v4532_v19, %s4432_s26 }
 0xabe   :  { %3321 = vrot.lane.b32.xlu1 %v4488_v8, %s4433_s27 }
 0xace   :  { %3198 = vrot.lane.b32.xlu0 %v4496_v11, %s4431_s25 }
 0xad2   :  { %3103 = vrot.lane.b32.xlu0 %v4525_v17, %s4432_s26 }
 0xad6   :  { %3192 = vrot.lane.b32.xlu0 %v4505_v13, %s4432_s26 }
 0xb2a   :  { %v2867_v60 = vpop.xlane.xlu1 %2866 }
 0xb2b   :  { %v2875_v62 = vsub.f32 %v4093_v32, %v2867_v60 }
 0xb2c   :  { %v2864_v5 = vpop.xlane.xlu0 %2863 }
 0xb2d   :  { %v2874_v44 = vsub.f32 %v2762_v6, %v2864_v5  ;;  %v2880_v14 = vmul.f32 1.442695, %v2875_v62 }
 0xb2e   :  { %v3102_v19 = vpop.permute.xlu1 %3101 }
 0xb2f   :  { %v2878_v7 = vmul.f32 1.442695, %v2874_v44 }
 0xb31   :  { %4240 = vpow2.f32 %v2878_v7 }
 0xb32   :  { %4242 = vpow2.f32 %v2880_v14  ;;  %v3197_v38 = vpop.permute.xlu1 %3196 }
 0xb36   :  { %v3195_v4 = vpop.permute.xlu1 %3194 }
 0xb3a   :  { %v3322_v62 = vpop.permute.xlu1 %3321 }
 0xb3d   :  { %v2873_v36 = vpop.xlane.xlu0 %2872 }
 0xb3e   :  { %v4911_v8 = vpop.eup %4240  ;;  %v2877_v17 = vsub.f32 %v4100_v48, %v2873_v36 }
 0xb3f   :  { %v4913_v1 = vpop.eup %4242  ;;  %4105 = vmatprep.mubr.msk.f32.mxu0 %vm352_vm2, %v4911_v8 }
 0xb40   :  { %4106 = vmatmul.mubr.msk.f32.vlgmr.msra.gmra.mxu0 %vm352_vm2, %v4913_v1  ;;  %v2884_v6 = vmul.f32 1.442695, %v2877_v17 }
 0xb41   :  { %4116 = vmatpush3.xpose.msk.msra.mxu0 %vm175_vm1, %v3108_v3  ;;  %v2870_v13 = vpop.xlane.xlu0 %2869  ;;  %4119 = vmatprep.mubr.msk.f32.mxu0 %vm175_vm1, %v3102_v19 }
 0xb42   :  { %v2876_v32 = vsub.f32 %v2853_v23, %v2870_v13  ;;  %4117 = vmatprep.subr.msk.mxu0 %vm175_vm1, %v3106_v10 }
 0xb44   :  { %v2882_v60 = vmul.f32 1.442695, %v2876_v32 }
 0xb45   :  { %4118 = vmatpush3.xpose.msk.msra.mxu0 %vm175_vm1, %v3106_v10  ;;  %v3199_v36 = vpop.permute.xlu0 %3198 }
 0xb46   :  { %4244 = vpow2.f32 %v2882_v60  ;;  %4122 = vmatprep.subr.msk.mxu1 %vm175_vm1, %v3199_v36  ;;  %4129 = vmatprep.subr.mxu0 %v3322_v62 }
 0xb47   :  { %4246 = vpow2.f32 %v2884_v6 }
 0xb49   :  { %v3104_v48 = vpop.permute.xlu0 %3103 }
 0xb4a   :  { %4120 = vmatmul.mubr.msk.f32.vlgmr.msra.gmra.mxu0 %vm175_vm1, %v3104_v48  ;;  %v790_v48 = vsel %vm352_vm2, %v4639_v43, 0.0  ;;  %v1205_v43 = vsel %vm352_vm2, %v4682_v20, 0.0  ;;  %v2465_v20 = vsel %vm352_vm2, %v4860_v61, 0.0 }
 0xb4b   :  { %4130 = vmatpush3.msra.mxu0 %v3322_v62  ;;  %v784_v62 = vsel %vm352_vm2, %v4622_v28, 0.0  ;;  %v2468_v28 = vsel %vm352_vm2, %v4862_v31, 0.0 }
 0xb4d   :  { %v3193_v5 = vpop.permute.xlu0 %3192 }
 0xb53   :  { %v4925_v3 = vpop.eup %4244 }
 0xb54   :  { %v4927_v23 = vpop.eup %4246  ;;  %4112 = vmatprep.mubr.msk.f32.mxu1 %vm352_vm2, %v4925_v3 }
 0xb55   :  { %4113 = vmatmul.mubr.msk.f32.vlgmr.msra.gmra.mxu1 %vm352_vm2, %v4927_v23 }
 0xb56   :  { %4123 = vmatpush3.xpose.msk.msra.mxu1 %vm175_vm1, %v3199_v36  ;;  %4126 = vmatprep.mubr.msk.f32.mxu1 %vm175_vm1, %v3193_v5  ;;  %v2044_v36 = vsel %vm352_vm2, %v4800_v33, 0.0  ;;  %v1211_v33 = vsel %vm352_vm2, %v4699_v37, 0.0  ;;  %v787_v37 = vsel %vm352_vm2, %v4635_v41, 0.0 }
 0xb57   :  { %4124 = vmatprep.subr.msk.mxu1 %vm175_vm1, %v3197_v38 }
 0xb5a   :  { %4125 = vmatpush3.xpose.msk.msra.mxu1 %vm175_vm1, %v3197_v38 }
 0xb5d   :  { %4127 = vmatmul.mubr.msk.f32.vlgmr.msra.gmra.mxu1 %vm175_vm1, %v3195_v4 }
 0xc00   :  { %v4938_v10 = vpop.f32.mrf.mxu0 }
 0xc02   :  { %v4940_v44 = vpop.f32.mrf.mxu0 }
 0xc0a   :  { %v4121_v14 = vpop.f32.mrf.mxu0 }
 0xc0b   :  { %v3286_v7 = vsel %vm352_vm2, %v4121_v14, -inf }
 0xc0c   :  { %3287 = vmax.xlane.f32.xlu1 %v3286_v7  ;;  %v3183_v19 = vpop.f32.mrf.mxu0 }
 0xc0d   :  { %v3283_v17 = vsel %vm352_vm2, %v3183_v19, -inf }
 0xc0e   :  { %3284 = vmax.xlane.f32.xlu0 %v3283_v17 }
 0xc15   :  { %v4944_v13 = vpop.f32.mrf.mxu1 }
 0xc17   :  { %v4946_v32 = vpop.f32.mrf.mxu1 }
 0xc1d   :  { %v4948_v6 = vpop.f32.mrf.mxu1  ;;  %3408 = vrot.lane.b32.xlu1 %v4496_v11, %s4433_s27  ;;  %v1623_v11 = vsel %vm352_vm2, %v4740_v21, 0.0  ;;  %v1202_v21 = vsel %vm352_vm2, %v4680_v18, 0.0  ;;  %v1632_v18 = vsel %vm352_vm2, %v4759_v47, 0.0  ;;  %v1629_v47 = vsel %vm352_vm2, %v4755_v42, 0.0 }
 0xc1e   :  { %v3292_v4 = vsel %vm352_vm2, %v4948_v6, -inf }
 0xc1f   :  { %3293 = vmax.xlane.f32.xlu0 %v3292_v4  ;;  %v4954_v38 = vpop.f32.mrf.mxu1 }
 0xc20   :  { %v3289_v60 = vsel %vm352_vm2, %v4954_v38, -inf }
 0xc21   :  { %3406 = vrot.lane.b32.xlu1 %v4502_v12, %s4433_s27  ;;  %v2047_v12 = vsel %vm352_vm2, %v4802_v34, 0.0  ;;  %v1626_v34 = vsel %vm352_vm2, %v4742_v22, 0.0  ;;  %v2886_v22 = vsel %vm352_vm2, %v4911_v8, 0.0 }
 0xc23   :  { %3290 = vmax.xlane.f32.xlu0 %v3289_v60 }
 0xc39   :  { %3319 = vrot.lane.b32.xlu0 %v4491_v9, %s4433_s27  ;;  %v781_v9 = vsel %vm352_vm2, %v4620_v27, 0.0  ;;  %v2889_v27 = vsel %vm352_vm2, %v4913_v1, 0.0  ;;  %v1208_v1 = vsel %vm352_vm2, %v4695_v35, 0.0 }
 0xc45   :  { %785 = vadd.xlane.f32.xlu1 %v784_v62 }
 0xc49   :  { %1624 = vadd.xlane.f32.xlu1 %v1623_v11 }
 0xc4d   :  { %2045 = vadd.xlane.f32.xlu1 %v2044_v36 }
 0xc51   :  { %2048 = vadd.xlane.f32.xlu1 %v2047_v12  ;;  %v2471_v12 = vsel %vm352_vm2, %v4875_v24, 0.0  ;;  %v2053_v24 = vsel %vm352_vm2, %v4819_v15, 0.0 }
 0xc55   :  { %791 = vadd.xlane.f32.xlu1 %v790_v48 }
 0xc58   :  { %782 = vadd.xlane.f32.xlu0 %v781_v9  ;;  %v2050_v9 = vsel %vm352_vm2, %v4815_v16, 0.0  ;;  %v2474_v16 = vsel %vm352_vm2, %v4877_v30, 0.0 }
 0xc59   :  { %2469 = vadd.xlane.f32.xlu1 %v2468_v28 }
 0xc5c   :  { %1203 = vadd.xlane.f32.xlu0 %v1202_v21  ;;  %v2892_v21 = vsel %vm352_vm2, %v4925_v3, 0.0  ;;  %v383_v3 = vsel %vm352_vm2, %v4575_v57, 0.0  ;;  %v386_v57 = vsel %vm352_vm2, %v4579_v59, 0.0 }
 0xc5d   :  { %1212 = vadd.xlane.f32.xlu1 %v1211_v33  ;;  %v2895_v33 = vsel %vm352_vm2, %v4927_v23, 0.0 }
 0xc60   :  { %1206 = vadd.xlane.f32.xlu0 %v1205_v43 }
 0xc61   :  { %2890 = vadd.xlane.f32.xlu1 %v2889_v27 }
 0xc64   :  { %1627 = vadd.xlane.f32.xlu0 %v1626_v34 }
 0xc65   :  { %1633 = vadd.xlane.f32.xlu1 %v1632_v18 }
 0xc68   :  { %788 = vadd.xlane.f32.xlu0 %v787_v37 }
 0xc6c   :  { %2466 = vadd.xlane.f32.xlu0 %v2465_v20 }
 0xc70   :  { %1209 = vadd.xlane.f32.xlu0 %v1208_v1 }
 0xc74   :  { %2887 = vadd.xlane.f32.xlu0 %v2886_v22 }
 0xc78   :  { %1630 = vadd.xlane.f32.xlu0 %v1629_v47 }
 0xc95   :  { %v3288_v31 = vpop.xlane.xlu1 %3287 }
 0xc96   :  { %v3296_v5 = vsub.f32 %v4121_v14, %v3288_v31 }
 0xc97   :  { %v3285_v41 = vpop.xlane.xlu0 %3284 }
 0xc98   :  { %v3301_v7 = vmul.f32 1.442695, %v3296_v5  ;;  %v3295_v17 = vsub.f32 %v3183_v19, %v3285_v41 }
 0xc99   :  { %v3409_v4 = vpop.permute.xlu1 %3408 }
 0xc9a   :  { %4248 = vpow2.f32 %v3301_v7  ;;  %v3299_v61 = vmul.f32 1.442695, %v3295_v17  ;;  %4136 = vmatprep.subr.mxu1 %v3409_v4 }
 0xc9b   :  { %4137 = vmatpush3.msra.mxu1 %v3409_v4 }
 0xc9c   :  { %4250 = vpow2.f32 %v3299_v61 }
 0xc9d   :  { %v3407_v35 = vpop.permute.xlu1 %3406 }
 0xc9e   :  { %4138 = vmatprep.subr.mxu1 %v3407_v35 }
 0xc9f   :  { %4139 = vmatpush3.msra.mxu1 %v3407_v35 }
 0xca7   :  { %v4249_v8 = vpop.eup %4248 }
 0xca8   :  { %v3294_v60 = vpop.xlane.xlu0 %3293  ;;  %v3310_v62 = vsel %vm352_vm2, %v4249_v8, 0.0 }
 0xca9   :  { %v4251_v42 = vpop.eup %4250  ;;  %v3298_v11 = vsub.f32 %v4948_v6, %v3294_v60  ;;  %3311 = vadd.xlane.f32.xlu1 %v3310_v62 }
 0xcaa   :  { %4133 = vmatprep.mubr.msk.f32.mxu0 %vm352_vm2, %v4251_v42  ;;  %v3307_v14 = vsel %vm352_vm2, %v4251_v42, 0.0 }
 0xcab   :  { %v3305_v19 = vmul.f32 1.442695, %v3298_v11  ;;  %3308 = vadd.xlane.f32.xlu0 %v3307_v14 }
 0xcac   :  { %v3291_v36 = vpop.xlane.xlu0 %3290 }
 0xcad   :  { %v3297_v48 = vsub.f32 %v4954_v38, %v3291_v36  ;;  %2472 = vadd.xlane.f32.xlu1 %v2471_v12  ;;  %4252 = vpow2.f32 %v3305_v19  ;;  %v377_v38 = vsel %vm352_vm2, %v4565_v52, 0.0  ;;  %v380_v52 = vsel %vm352_vm2, %v4567_v53, 0.0 }
 0xcaf   :  { %v3303_v28 = vmul.f32 1.442695, %v3297_v48  ;;  %2051 = vadd.xlane.f32.xlu0 %v2050_v9 }
 0xcb0   :  { %v3320_v6 = vpop.permute.xlu0 %3319 }
 0xcb1   :  { %4254 = vpow2.f32 %v3303_v28  ;;  %4131 = vmatprep.subr.mxu0 %v3320_v6  ;;  %2893 = vadd.xlane.f32.xlu1 %v2892_v21 }
 0xcb2   :  { %4132 = vmatpush3.msra.mxu0 %v3320_v6 }
 0xcb3   :  { %4134 = vmatmul.mubr.msk.f32.vlgmr.msra.gmra.mxu0 %vm352_vm2, %v4249_v8  ;;  %2054 = vadd.xlane.f32.xlu0 %v2053_v24 }
 0xcb5   :  { %378 = vadd.xlane.f32.xlu1 %v377_v38 }
 0xcb7   :  { %2475 = vadd.xlane.f32.xlu0 %v2474_v16 }
 0xcb9   :  { %384 = vadd.xlane.f32.xlu1 %v383_v3 }
 0xcba   :  { %v4253_v43 = vpop.eup %4252 }
 0xcbb   :  { %2896 = vadd.xlane.f32.xlu0 %v2895_v33  ;;  %v3316_v27 = vsel %vm352_vm2, %v4253_v43, 0.0 }
 0xcbe   :  { %v5020_v15 = vpop.eup %4254 }
 0xcbf   :  { %4140 = vmatprep.mubr.msk.f32.mxu1 %vm352_vm2, %v5020_v15  ;;  %3317 = vadd.xlane.f32.xlu0 %v3316_v27 }
 0xcc0   :  { %4141 = vmatmul.mubr.msk.f32.vlgmr.msra.gmra.mxu1 %vm352_vm2, %v4253_v43 }
 0xcc3   :  { %381 = vadd.xlane.f32.xlu0 %v380_v52 }
 0xcc7   :  { %387 = vadd.xlane.f32.xlu0 %v386_v57 }
 0xcce   :  { %v786_v30 = vpop.xlane.xlu1 %785 }
 0xccf   :  { %4256 = vrcp.f32 %v786_v30 }
 0xcd2   :  { %v1625_v23 = vpop.xlane.xlu1 %1624 }
 0xcd3   :  { %4258 = vrcp.f32 %v1625_v23 }
 0xcd6   :  { %v2046_v34 = vpop.xlane.xlu1 %2045 }
 0xcd7   :  { %4260 = vrcp.f32 %v2046_v34 }
 0xcda   :  { %v2049_v18 = vpop.xlane.xlu1 %2048 }
 0xcdb   :  { %4262 = vrcp.f32 %v2049_v18 }
 0xcdc   :  { %v4257_v37 = vpop.eup %4256 }
 0xcdd   :  { %v972_v20 = vmul.f32 %v4257_v37, %v4652_v45 }
 0xcde   :  { %v792_v1 = vpop.xlane.xlu1 %791 }
 0xcdf   :  { %4264 = vrcp.f32 %v792_v1  ;;  %981 = vrot.lane.b32.xlu0 %v972_v20, %s4434_s28 }
 0xce0   :  { %v4259_v53 = vpop.eup %4258 }
 0xce1   :  { %v783_v22 = vpop.xlane.xlu0 %782  ;;  %v1813_v59 = vmul.f32 %v4259_v53, %v4774_v56 }
 0xce2   :  { %4266 = vrcp.f32 %v783_v22  ;;  %v2470_v47 = vpop.xlane.xlu1 %2469 }
 0xce3   :  { %4268 = vrcp.f32 %v2470_v47  ;;  %1821 = vrot.lane.b32.xlu0 %v1813_v59, %s4435_s29 }
 0xce4   :  { %v4261_v31 = vpop.eup %4260 }
 0xce5   :  { %v2234_v5 = vmul.f32 %v4261_v31, %v4834_v26  ;;  %v5164_v31 = vld [vmem:[#allocation15_spill] sm:$0xff] }
 0xce6   :  { %v1213_v41 = vpop.xlane.xlu1 %1212 }
 0xce7   :  { %4270 = vrcp.f32 %v1213_v41  ;;  %2242 = vrot.lane.b32.xlu0 %v2234_v5, %s4436_s1 }
 0xce8   :  { %v4263_v45 = vpop.eup %4262 }
 0xce9   :  { %v2235_v7 = vmul.f32 %v4263_v45, %v4832_v25 }
 0xcea   :  { %v2891_v17 = vpop.xlane.xlu1 %2890 }
 0xceb   :  { %4272 = vrcp.f32 %v2891_v17  ;;  %2244 = vrot.lane.b32.xlu0 %v2235_v7, %s4436_s1  ;;  %v5165_v7 = vld [vmem:[#allocation13_spill] sm:$0xff] }
 0xcec   :  { %v4265_v56 = vpop.eup %4264 }
 0xced   :  { %v974_v4 = vmul.f32 %v4265_v56, %v4658_v51 }
 0xcee   :  { %v1634_v61 = vpop.xlane.xlu1 %1633 }
 0xcef   :  { %v4267_v35 = vpop.eup %4266  ;;  %4274 = vrcp.f32 %v1634_v61  ;;  %985 = vrot.lane.b32.xlu0 %v974_v4, %s4434_s28  ;;  %v5166_v4 = vld [vmem:[#allocation14_spill] sm:$0xff] }
 0xcf0   :  { %v4269_v26 = vpop.eup %4268  ;;  %v971_v8 = vmul.f32 %v4267_v35, %v4654_v46 }
 0xcf1   :  { %v2656_v60 = vmul.f32 %v4269_v26, %v4889_v58  ;;  %v1204_v58 = vpop.xlane.xlu0 %1203 }
 0xcf2   :  { %979 = vrot.lane.b32.xlu1 %v971_v8, %s4434_s28  ;;  %4276 = vrcp.f32 %v1204_v58 }
 0xcf3   :  { %2665 = vrot.lane.b32.xlu0 %v2656_v60, %s4437_s30 }
 0xcf4   :  { %v4271_v25 = vpop.eup %4270 }
 0xcf5   :  { %v1395_v62 = vmul.f32 %v4271_v25, %v4718_v49  ;;  %v1207_v14 = vpop.xlane.xlu0 %1206  ;;  %v3313_v49 = vsel %vm352_vm2, %v5020_v15, 0.0  ;;  %v3529_v25 = vld [vmem:[#allocation8 + $0x18] sm:$0xff] }
 0xcf6   :  { %4278 = vrcp.f32 %v1207_v14  ;;  %4143 = vmatprep.subr.mxu0 %v3529_v25 }
 0xcf7   :  { %1406 = vrot.lane.b32.xlu0 %v1395_v62, %s4409_s21  ;;  %4144 = vmatpush3.msra.mxu0 %v3529_v25 }
 0xcf8   :  { %v4273_v51 = vpop.eup %4272 }
 0xcf9   :  { %v3077_v42 = vmul.f32 %v4273_v51, %v4938_v10  ;;  %v1628_v19 = vpop.xlane.xlu0 %1627  ;;  %v3528_v51 = vld [vmem:[#allocation8 + $0x10] sm:$0xff] }
 0xcfa   :  { %4280 = vrcp.f32 %v1628_v19  ;;  %4145 = vmatprep.subr.mxu0 %v3528_v51 }
 0xcfb   :  { %3086 = vrot.lane.b32.xlu0 %v3077_v42, %s4438_s0  ;;  %4146 = vmatpush3.msra.mxu0 %v3528_v51  ;;  %v3527_v42 = vld [vmem:[#allocation8 + $0x8] sm:$0xff] }
 0xcfc   :  { %v4275_v11 = vpop.eup %4274  ;;  %4147 = vmatprep.subr.mxu0 %v3527_v42 }
 0xcfd   :  { %v1816_v46 = vmul.f32 %v4275_v11, %v4778_v63  ;;  %v789_v36 = vpop.xlane.xlu0 %788  ;;  %4148 = vmatpush3.msra.mxu0 %v3527_v42 }
 0xcfe   :  { %4282 = vrcp.f32 %v789_v36 }
 0xcff   :  { %1827 = vrot.lane.b32.xlu0 %v1816_v46, %s4435_s29  ;;  %v4277_v10 = vpop.eup %4276  ;;  %v3526_v46 = vld [vmem:[#allocation8] sm:$0xff] }
 0xd00   :  { %v1392_v63 = vmul.f32 %v4277_v10, %v4714_v40  ;;  %4149 = vmatprep.subr.mxu0 %v3526_v46 }
 0xd01   :  { %v2467_v12 = vpop.xlane.xlu0 %2466  ;;  %4150 = vmatpush3.msra.mxu0 %v3526_v46 }
 0xd02   :  { %4284 = vrcp.f32 %v2467_v12 }
 0xd03   :  { %v4279_v9 = vpop.eup %4278 }
 0xd04   :  { %v1393_v6 = vmul.f32 %v4279_v9, %v4712_v39  ;;  %v5167_v9 = vld [vmem:[#allocation19_spill] sm:$0xff] }
 0xd05   :  { %v1210_v48 = vpop.xlane.xlu0 %1209 }
 0xd06   :  { %4286 = vrcp.f32 %v1210_v48 }
 0xd07   :  { %v4281_v21 = vpop.eup %4280 }
 0xd08   :  { %v1814_v24 = vmul.f32 %v4281_v21, %v4772_v55  ;;  %v5168_v21 = vld [vmem:[#allocation17_spill] sm:$0xff] }
 0xd09   :  { %v2888_v28 = vpop.xlane.xlu0 %2887 }
 0xd0a   :  { %4288 = vrcp.f32 %v2888_v28 }
 0xd0b   :  { %v4283_v38 = vpop.eup %4282 }
 0xd0c   :  { %v973_v40 = vmul.f32 %v4283_v38, %v4660_v54 }
 0xd0d   :  { %v1631_v16 = vpop.xlane.xlu0 %1630 }
 0xd0e   :  { %4290 = vrcp.f32 %v1631_v16 }
 0xd0f   :  { %v4285_v3 = vpop.eup %4284 }
 0xd10   :  { %v2655_v39 = vmul.f32 %v4285_v3, %v4891_v29 }
 0xd13   :  { %v4287_v15 = vpop.eup %4286 }
 0xd14   :  { %v1394_v55 = vmul.f32 %v4287_v15, %v4720_v50 }
 0xd16   :  { %3314 = vadd.xlane.f32.xlu1 %v3313_v49 }
 0xd17   :  { %v4289_v57 = vpop.eup %4288 }
 0xd18   :  { %v3076_v54 = vmul.f32 %v4289_v57, %v4940_v44 }
 0xd1b   :  { %v4291_v34 = vpop.eup %4290 }
 0xd1c   :  { %v1815_v37 = vmul.f32 %v4291_v34, %v4780_v0 }
 0xd27   :  { %1400 = vrot.lane.b32.xlu1 %v1392_v63, %s4409_s21 }
 0xd2b   :  { %1402 = vrot.lane.b32.xlu1 %v1393_v6, %s4409_s21 }
 0xd2f   :  { %1823 = vrot.lane.b32.xlu1 %v1814_v24, %s4435_s29 }
 0xd32   :  { %v3312_v33 = vpop.xlane.xlu1 %3311 }
 0xd33   :  { %983 = vrot.lane.b32.xlu1 %v973_v40, %s4434_s28  ;;  %v5169_v40 = vld [vmem:[#allocation16_spill] sm:$0xff] }
 0xd34   :  { %v3309_v43 = vpop.xlane.xlu0 %3308 }
 0xd36   :  { %v2473_v27 = vpop.xlane.xlu1 %2472 }
 0xd37   :  { %2663 = vrot.lane.b32.xlu1 %v2655_v39, %s4437_s30 }
 0xd38   :  { %v2052_v52 = vpop.xlane.xlu0 %2051 }
 0xd3a   :  { %v2894_v30 = vpop.xlane.xlu1 %2893 }
 0xd3b   :  { %1404 = vrot.lane.b32.xlu1 %v1394_v55, %s4409_s21 }
 0xd3c   :  { %v2055_v23 = vpop.xlane.xlu0 %2054 }
 0xd3e   :  { %v379_v18 = vpop.xlane.xlu1 %378 }
 0xd3f   :  { %4292 = vrcp.f32 %v379_v18  ;;  %3084 = vrot.lane.b32.xlu1 %v3076_v54, %s4438_s0 }
 0xd40   :  { %v2476_v29 = vpop.xlane.xlu0 %2475 }
 0xd42   :  { %v385_v20 = vpop.xlane.xlu1 %384 }
 0xd43   :  { %4294 = vrcp.f32 %v385_v20  ;;  %1825 = vrot.lane.b32.xlu1 %v1815_v37, %s4435_s29 }
 0xd44   :  { %v2897_v50 = vpop.xlane.xlu0 %2896 }
 0xd48   :  { %v5068_v1 = vpop.xlane.xlu0 %3317 }
 0xd4c   :  { %v4293_v53 = vpop.eup %4292  ;;  %v382_v22 = vpop.xlane.xlu0 %381 }
 0xd4d   :  { %4296 = vrcp.f32 %v382_v22  ;;  %v567_v44 = vmul.f32 %v4293_v53, %v4596_v2 }
 0xd4f   :  { %571 = vst.msk [vmem:[#allocation2] sm:$0xff] %vm175_vm1, %v567_v44 }
 0xd50   :  { %v4295_v59 = vpop.eup %4294  ;;  %v388_v47 = vpop.xlane.xlu0 %387 }
 0xd51   :  { %4298 = vrcp.f32 %v388_v47  ;;  %v569_v5 = vmul.f32 %v4295_v59, %v5164_v31 }
 0xd52   :  { %4300 = vrcp.f32 %v3312_v33 }
 0xd53   :  { %573 = vst.msk [vmem:[#allocation2 + $0x10] sm:$0xff] %vm175_vm1, %v569_v5  ;;  %4302 = vrcp.f32 %v3309_v43  ;;  %v5170_v43 = vld [vmem:[#allocation18_spill] sm:$0xff] }
 0xd54   :  { %v982_v0 = vpop.permute.xlu0 %981  ;;  %4304 = vrcp.f32 %v2473_v27 }
 0xd55   :  { %4306 = vrcp.f32 %v2052_v52 }
 0xd56   :  { %4308 = vrcp.f32 %v2894_v30 }
 0xd57   :  { %4310 = vrcp.f32 %v2055_v23 }
 0xd58   :  { %v5074_v41 = vpop.permute.xlu0 %1821  ;;  %4312 = vrcp.f32 %v2476_v29 }
 0xd59   :  { %4314 = vrcp.f32 %v2897_v50 }
 0xd5a   :  { %v4297_v45 = vpop.eup %4296  ;;  %4316 = vrcp.f32 %v5068_v1 }
 0xd5b   :  { %v568_v17 = vmul.f32 %v4297_v45, %v5165_v7 }
 0xd5c   :  { %v5077_v56 = vpop.permute.xlu0 %2242 }
 0xd5d   :  { %572 = vst.msk [vmem:[#allocation2 + $0x8] sm:$0xff] %vm175_vm1, %v568_v17 }
 0xd5e   :  { %v4299_v2 = vpop.eup %4298  ;;  %993 = vst.msk [vmem:[#allocation2 + $0x8] sm:$0xff] %vm991_vm3, %v982_v0 }
 0xd5f   :  { %v570_v61 = vmul.f32 %v4299_v2, %v5166_v4  ;;  %v4301_v58 = vpop.eup %4300  ;;  %v3756_v4 = vld [vmem:[%s5155_s3] ss:$0 sm:$0xff]  ;;  %s4380_s3 = scalar_lea.vmem %s3644_s8, 512 }
 0xd60   :  { %v5082_v35 = vpop.permute.xlu0 %2244  ;;  %v4303_v19 = vpop.eup %4302  ;;  %p4381_p1 = scmp.ne.s32.totalorder %s3644_s8, %s4380_s3  ;;  %p4386_p3 = scmp.lt.s32.totalorder %s4380_s3, %s4380_s3 }
 0xd61   :  { %574 = vst.msk [vmem:[#allocation2 + $0x18] sm:$0xff] %vm175_vm1, %v570_v61  ;;  %v4305_v12 = vpop.eup %4304 }
 0xd62   :  { %v4307_v63 = vpop.eup %4306  ;;  %v2657_v28 = vmul.f32 %v4305_v12, %v5167_v9  ;;  %p4387_p4 = por %p4386_p3, %p4385_p2 }
 0xd63   :  { %v4309_v6 = vpop.eup %4308  ;;  %v2236_v24 = vmul.f32 %v4307_v63, %v5168_v21 }
 0xd64   :  { %v980_v26 = vpop.permute.xlu1 %979  ;;  %v986_v8 = vpop.permute.xlu0 %985  ;;  %v3078_v16 = vmul.f32 %v4309_v6, %v4946_v32  ;;  %p4388_p5 = pnand %p4387_p4, %p4381_p1 }
 0xd65   :  { %992 = vst.msk [vmem:[#allocation2] sm:$0xff] %vm991_vm3, %v980_v26  ;;  %995 = vst.msk [vmem:[#allocation2 + $0x18] sm:$0xff] %vm991_vm3, %v986_v8  ;;  %v4311_v38 = vpop.eup %4310 }
 0xd66   :  { %v2237_v3 = vmul.f32 %v4311_v38, %v5169_v40  ;;  %v4313_v33 = vpop.eup %4312 }
 0xd67   :  { %v2658_v39 = vmul.f32 %v4313_v33, %v5170_v43  ;;  %v4315_v15 = vpop.eup %4314 }
 0xd68   :  { %v5087_v60 = vpop.permute.xlu0 %2665  ;;  %v3079_v27 = vmul.f32 %v4315_v15, %v4944_v13  ;;  %v4317_v55 = vpop.eup %4316 }
 0xd6c   :  { %v1407_v62 = vpop.permute.xlu0 %1406 }
 0xd6d   :  { %1416 = vst.msk [vmem:[#allocation2 + $0x18] sm:$0xff] %vm1412_vm4, %v1407_v62 }
 0xd70   :  { %v3087_v11 = vpop.permute.xlu0 %3086 }
 0xd73   :  { %v4135_v14 = vpop.f32.mrf.mxu0 }
 0xd74   :  { %v3498_v49 = vmul.f32 %v4301_v58, %v4135_v14  ;;  %v1828_v36 = vpop.permute.xlu0 %1827 }
 0xd75   :  { %v3397_v10 = vpop.f32.mrf.mxu0  ;;  %1837 = vst.msk [vmem:[#allocation2 + $0x18] sm:$0xff] %vm1833_vm5, %v1828_v36 }
 0xd76   :  { %v3497_v48 = vmul.f32 %v4303_v19, %v3397_v10  ;;  %3507 = vrot.lane.b32.xlu0 %v3498_v49, %s4439_s2 }
 0xd78   :  { %3505 = vrot.lane.b32.xlu1 %v3497_v48, %s4439_s2 }
 0xd7a   :  { %2667 = vrot.lane.b32.xlu0 %v2657_v28, %s4437_s30 }
 0xd7c   :  { %2246 = vrot.lane.b32.xlu1 %v2236_v24, %s4436_s1 }
 0xd7e   :  { %3088 = vrot.lane.b32.xlu0 %v3078_v16, %s4438_s0 }
 0xd80   :  { %2248 = vrot.lane.b32.xlu1 %v2237_v3, %s4436_s1  ;;  %v4142_v52 = vpop.f32.mrf.mxu1 }
 0xd81   :  { %v3500_v57 = vmul.f32 %v4317_v55, %v4142_v52 }
 0xd82   :  { %v3484_v34 = vpop.f32.mrf.mxu1 }
 0xd84   :  { %2669 = vrot.lane.b32.xlu1 %v2658_v39, %s4437_s30 }
 0xd88   :  { %3090 = vrot.lane.b32.xlu1 %v3079_v27, %s4438_s0 }
 0xd8c   :  { %3511 = vrot.lane.b32.xlu1 %v3500_v57, %s4439_s2 }
 0xd9f   :  { %v3315_v32 = vpop.xlane.xlu1 %3314 }
 0xda0   :  { %4318 = vrcp.f32 %v3315_v32 }
 0xda3   :  { %v1401_v30 = vpop.permute.xlu1 %1400 }
 0xda4   :  { %1413 = vst.msk [vmem:[#allocation2] sm:$0xff] %vm1412_vm4, %v1401_v30 }
 0xda5   :  { %1834 = vst.msk [vmem:[#allocation2] sm:$0xff] %vm1833_vm5, %v5074_v41 }
 0xda6   :  { %2255 = vst.msk [vmem:[#allocation2] sm:$0xff] %vm2254_vm6, %v5077_v56 }
 0xda7   :  { %v1403_v13 = vpop.permute.xlu1 %1402 }
 0xda8   :  { %1414 = vst.msk [vmem:[#allocation2 + $0x8] sm:$0xff] %vm1412_vm4, %v1403_v13 }
 0xdab   :  { %v1824_v23 = vpop.permute.xlu1 %1823 }
 0xdac   :  { %1835 = vst.msk [vmem:[#allocation2 + $0x8] sm:$0xff] %vm1833_vm5, %v1824_v23 }
 0xdad   :  { %v4319_v54 = vpop.eup %4318  ;;  %2256 = vst.msk [vmem:[#allocation2 + $0x8] sm:$0xff] %vm2254_vm6, %v5082_v35 }
 0xdae   :  { %v3499_v18 = vmul.f32 %v4319_v54, %v3484_v34  ;;  %2677 = vst.msk [vmem:[#allocation2 + $0x8] sm:$0xff] %vm2675_vm7, %v5087_v60 }
 0xdaf   :  { %v984_v29 = vpop.permute.xlu1 %983  ;;  %3098 = vst.msk [vmem:[#allocation2 + $0x8] sm:$0xff] %vm3096_vm8, %v3087_v11 }
 0xdb0   :  { %994 = vst.msk [vmem:[#allocation2 + $0x10] sm:$0xff] %vm991_vm3, %v984_v29  ;;  %3509 = vrot.lane.b32.xlu0 %v3499_v18, %s4439_s2 }
 0xdb3   :  { %v2664_v37 = vpop.permute.xlu1 %2663 }
 0xdb4   :  { %2676 = vst.msk [vmem:[#allocation2] sm:$0xff] %vm2675_vm7, %v2664_v37 }
 0xdb7   :  { %v1405_v20 = vpop.permute.xlu1 %1404 }
 0xdb8   :  { %1415 = vst.msk [vmem:[#allocation2 + $0x10] sm:$0xff] %vm1412_vm4, %v1405_v20 }
 0xdbb   :  { %v3085_v50 = vpop.permute.xlu1 %3084 }
 0xdbc   :  { %3097 = vst.msk [vmem:[#allocation2] sm:$0xff] %vm3096_vm8, %v3085_v50 }
 0xdbf   :  { %v1826_v1 = vpop.permute.xlu1 %1825 }
 0xdc0   :  { %1836 = vst.msk [vmem:[#allocation2 + $0x10] sm:$0xff] %vm1833_vm5, %v1826_v1 }
 0xde8   :  { %v3508_v53 = vpop.permute.xlu0 %3507 }
 0xde9   :  { %3519 = vst.msk [vmem:[#allocation2 + $0x8] sm:$0xff] %vm3517_vm9, %v3508_v53 }
 0xdea   :  { %v3506_v22 = vpop.permute.xlu1 %3505 }
 0xdeb   :  { %3518 = vst.msk [vmem:[#allocation2] sm:$0xff] %vm3517_vm9, %v3506_v22 }
 0xdec   :  { %v2668_v44 = vpop.permute.xlu0 %2667 }
 0xdee   :  { %v2247_v59 = vpop.permute.xlu1 %2246 }
 0xdef   :  { %2257 = vst.msk [vmem:[#allocation2 + $0x10] sm:$0xff] %vm2254_vm6, %v2247_v59 }
 0xdf0   :  { %2678 = vst.msk [vmem:[#allocation2 + $0x10] sm:$0xff] %vm2675_vm7, %v2668_v44  ;;  %v3089_v47 = vpop.permute.xlu0 %3088  ;;  %v3523_v0 = vld [vmem:[#allocation2 + $0x8] sm:$0xff] }
 0xdf1   :  { %3099 = vst.msk [vmem:[#allocation2 + $0x10] sm:$0xff] %vm3096_vm8, %v3089_v47 }
 0xdf2   :  { %v2249_v31 = vpop.permute.xlu1 %2248  ;;  %v3522_v5 = vld [vmem:[#allocation2] sm:$0xff] }
 0xdf3   :  { %2258 = vst.msk [vmem:[#allocation2 + $0x18] sm:$0xff] %vm2254_vm6, %v2249_v31  ;;  %4151 = vmatprep.mubr.msk.f32.mxu0 %vm67_vm0, %v3522_v5 }
 0xdf4   :  { %4152 = vmatmul.mubr.msk.f32.vlgmr.msra.gmra.mxu0 %vm67_vm0, %v3523_v0 }
 0xdf6   :  { %v2670_v41 = vpop.permute.xlu1 %2669 }
 0xdf7   :  { %2679 = vst.msk [vmem:[#allocation2 + $0x18] sm:$0xff] %vm2675_vm7, %v2670_v41 }
 0xdfa   :  { %v3091_v45 = vpop.permute.xlu1 %3090 }
 0xdfb   :  { %3100 = vst.msk [vmem:[#allocation2 + $0x18] sm:$0xff] %vm3096_vm8, %v3091_v45 }
 0xdfe   :  { %v3512_v7 = vpop.permute.xlu1 %3511 }
 0xdff   :  { %3521 = vst.msk [vmem:[#allocation2 + $0x18] sm:$0xff] %vm3517_vm9, %v3512_v7 }
 0xe06   :  { %v3525_v2 = vld [vmem:[#allocation2 + $0x18] sm:$0xff] }
 0xe22   :  { %v3510_v17 = vpop.permute.xlu0 %3509 }
 0xe23   :  { %3520 = vst.msk [vmem:[#allocation2 + $0x10] sm:$0xff] %vm3517_vm9, %v3510_v17 }
 0xe2a   :  { %v3524_v56 = vld [vmem:[#allocation2 + $0x10] sm:$0xff] }
 0xe2b   :  { %4154 = vmatprep.mubr.msk.f32.mxu0 %vm67_vm0, %v3524_v56 }
 0xe2c   :  { %4155 = vmatmul.mubr.msk.f32.gmra.mxu0 %vm67_vm0, %v3525_v2 }
 0xeb4   :  { %v4153_v61 = vpop.f32.mrf.mxu0 }
 0xeb5   :  { %v3621_v35 = vadd.f32 %v4153_v61, %v3756_v4 }
 0xeb6   :  { %v3615_v26 = vpop.f32.mrf.mxu0 }
 0xeb7   :  { %3635 = vst.msk [vmem:[#allocation9 + $0x8] sm:$0xff] %vm67_vm0, %v3621_v35  ;;  %v3616_v8 = vadd.f32 %v3756_v4, %v3615_v26 }
 0xeb9   :  { %3634 = vst.msk [vmem:[#allocation9] sm:$0xff] %vm67_vm0, %v3616_v8 }
 0xeec   :  { %v4156_v60 = vpop.f32.mrf.mxu0 }
 0xeed   :  { %v3631_v25 = vadd.f32 %v4156_v60, %v3756_v4 }
 0xeee   :  { %v3625_v62 = vpop.f32.mrf.mxu0 }
 0xeef   :  { %3637 = vst.msk [vmem:[#allocation9 + $0x18] sm:$0xff] %vm67_vm0, %v3631_v25  ;;  %v3626_v51 = vadd.f32 %v3756_v4, %v3625_v62 }
 0xef1   :  { %3636 = vst.msk [vmem:[#allocation9 + $0x10] sm:$0xff] %vm67_vm0, %v3626_v51 }
 0xef2   :  { %4391 = shalt.err (!%p4388_p5)
}
 0xef3   :  { %3649 = dma.vmem_to_hbm [thread:$0]  %s3644_s8, 512, %s5156_s4, [#allocation5], %s4408_s20, %s4408_s20, %s4409_s21  }
 0xef4   :  { %4404 = dma.done.wait [#allocation5], 512  }
 0xef5   :  { %4405 = vsyncadd [#allocation5], 4294966784 }
 0xef6   :  { %3653 = vsyncpa [#allocation4], 1 }
 0xef7   :  { %3654 = vsyncpa [#allocation7], 1 }
 0xef8   :  { %3655 = vsyncpa [#allocation5], 1 }

</bundles_post_ra>
